<compile_context>
chip_gen: v5e
topology: v5e:2x2
jax: 0.10.0
libtpu: 0.0.40
codegen_flags: <defaults>
</compile_context>

<pallas_src>
from collections import namedtuple

import numpy as np
import jax
import jax.numpy as jnp
from jax.experimental import pallas as pl
from jax.experimental.pallas import tpu as pltpu

MultiAspectEmbedding = namedtuple("MultiAspectEmbedding", ["structural", "temporal"])

LANE = 128   # TPU lane width  (last dim)
SUB = 8      # TPU sublane width (second-to-last dim)


def _ceil_to(x, m):
    return ((x + m - 1) // m) * m


def _cdiv(a, b):
    return (a + b - 1) // b


def _pad2(x, rows, cols):
    return jnp.pad(x, ((0, rows - x.shape[0]), (0, cols - x.shape[1])))


def _tpu_vmem_bytes():
    try:
        return int(pltpu.get_tpu_info().vmem_capacity_bytes)
    except Exception:
        return 64 * 2 ** 20          # conservative (v7x per-TC) default


def _choose_rel_chunk(n_pad, dmax, hd_p, num_rels, budget_bytes):
    """Pick relations-per-chunk Rc so the per-step VMEM footprint fits."""
    bf, f4 = 2, 4
    fixed = (2 * bf * n_pad * dmax                # H (double-buffered)
             + 2 * bf * n_pad * hd_p              # h_prev
             + 2 * bf * dmax * hd_p               # W_self
             + 2 * f4 * hd_p                      # bias
             + 2 * bf * 2 * hd_p * 4 * hd_p       # GRU W
             + 2 * f4 * 4 * hd_p                  # GRU b
             + 2 * f4 * n_pad * hd_p              # output
             + f4 * n_pad * hd_p                  # acc scratch
             + bf * n_pad * dmax)                 # x1 scratch
    per_rel = (2 * bf * n_pad * n_pad             # adjacency chunk (dbl-buf)
               + 2 * bf * dmax * hd_p             # W_rel chunk (dbl-buf)
               + bf * n_pad * hd_p                # hw scratch
               + f4 * n_pad * hd_p)               # wide intermediate
    avail = max(budget_bytes - fixed, per_rel)
    return max(1, min(num_rels, int(avail // per_rel)))


# ---------------------------------------------------------------------------
# Pallas kernels
# ---------------------------------------------------------------------------
def _rgcn_gru_kernel(h_ref, wr_ref, ws_ref, b_ref, wg_ref, bg_ref,
                     a_ref, hp_ref, o_ref, hw_ref, acc_ref, x1_ref):
    """Two RGCN layers (relation-chunked deep-K matmul) + fused 1-step GRU.

    Grid = (branch b, layer l, relation-chunk k).
    branch 0 = structural, 1 = temporal fwd, 2 = temporal rev.
    """
    f32, bf16 = jnp.float32, jnp.bfloat16
    l = pl.program_id(1)
    k = pl.program_id(2)
    last_k = pl.num_programs(2) - 1
    n_pad, dmax = h_ref.shape
    hd_p = o_ref.shape[1]
    rc = a_ref.shape[1] // n_pad                 # relations in this chunk

    # Current layer input lives in x1_ref: H for layer 0, layer-0 output for
    # layer 1.
    @pl.when((l == 0) & (k == 0))
    def _():
        x1_ref[...] = h_ref[...]

    @pl.when(k == 0)
    def _():
        acc_ref[...] = jnp.zeros_like(acc_ref)

    x = x1_ref[...]                              # (n_pad, dmax) bf16

    # One wide matmul over the whole relation chunk, restacked into the
    # deep-K layout hw[r*n_pad:(r+1)*n_pad, :] = X @ W_r  (128-aligned slabs).
    wide = jnp.dot(x, wr_ref[...], preferred_element_type=f32)
    for r in range(rc):
        hw_ref[r * n_pad:(r + 1) * n_pad, :] = (
            wide[:, r * hd_p:(r + 1) * hd_p].astype(bf16))

    # One deep-K MXU pass per chunk: K = rc * n_pad.
    acc_ref[...] += jnp.dot(a_ref[...], hw_ref[...], preferred_element_type=f32)

    @pl.when(k == last_k)
    def _():
        # Self-loop (plain matmul) + bias epilogue.
        # NOTE: padded node rows (>= nb) of y equal the bias; this never leaks
        # into real rows because padded-src adjacency columns are identically
        # zero and outputs are sliced to :nb in the wrapper.
        y = (acc_ref[...]
             + jnp.dot(x, ws_ref[...], preferred_element_type=f32)
             + b_ref[...])                       # activation=None, dropout=0.0

        @pl.when(l == 0)
        def _():
            x1_ref[:, 0:hd_p] = y.astype(bf16)
            if dmax > hd_p:                      # static
                x1_ref[:, hd_p:] = jnp.zeros((n_pad, dmax - hd_p), bf16)

        @pl.when(l == 1)
        def _():
            # Fused single-step GRU (PyTorch gate order r, z, n):
            # ONE K = 2*hd_p matmul on [x2 | h_prev] against the packed
            # weight  [[W_ir^T W_iz^T W_in^T   0   ],
            #          [W_hr^T W_hz^T   0    W_hn^T]].
            hp = hp_ref[...]
            xh = jnp.concatenate([y.astype(bf16), hp], axis=-1)
            g = (jnp.dot(xh, wg_ref[...], preferred_element_type=f32)
                 + bg_ref[...])
            hpf = hp.astype(f32)
            r_g = jax.nn.sigmoid(g[:, 0:hd_p])
            z_g = jax.nn.sigmoid(g[:, hd_p:2 * hd_p])
            n_g = jnp.tanh(g[:, 2 * hd_p:3 * hd_p] + r_g * g[:, 3 * hd_p:4 * hd_p])
            o_ref[...] = ((1.0 - z_g) * n_g + z_g * hpf).astype(o_ref.dtype)


def rgcn_gru_fused(h_all, w_rel_all, w_self_all, b_all, wg_all, bg_all,
                   a_all, hprev_all, rel_chunk, vmem_limit):
    """One pallas_call for all three branches: grid=(3, 2 layers, rel chunks)."""
    B, n_pad, hd_p = hprev_all.shape
    dmax = h_all.shape[-1]
    r_pad = w_rel_all.shape[-1] // hd_p
    rc = rel_chunk
    kc = r_pad // rc

    def bt(b):                                   # branch type: 0=struct, 1=temporal
        return jnp.minimum(b, 1)

    grid_spec = pltpu.PrefetchScalarGridSpec(
        num_scalar_prefetch=0,
        grid=(B, 2, kc),
        in_specs=[
            pl.BlockSpec((None, n_pad, dmax), lambda b, l, k: (bt(b), 0, 0)),          # H
            pl.BlockSpec((None, None, dmax, rc * hd_p),
                         lambda b, l, k: (bt(b), l, 0, k)),                            # W_rel chunk
            pl.BlockSpec((None, None, dmax, hd_p), lambda b, l, k: (bt(b), l, 0, 0)),  # W_self
            pl.BlockSpec((None, None, 1, hd_p), lambda b, l, k: (bt(b), l, 0, 0)),     # bias
            pl.BlockSpec((None, 2 * hd_p, 4 * hd_p), lambda b, l, k: (bt(b), 0, 0)),   # GRU W
            pl.BlockSpec((None, 1, 4 * hd_p), lambda b, l, k: (bt(b), 0, 0)),          # GRU b
            pl.BlockSpec((None, n_pad, rc * n_pad), lambda b, l, k: (b, 0, k)),        # A chunk
            pl.BlockSpec((None, n_pad, hd_p), lambda b, l, k: (b, 0, 0)),              # h_prev
        ],
        out_specs=pl.BlockSpec((None, n_pad, hd_p), lambda b, l, k: (b, 0, 0)),
        scratch_shapes=[pltpu.VMEM((rc * n_pad, hd_p), jnp.bfloat16),   # hw (deep-K RHS)
                        pltpu.VMEM((n_pad, hd_p), jnp.float32),         # msg accumulator
                        pltpu.VMEM((n_pad, dmax), jnp.bfloat16)],       # layer input / x1
    )
    return pl.pallas_call(
        _rgcn_gru_kernel,
        out_shape=jax.ShapeDtypeStruct((B, n_pad, hd_p), jnp.float32),
        grid_spec=grid_spec,
        compiler_params=pltpu.CompilerParams(
            dimension_semantics=("parallel", "arbitrary", "arbitrary"),
            vmem_limit_bytes=vmem_limit),
    )(h_all, w_rel_all, w_self_all, b_all, wg_all, bg_all, a_all, hprev_all)


def _relation_rnn_kernel(oh_ref, emb_ref, hp_ref, wx_ref, wh_ref, b_ref,
                         o_ref, avg_ref):
    """scatter_mean-by-relation (edge-chunked matmul, f32 accumulator) + the
    4 single-step tanh-RNN cells as TWO block-diagonal matmuls and ONE
    lane-dense (r_p, 4*rd_p) store."""
    f32, bf16 = jnp.float32, jnp.bfloat16
    k = pl.program_id(0)

    @pl.when(k == 0)
    def _():
        avg_ref[...] = jnp.zeros_like(avg_ref)

    # One (R, Ec) @ (Ec, 4*D) matmul per edge chunk; the one-hot is pre-scaled
    # by 1/count(rel) in the wrapper.
    avg_ref[...] += jnp.dot(oh_ref[...], emb_ref[...], preferred_element_type=f32)

    @pl.when(k == pl.num_programs(0) - 1)
    def _():
        x = avg_ref[...].astype(bf16)
        g = (jnp.dot(x, wx_ref[...], preferred_element_type=f32)
             + jnp.dot(hp_ref[...], wh_ref[...], preferred_element_type=f32)
             + b_ref[...])
        o_ref[...] = jnp.tanh(g).astype(o_ref.dtype)


def relation_rnn_fused(onehot, emb_cat, hprev, wx_bd, wh_bd, b_bd,
                       edge_chunk, vmem_limit):
    r_p, e_p = onehot.shape
    d4 = emb_cat.shape[1]
    rd4 = wh_bd.shape[0]
    ke = e_p // edge_chunk
    grid_spec = pltpu.PrefetchScalarGridSpec(
        num_scalar_prefetch=0,
        grid=(ke,),
        in_specs=[
            pl.BlockSpec((r_p, edge_chunk), lambda k: (0, k)),
            pl.BlockSpec((edge_chunk, d4), lambda k: (k, 0)),
            pl.BlockSpec((r_p, rd4), lambda k: (0, 0)),
            pl.BlockSpec((d4, rd4), lambda k: (0, 0)),
            pl.BlockSpec((rd4, rd4), lambda k: (0, 0)),
            pl.BlockSpec((1, rd4), lambda k: (0, 0)),
        ],
        out_specs=pl.BlockSpec((r_p, rd4), lambda k: (0, 0)),
        scratch_shapes=[pltpu.VMEM((r_p, d4), jnp.float32)],
    )
    return pl.pallas_call(
        _relation_rnn_kernel,
        out_shape=jax.ShapeDtypeStruct((r_p, rd4), jnp.float32),
        grid_spec=grid_spec,
        compiler_params=pltpu.CompilerParams(
            dimension_semantics=("arbitrary",),
            vmem_limit_bytes=vmem_limit),
    )(onehot, emb_cat, hprev, wx_bd, wh_bd, b_bd)


# ---------------------------------------------------------------------------
# Glue
# ---------------------------------------------------------------------------
def build_adjacency_cat(src, dst, rel, edge_norm, r_pad, n_pad):
    """A_cat[dst, rel*n_pad + src] += edge_norm (dense; kernel reads bf16)."""
    a = jnp.zeros((n_pad, r_pad * n_pad), jnp.float32)
    return a.at[dst, rel * n_pad + src].add(edge_norm)


def time_interval_transform(t):
    return jnp.log1p(jnp.maximum(t, 0.0))


def embedding_updater_forward(graph, prepared, static_entity_emb, dynamic_entity_emb,
                              dynamic_relation_emb, node_latest_event_time,
                              rel_chunk=None, edge_chunk=None):
    (in_dim, hid_dim, rel_dim, d_in_p, hd_p, rd_p, dmax) = prepared["dims"]
    bf16 = jnp.bfloat16
    src, dst, rel, etime, nid = graph["src"], graph["dst"], graph["rel"], graph["time"], graph["nid"]
    num_rels = graph["num_rels"]
    nb = nid.shape[0]
    e = src.shape[0]
    # n_pad is 128-aligned so every adjacency chunk's lane dim (Rc*n_pad) is
    # a multiple of 128 (lane-dense, unmasked vst / vld).
    n_pad = _ceil_to(nb, LANE)

    src_j = jnp.asarray(src, jnp.int32)
    dst_j = jnp.asarray(dst, jnp.int32)
    rel_j = jnp.asarray(rel, jnp.int32)
    time_j = jnp.asarray(etime, jnp.float32)
    nid_j = jnp.asarray(nid, jnp.int32)

    # ---- VMEM budget / chunk sizing (re-derived per chip: v5e/v6e/v7x) ----
    vmem_cap = _tpu_vmem_bytes()
    vmem_limit = int(min(vmem_cap, 128 * 2 ** 20) * 3 // 4)
    if rel_chunk is None:
        rel_chunk = _choose_rel_chunk(n_pad, dmax, hd_p, num_rels, vmem_limit // 2)
    rel_chunk = max(1, min(rel_chunk, num_rels))
    kc = _cdiv(num_rels, rel_chunk)
    r_pad = kc * rel_chunk

    # -------- adjacencies (structural, temporal fwd, temporal rev) --------
    in_deg = jnp.zeros((nb,), jnp.float32).at[dst_j].add(1.0)
    node_norm = 1.0 / jnp.maximum(in_deg, 1.0)               # comp_deg_norm
    edge_norm_struct = node_norm[dst_j]

    nlet0 = node_latest_event_time[:, :, 0]
    nlet1 = node_latest_event_time[:, :, 1]
    batch_latest0 = nlet0[nid_j]
    batch_latest1 = nlet1[nid_j]
    inter_fwd = time_j - batch_latest0[dst_j, nid_j[src_j]]
    inter_rev = time_j - batch_latest1[src_j, nid_j[dst_j]]  # reverse graph
    norm_fwd = jnp.minimum(1.0 / jnp.maximum(time_interval_transform(inter_fwd), 1e-10), 10.0)
    norm_rev = jnp.minimum(1.0 / jnp.maximum(time_interval_transform(inter_rev), 1e-10), 10.0)

    a_all = jnp.stack([
        build_adjacency_cat(src_j, dst_j, rel_j, edge_norm_struct, r_pad, n_pad),
        build_adjacency_cat(src_j, dst_j, rel_j, norm_fwd, r_pad, n_pad),
        build_adjacency_cat(dst_j, src_j, rel_j, norm_rev, r_pad, n_pad),
    ], axis=0).astype(bf16)                                  # (3, n, R_pad*n)

    # -------- node features / RNN hidden states (bf16 MXU operands) --------
    h_all = jnp.stack([
        _pad2(static_entity_emb.structural[nid_j], n_pad, dmax),
        _pad2(static_entity_emb.temporal[nid_j], n_pad, dmax)], axis=0).astype(bf16)
    hprev_all = jnp.stack([
        _pad2(dynamic_entity_emb.structural[nid_j, 0], n_pad, hd_p),
        _pad2(dynamic_entity_emb.temporal[nid_j, 0, :, 0], n_pad, hd_p),
        _pad2(dynamic_entity_emb.temporal[nid_j, 0, :, 1], n_pad, hd_p)], axis=0).astype(bf16)

    w_rel_all, w_self_all, b_all, wg_all, bg_all = prepared["rgcn_gru"]
    if r_pad > num_rels:
        w_rel_all = jnp.pad(
            w_rel_all, ((0, 0), (0, 0), (0, 0), (0, (r_pad - num_rels) * hd_p)))

    out = rgcn_gru_fused(h_all, w_rel_all, w_self_all, b_all, wg_all, bg_all,
                         a_all, hprev_all, rel_chunk, vmem_limit)   # (3, n, hd)
    batch_structural_dynamic = out[0, :nb, :hid_dim][:, None, :]
    batch_temporal_dynamic = jnp.stack(
        [out[1, :nb, :hid_dim], out[2, :nb, :hid_dim]], axis=-1)[:, None, :, :]

    # -------- node_latest_event_time update (functional) --------
    seg_max_fwd = jnp.maximum(jax.ops.segment_max(time_j, dst_j, num_segments=nb), 0.0)
    max_evt_fwd = jnp.maximum(seg_max_fwd, batch_latest0[:, -1])
    nlet0_new = nlet0.at[nid_j[dst_j], nid_j[src_j]].set(time_j)
    nlet0_new = nlet0_new.at[nid_j, -1].set(max_evt_fwd)
    seg_max_rev = jnp.maximum(jax.ops.segment_max(time_j, src_j, num_segments=nb), 0.0)
    max_evt_rev = jnp.maximum(seg_max_rev, batch_latest1[:, -1])
    nlet1_new = nlet1.at[nid_j[src_j], nid_j[dst_j]].set(time_j)
    nlet1_new = nlet1_new.at[nid_j, -1].set(max_evt_rev)
    updated_node_latest_event_time = jnp.stack([nlet0_new, nlet1_new], axis=-1)

    # -------- relation RNNs: fused scatter_mean + block-diag RNN steps --------
    counts = jnp.zeros((num_rels,), jnp.float32).at[rel_j].add(1.0)
    inv_count = 1.0 / jnp.maximum(counts, 1.0)
    r_p = _ceil_to(num_rels, SUB)
    if edge_chunk is None:
        edge_chunk = min(2048, _ceil_to(e, LANE))
    edge_chunk = _ceil_to(edge_chunk, LANE)
    e_p = _ceil_to(e, edge_chunk)

    onehot = jnp.zeros((r_p, e_p), jnp.float32).at[
        rel_j, jnp.arange(e)].set(inv_count[rel_j]).astype(bf16)   # scaled one-hot

    src_nid = nid_j[src_j]
    dst_nid = nid_j[dst_j]
    emb_cat = jnp.concatenate([
        _pad2(static_entity_emb.structural[src_nid], e, d_in_p),
        _pad2(static_entity_emb.structural[dst_nid], e, d_in_p),
        _pad2(static_entity_emb.temporal[src_nid], e, d_in_p),
        _pad2(static_entity_emb.temporal[dst_nid], e, d_in_p)], axis=1)
    emb_cat = jnp.pad(emb_cat, ((0, e_p - e), (0, 0))).astype(bf16)

    hprev_rel = jnp.concatenate([
        _pad2(dynamic_relation_emb.structural[:, 0, :, 0], r_p, rd_p),
        _pad2(dynamic_relation_emb.structural[:, 0, :, 1], r_p, rd_p),
        _pad2(dynamic_relation_emb.temporal[:, 0, :, 0], r_p, rd_p),
        _pad2(dynamic_relation_emb.temporal[:, 0, :, 1], r_p, rd_p)], axis=1).astype(bf16)

    wx_bd, wh_bd, b_bd = prepared["rel_rnn"]
    rel_out = relation_rnn_fused(onehot, emb_cat, hprev_rel, wx_bd, wh_bd, b_bd,
                                 edge_chunk, vmem_limit)           # (r_p, 4*rd_p)

    # np.unique on host: the batch's relation set must be static for the table
    # scatter below (same data-dependent indexing as the PyTorch module).
    uniq_rel_j = jnp.asarray(np.unique(np.asarray(rel)), jnp.int32)
    new_ss = rel_out[:, 0 * rd_p:0 * rd_p + rel_dim][uniq_rel_j]
    new_sd = rel_out[:, 1 * rd_p:1 * rd_p + rel_dim][uniq_rel_j]
    new_ts = rel_out[:, 2 * rd_p:2 * rd_p + rel_dim][uniq_rel_j]
    new_td = rel_out[:, 3 * rd_p:3 * rd_p + rel_dim][uniq_rel_j]
    batch_struct_rel = jnp.stack([new_ss, new_sd], axis=-1)[:, None, :, :]
    batch_temp_rel = jnp.stack([new_ts, new_td], axis=-1)[:, None, :, :]

    # -------- scatter the per-batch updates back into the full tables --------
    upd_entity_struct = dynamic_entity_emb.structural.at[nid_j].set(batch_structural_dynamic)
    upd_entity_temp = dynamic_entity_emb.temporal.at[nid_j].set(batch_temporal_dynamic)
    upd_rel_struct = dynamic_relation_emb.structural.at[uniq_rel_j].set(batch_struct_rel)
    upd_rel_temp = dynamic_relation_emb.temporal.at[uniq_rel_j].set(batch_temp_rel)

    updated_dynamic_entity_emb = MultiAspectEmbedding(structural=upd_entity_struct,
                                                      temporal=upd_entity_temp)
    updated_dynamic_relation_emb = MultiAspectEmbedding(structural=upd_rel_struct,
                                                        temporal=upd_rel_temp)
    return updated_dynamic_entity_emb, updated_dynamic_relation_emb, updated_node_latest_event_time


# ---------------------------------------------------------------------------
# Parameter init (PyTorch shapes) + one-time prepare (pad / transpose / pack)
# ---------------------------------------------------------------------------
def init_params(key, in_dim, hid_dim, rel_embed_dim, num_rels, num_gconv_layers=2):
    keys = iter(jax.random.split(key, 64))

    def w(shape, scale=0.1):
        return scale * jax.random.normal(next(keys), shape, jnp.float32)

    def rgcn_params():
        layers, d_prev = [], in_dim
        for _ in range(num_gconv_layers):
            layers.append((w((num_rels, d_prev, hid_dim)),      # per-relation W
                           w((d_prev, hid_dim)),                # self-loop W
                           w((hid_dim,))))                      # bias
            d_prev = hid_dim
        return layers

    def gru_params(input_dim, hidden_dim):
        return (w((3 * hidden_dim, input_dim)), w((3 * hidden_dim, hidden_dim)),
                w((3 * hidden_dim,)), w((3 * hidden_dim,)))

    def rnn_params(input_dim, hidden_dim):
        return (w((hidden_dim, input_dim)), w((hidden_dim, hidden_dim)),
                w((hidden_dim,)), w((hidden_dim,)))

    return {
        "rgcn_structural": rgcn_params(),
        "rgcn_temporal": rgcn_params(),
        "gru_structural": gru_params(hid_dim, hid_dim),
        "gru_temporal": gru_params(hid_dim, hid_dim),
        "rnn_rel_structural": rnn_params(in_dim, rel_embed_dim),
        "rnn_rel_temporal": rnn_params(in_dim, rel_embed_dim),
    }


def prepare_params(params, in_dim, hid_dim, rel_embed_dim):
    """Pad to lane-dense shapes, pre-transpose, pack gates, cast to bf16 ONCE."""
    d_in_p = _ceil_to(in_dim, LANE)
    hd_p = _ceil_to(hid_dim, LANE)
    rd_p = _ceil_to(rel_embed_dim, LANE)
    dmax = max(d_in_p, hd_p)
    bf16 = jnp.bfloat16

    def prep_rgcn_branch(layers):
        wr_l, ws_l, b_l = [], [], []
        for (w_rel, w_self, bias) in layers:
            num_rels, d_prev, d_out = w_rel.shape
            wr = jnp.pad(w_rel, ((0, 0), (0, dmax - d_prev), (0, hd_p - d_out)))
            # relation-concatenated weight: column block r -> W_r (wide matmul)
            wr_cat = jnp.transpose(wr, (1, 0, 2)).reshape(dmax, num_rels * hd_p)
            wr_l.append(wr_cat.astype(bf16))
            ws_l.append(_pad2(w_self, dmax, hd_p).astype(bf16))
            b_l.append(_pad2(bias[None, :], 1, hd_p))
        return jnp.stack(wr_l), jnp.stack(ws_l), jnp.stack(b_l)

    wr_s, ws_s, b_s = prep_rgcn_branch(params["rgcn_structural"])
    wr_t, ws_t, b_t = prep_rgcn_branch(params["rgcn_temporal"])
    w_rel_all = jnp.stack([wr_s, wr_t])        # (2, L, dmax, R*hd_p)  bf16
    w_self_all = jnp.stack([ws_s, ws_t])       # (2, L, dmax, hd_p)    bf16
    b_all = jnp.stack([b_s, b_t])              # (2, L, 1, hd_p)       f32

    def pack_gru(w_ih, w_hh, b_ih, b_hh, in_p, h_p):
        wir, wiz, win = jnp.split(w_ih, 3, axis=0)
        whr, whz, whn = jnp.split(w_hh, 3, axis=0)
        bir, biz, binn = jnp.split(b_ih, 3)
        bhr, bhz, bhn = jnp.split(b_hh, 3)

        def pw(wm, rows):                      # (out, in) -> transposed, padded
            return _pad2(wm.T, rows, hd_p)

        wx = jnp.concatenate([pw(wir, in_p), pw(wiz, in_p), pw(win, in_p),
                              jnp.zeros((in_p, hd_p), jnp.float32)], axis=1)
        wh = jnp.concatenate([pw(whr, h_p), pw(whz, h_p),
                              jnp.zeros((h_p, hd_p), jnp.float32), pw(whn, h_p)], axis=1)
        wg = jnp.concatenate([wx, wh], axis=0).astype(bf16)   # (in_p + h_p, 4*hd_p)

        def pb(b):
            return jnp.pad(b, (0, hd_p - b.shape[0]))

        bg = jnp.concatenate([pb(bir + bhr), pb(biz + bhz), pb(binn), pb(bhn)])[None, :]
        return wg, bg

    wg_s, bg_s = pack_gru(*params["gru_structural"], hd_p, hd_p)
    wg_t, bg_t = pack_gru(*params["gru_temporal"], hd_p, hd_p)
    wg_all = jnp.stack([wg_s, wg_t])           # (2, 2*hd_p, 4*hd_p) bf16
    bg_all = jnp.stack([bg_s, bg_t])           # (2, 1, 4*hd_p)      f32

    def blockdiag(blocks):
        a, b = blocks[0].shape
        out = jnp.zeros((len(blocks) * a, len(blocks) * b), jnp.float32)
        for i, blk in enumerate(blocks):
            out = out.at[i * a:(i + 1) * a, i * b:(i + 1) * b].set(blk)
        return out

    def pack_rel_rnn(struct_p, temp_p):
        wsx, wsh, bs_ih, bs_hh = struct_p
        wtx, wth, bt_ih, bt_hh = temp_p
        wsx_t = _pad2(wsx.T, d_in_p, rd_p)
        wsh_t = _pad2(wsh.T, rd_p, rd_p)
        wtx_t = _pad2(wtx.T, d_in_p, rd_p)
        wth_t = _pad2(wth.T, rd_p, rd_p)
        bs = jnp.pad(bs_ih + bs_hh, (0, rd_p - bs_ih.shape[0]))
        bt = jnp.pad(bt_ih + bt_hh, (0, rd_p - bt_ih.shape[0]))
        # 4 cells (struct-src, struct-dst, temp-src, temp-dst) as 2 block-diag W
        wx_bd = blockdiag([wsx_t, wsx_t, wtx_t, wtx_t]).astype(bf16)
        wh_bd = blockdiag([wsh_t, wsh_t, wth_t, wth_t]).astype(bf16)
        b_bd = jnp.concatenate([bs, bs, bt, bt])[None, :]
        return wx_bd, wh_bd, b_bd

    rel_rnn = pack_rel_rnn(params["rnn_rel_structural"], params["rnn_rel_temporal"])

    return {
        "rgcn_gru": (w_rel_all, w_self_all, b_all, wg_all, bg_all),
        "rel_rnn": rel_rnn,
        "dims": (in_dim, hid_dim, rel_embed_dim, d_in_p, hd_p, rd_p, dmax),
    }


if __name__ == "__main__":
    num_all_nodes = 16
    nb = 8                 # nodes in the batch graph
    num_edges = 16
    num_rels = 4
    in_dim = 32
    hid_dim = 32           # structural_hid_dim == temporal_hid_dim
    rel_embed_dim = 32
    num_rnn_layers = 1

    key = jax.random.PRNGKey(0)
    k_param, k_graph, k_emb = jax.random.split(key, 3)
    params = init_params(k_param, in_dim, hid_dim, rel_embed_dim, num_rels)
    prepared = prepare_params(params, in_dim, hid_dim, rel_embed_dim)

    kg = jax.random.split(k_graph, 5)
    src = np.asarray(jax.random.randint(kg[0], (num_edges,), 0, nb))
    dst = np.asarray(jax.random.randint(kg[1], (num_edges,), 0, nb))
    rel = np.asarray(jax.random.randint(kg[2], (num_edges,), 0, num_rels))
    etime = np.asarray(jax.random.uniform(kg[3], (num_edges,), minval=1.0, maxval=10.0))
    nid = np.asarray(jax.random.permutation(kg[4], num_all_nodes)[:nb])   # batch_G.ndata[dgl.NID]

    graph = dict(src=src, dst=dst, rel=rel, time=etime, nid=nid, num_rels=num_rels)

    ke = jax.random.split(k_emb, 6)
    static_entity_emb = MultiAspectEmbedding(
        structural=0.1 * jax.random.normal(ke[0], (num_all_nodes, in_dim), jnp.float32),
        temporal=0.1 * jax.random.normal(ke[1], (num_all_nodes, in_dim), jnp.float32))
    dynamic_entity_emb = MultiAspectEmbedding(
        structural=0.1 * jax.random.normal(ke[2], (num_all_nodes, num_rnn_layers, hid_dim), jnp.float32),
        temporal=0.1 * jax.random.normal(ke[3], (num_all_nodes, num_rnn_layers, hid_dim, 2), jnp.float32))
    dynamic_relation_emb = MultiAspectEmbedding(
        structural=0.1 * jax.random.normal(ke[4], (num_rels, num_rnn_layers, rel_embed_dim, 2), jnp.float32),
        temporal=0.1 * jax.random.normal(ke[5], (num_rels, num_rnn_layers, rel_embed_dim, 2), jnp.float32))
    node_latest_event_time = jnp.zeros((num_all_nodes, num_all_nodes + 1, 2), jnp.float32)

    # rel_chunk=2 exercises the multi-chunk K-axis accumulation path even at
    # demo sizes (num_rels=4 -> 2 chunks of 2 relations each).
    updated_entity_emb, updated_relation_emb, updated_nlet = embedding_updater_forward(
        graph, prepared, static_entity_emb, dynamic_entity_emb,
        dynamic_relation_emb, node_latest_event_time, rel_chunk=2)

    jax.block_until_ready((updated_entity_emb, updated_relation_emb, updated_nlet))
    print("KERNEL_OK")
</pallas_src>

<mosaic_0001>
module attributes {stable_mosaic.version = 11 : i64} {
  func.func @_rgcn_gru_kernel(%arg0: i32, %arg1: i32, %arg2: i32, %arg3: memref<1x128x128xbf16, #tpu.memory_space<vmem>>, %arg4: memref<1x1x128x256xbf16, #tpu.memory_space<vmem>>, %arg5: memref<1x1x128x128xbf16, #tpu.memory_space<vmem>>, %arg6: memref<1x1x1x128xf32, #tpu.memory_space<vmem>>, %arg7: memref<1x256x512xbf16, #tpu.memory_space<vmem>>, %arg8: memref<1x1x512xf32, #tpu.memory_space<vmem>>, %arg9: memref<1x128x256xbf16, #tpu.memory_space<vmem>>, %arg10: memref<1x128x128xbf16, #tpu.memory_space<vmem>>, %arg11: memref<1x128x128xf32, #tpu.memory_space<vmem>>, %arg12: memref<256x128xbf16, #tpu.memory_space<vmem>>, %arg13: memref<128x128xf32, #tpu.memory_space<vmem>>, %arg14: memref<128x128xbf16, #tpu.memory_space<vmem>>) attributes {dimension_semantics = [#tpu.dimension_semantics<parallel>, #tpu.dimension_semantics<arbitrary>, #tpu.dimension_semantics<arbitrary>], iteration_bounds = array<i64: 3, 2, 2>, scalar_prefetch = 0 : i64, scratch_operands = 3 : i64, tpu.core_type = #tpu.core_type<tc>, window_params = [{transform_indices = @transform_0, window_bounds = array<i64: 1, 128, 128>}, {transform_indices = @transform_1, window_bounds = array<i64: 1, 1, 128, 256>}, {transform_indices = @transform_2, window_bounds = array<i64: 1, 1, 128, 128>}, {transform_indices = @transform_3, window_bounds = array<i64: 1, 1, 1, 128>}, {transform_indices = @transform_4, window_bounds = array<i64: 1, 256, 512>}, {transform_indices = @transform_5, window_bounds = array<i64: 1, 1, 512>}, {transform_indices = @transform_6, window_bounds = array<i64: 1, 128, 256>}, {transform_indices = @transform_7, window_bounds = array<i64: 1, 128, 128>}, {transform_indices = @transform_8, window_bounds = array<i64: 1, 128, 128>}]} {
    %c0_i32 = arith.constant 0 : i32
    %0 = arith.cmpi eq, %arg1, %c0_i32 : i32
    %c0_i32_0 = arith.constant 0 : i32
    %1 = arith.cmpi eq, %arg2, %c0_i32_0 : i32
    %2 = arith.andi %0, %1 : i1
    %3 = arith.extui %2 : i1 to i32
    %c0_i32_1 = arith.constant 0 : i32
    %4 = arith.cmpi ne, %3, %c0_i32_1 : i32
    scf.if %4 {
      %c0_23 = arith.constant 0 : index
      %c0_24 = arith.constant 0 : index
      %c0_25 = arith.constant 0 : index
      %28 = vector.load %arg3[%c0_23, %c0_24, %c0_25] : memref<1x128x128xbf16, #tpu.memory_space<vmem>>, vector<1x128x128xbf16>
      %29 = vector.shape_cast %28 : vector<1x128x128xbf16> to vector<128x128xbf16>
      %c0_26 = arith.constant 0 : index
      %c0_27 = arith.constant 0 : index
      %30 = vector.load %arg14[%c0_26, %c0_27] : memref<128x128xbf16, #tpu.memory_space<vmem>>, vector<128x128xbf16>
      tpu.vector_store %arg14[%c0_26, %c0_27], %29 {strides = array<i32>} : memref<128x128xbf16, #tpu.memory_space<vmem>>, vector<128x128xbf16>,
    } else {
    }
    %c0_i32_2 = arith.constant 0 : i32
    %5 = arith.cmpi eq, %arg2, %c0_i32_2 : i32
    %6 = arith.extui %5 : i1 to i32
    %c0_i32_3 = arith.constant 0 : i32
    %7 = arith.cmpi ne, %6, %c0_i32_3 : i32
    scf.if %7 {
      %cst_23 = arith.constant 0.000000e+00 : f32
      %28 = vector.broadcast %cst_23 : f32 to vector<128x128xf32>
      %c0_24 = arith.constant 0 : index
      %c0_25 = arith.constant 0 : index
      %29 = vector.load %arg13[%c0_24, %c0_25] : memref<128x128xf32, #tpu.memory_space<vmem>>, vector<128x128xf32>
      tpu.vector_store %arg13[%c0_24, %c0_25], %28 {strides = array<i32>} : memref<128x128xf32, #tpu.memory_space<vmem>>, vector<128x128xf32>,
    } else {
    }
    %c0 = arith.constant 0 : index
    %c0_4 = arith.constant 0 : index
    %8 = vector.load %arg14[%c0, %c0_4] : memref<128x128xbf16, #tpu.memory_space<vmem>>, vector<128x128xbf16>
    %c0_5 = arith.constant 0 : index
    %c0_6 = arith.constant 0 : index
    %c0_7 = arith.constant 0 : index
    %c0_8 = arith.constant 0 : index
    %9 = vector.load %arg4[%c0_5, %c0_6, %c0_7, %c0_8] : memref<1x1x128x256xbf16, #tpu.memory_space<vmem>>, vector<1x1x128x256xbf16>
    %10 = vector.shape_cast %9 : vector<1x1x128x256xbf16> to vector<128x256xbf16>
    %cst = arith.constant dense<0.000000e+00> : vector<128x256xf32>
    %11 = tpu.matmul %8, %10, %cst {dimension_numbers = #tpu.dot_dimension_numbers<[1], [0], [0], [1], [0, 0, 1, 1], [], []>} : vector<128x128xbf16>, vector<128x256xbf16>, vector<128x256xf32> -> vector<128x256xf32>
    %12 = vector.extract_strided_slice %11 {offsets = [0, 0], sizes = [128, 128], strides = [1, 1]} : vector<128x256xf32> to vector<128x128xf32>
    %13 = arith.truncf %12 : vector<128x128xf32> to vector<128x128xbf16>
    %c0_9 = arith.constant 0 : index
    %c0_10 = arith.constant 0 : index
    %14 = vector.load %arg12[%c0_9, %c0_10] : memref<256x128xbf16, #tpu.memory_space<vmem>>, vector<128x128xbf16>
    tpu.vector_store %arg12[%c0_9, %c0_10], %13 {strides = array<i32>} : memref<256x128xbf16, #tpu.memory_space<vmem>>, vector<128x128xbf16>,
    %15 = vector.extract_strided_slice %11 {offsets = [0, 128], sizes = [128, 128], strides = [1, 1]} : vector<128x256xf32> to vector<128x128xf32>
    %16 = arith.truncf %15 : vector<128x128xf32> to vector<128x128xbf16>
    %c128 = arith.constant 128 : index
    %c0_11 = arith.constant 0 : index
    %17 = vector.load %arg12[%c128, %c0_11] : memref<256x128xbf16, #tpu.memory_space<vmem>>, vector<128x128xbf16>
    tpu.vector_store %arg12[%c128, %c0_11], %16 {strides = array<i32>} : memref<256x128xbf16, #tpu.memory_space<vmem>>, vector<128x128xbf16>,
    %c0_12 = arith.constant 0 : index
    %c0_13 = arith.constant 0 : index
    %18 = vector.load %arg13[%c0_12, %c0_13] : memref<128x128xf32, #tpu.memory_space<vmem>>, vector<128x128xf32>
    %c0_14 = arith.constant 0 : index
    %c0_15 = arith.constant 0 : index
    %c0_16 = arith.constant 0 : index
    %19 = vector.load %arg9[%c0_14, %c0_15, %c0_16] : memref<1x128x256xbf16, #tpu.memory_space<vmem>>, vector<1x128x256xbf16>
    %20 = vector.shape_cast %19 : vector<1x128x256xbf16> to vector<128x256xbf16>
    %c0_17 = arith.constant 0 : index
    %c0_18 = arith.constant 0 : index
    %21 = vector.load %arg12[%c0_17, %c0_18] : memref<256x128xbf16, #tpu.memory_space<vmem>>, vector<256x128xbf16>
    %cst_19 = arith.constant dense<0.000000e+00> : vector<128x128xf32>
    %22 = tpu.matmul %20, %21, %cst_19 {dimension_numbers = #tpu.dot_dimension_numbers<[1], [0], [0], [1], [0, 0, 1, 1], [], []>} : vector<128x256xbf16>, vector<256x128xbf16>, vector<128x128xf32> -> vector<128x128xf32>
    %23 = arith.addf %18, %22 : vector<128x128xf32>
    %c0_20 = arith.constant 0 : index
    %c0_21 = arith.constant 0 : index
    %24 = vector.load %arg13[%c0_20, %c0_21] : memref<128x128xf32, #tpu.memory_space<vmem>>, vector<128x128xf32>
    tpu.vector_store %arg13[%c0_20, %c0_21], %23 {strides = array<i32>} : memref<128x128xf32, #tpu.memory_space<vmem>>, vector<128x128xf32>,
    %c1_i32 = arith.constant 1 : i32
    %25 = arith.cmpi eq, %arg2, %c1_i32 : i32
    %26 = arith.extui %25 : i1 to i32
    %c0_i32_22 = arith.constant 0 : i32
    %27 = arith.cmpi ne, %26, %c0_i32_22 : i32
    scf.if %27 {
      %c0_23 = arith.constant 0 : index
      %c0_24 = arith.constant 0 : index
      %28 = vector.load %arg13[%c0_23, %c0_24] : memref<128x128xf32, #tpu.memory_space<vmem>>, vector<128x128xf32>
      %c0_25 = arith.constant 0 : index
      %c0_26 = arith.constant 0 : index
      %c0_27 = arith.constant 0 : index
      %c0_28 = arith.constant 0 : index
      %29 = vector.load %arg5[%c0_25, %c0_26, %c0_27, %c0_28] : memref<1x1x128x128xbf16, #tpu.memory_space<vmem>>, vector<1x1x128x128xbf16>
      %30 = vector.shape_cast %29 : vector<1x1x128x128xbf16> to vector<128x128xbf16>
      %cst_29 = arith.constant dense<0.000000e+00> : vector<128x128xf32>
      %31 = tpu.matmul %8, %30, %cst_29 {dimension_numbers = #tpu.dot_dimension_numbers<[1], [0], [0], [1], [0, 0, 1, 1], [], []>} : vector<128x128xbf16>, vector<128x128xbf16>, vector<128x128xf32> -> vector<128x128xf32>
      %32 = arith.addf %28, %31 : vector<128x128xf32>
      %c0_30 = arith.constant 0 : index
      %c0_31 = arith.constant 0 : index
      %c0_32 = arith.constant 0 : index
      %c0_33 = arith.constant 0 : index
      %33 = vector.load %arg6[%c0_30, %c0_31, %c0_32, %c0_33] : memref<1x1x1x128xf32, #tpu.memory_space<vmem>>, vector<1x1x1x128xf32>
      %34 = vector.shape_cast %33 : vector<1x1x1x128xf32> to vector<1x128xf32>
      %35 = vector.broadcast %34 : vector<1x128xf32> to vector<128x128xf32>
      %36 = arith.addf %32, %35 : vector<128x128xf32>
      %c0_i32_34 = arith.constant 0 : i32
      %37 = arith.cmpi eq, %arg1, %c0_i32_34 : i32
      %38 = arith.extui %37 : i1 to i32
      %c0_i32_35 = arith.constant 0 : i32
      %39 = arith.cmpi ne, %38, %c0_i32_35 : i32
      scf.if %39 {
        %43 = arith.truncf %36 : vector<128x128xf32> to vector<128x128xbf16>
        %c0_38 = arith.constant 0 : index
        %c0_39 = arith.constant 0 : index
        %44 = vector.load %arg14[%c0_38, %c0_39] : memref<128x128xbf16, #tpu.memory_space<vmem>>, vector<128x128xbf16>
        tpu.vector_store %arg14[%c0_38, %c0_39], %43 {strides = array<i32>} : memref<128x128xbf16, #tpu.memory_space<vmem>>, vector<128x128xbf16>,
      } else {
      }
      %c1_i32_36 = arith.constant 1 : i32
      %40 = arith.cmpi eq, %arg1, %c1_i32_36 : i32
      %41 = arith.extui %40 : i1 to i32
      %c0_i32_37 = arith.constant 0 : i32
      %42 = arith.cmpi ne, %41, %c0_i32_37 : i32
      scf.if %42 {
        %c0_38 = arith.constant 0 : index
        %c0_39 = arith.constant 0 : index
        %c0_40 = arith.constant 0 : index
        %43 = vector.load %arg10[%c0_38, %c0_39, %c0_40] : memref<1x128x128xbf16, #tpu.memory_space<vmem>>, vector<1x128x128xbf16>
        %44 = vector.shape_cast %43 : vector<1x128x128xbf16> to vector<128x128xbf16>
        %45 = arith.truncf %36 : vector<128x128xf32> to vector<128x128xbf16>
        %46 = tpu.concatenate %45, %44 in 1 : vector<128x128xbf16>, vector<128x128xbf16> -> vector<128x256xbf16>
        %c0_41 = arith.constant 0 : index
        %c0_42 = arith.constant 0 : index
        %c0_43 = arith.constant 0 : index
        %47 = vector.load %arg7[%c0_41, %c0_42, %c0_43] : memref<1x256x512xbf16, #tpu.memory_space<vmem>>, vector<1x256x512xbf16>
        %48 = vector.shape_cast %47 : vector<1x256x512xbf16> to vector<256x512xbf16>
        %cst_44 = arith.constant dense<0.000000e+00> : vector<128x512xf32>
        %49 = tpu.matmul %46, %48, %cst_44 {dimension_numbers = #tpu.dot_dimension_numbers<[1], [0], [0], [1], [0, 0, 1, 1], [], []>} : vector<128x256xbf16>, vector<256x512xbf16>, vector<128x512xf32> -> vector<128x512xf32>
        %c0_45 = arith.constant 0 : index
        %c0_46 = arith.constant 0 : index
        %c0_47 = arith.constant 0 : index
        %50 = vector.load %arg8[%c0_45, %c0_46, %c0_47] : memref<1x1x512xf32, #tpu.memory_space<vmem>>, vector<1x1x512xf32>
        %51 = vector.shape_cast %50 : vector<1x1x512xf32> to vector<1x512xf32>
        %52 = vector.broadcast %51 : vector<1x512xf32> to vector<128x512xf32>
        %53 = arith.addf %49, %52 : vector<128x512xf32>
        %54 = arith.extf %44 : vector<128x128xbf16> to vector<128x128xf32>
        %55 = vector.extract_strided_slice %53 {offsets = [0, 0], sizes = [128, 128], strides = [1, 1]} : vector<128x512xf32> to vector<128x128xf32>
        %56 = arith.negf %55 : vector<128x128xf32>
        %57 = math.exp %56 : vector<128x128xf32>
        %cst_48 = arith.constant 1.000000e+00 : f32
        %58 = vector.broadcast %cst_48 : f32 to vector<128x128xf32>
        %59 = arith.addf %58, %57 : vector<128x128xf32>
        %60 = arith.divf %58, %59 : vector<128x128xf32>
        %61 = vector.extract_strided_slice %53 {offsets = [0, 128], sizes = [128, 128], strides = [1, 1]} : vector<128x512xf32> to vector<128x128xf32>
        %62 = arith.negf %61 : vector<128x128xf32>
        %63 = math.exp %62 : vector<128x128xf32>
        %cst_49 = arith.constant 1.000000e+00 : f32
        %64 = vector.broadcast %cst_49 : f32 to vector<128x128xf32>
        %65 = arith.addf %64, %63 : vector<128x128xf32>
        %66 = arith.divf %64, %65 : vector<128x128xf32>
        %67 = vector.extract_strided_slice %53 {offsets = [0, 256], sizes = [128, 128], strides = [1, 1]} : vector<128x512xf32> to vector<128x128xf32>
        %68 = vector.extract_strided_slice %53 {offsets = [0, 384], sizes = [128, 128], strides = [1, 1]} : vector<128x512xf32> to vector<128x128xf32>
        %69 = arith.mulf %60, %68 : vector<128x128xf32>
        %70 = arith.addf %67, %69 : vector<128x128xf32>
        %71 = math.tanh %70 : vector<128x128xf32>
        %cst_50 = arith.constant 1.000000e+00 : f32
        %72 = vector.broadcast %cst_50 : f32 to vector<128x128xf32>
        %73 = arith.subf %72, %66 : vector<128x128xf32>
        %74 = arith.mulf %73, %71 : vector<128x128xf32>
        %75 = arith.mulf %66, %54 : vector<128x128xf32>
        %76 = arith.addf %74, %75 : vector<128x128xf32>
        %c0_51 = arith.constant 0 : index
        %c0_52 = arith.constant 0 : index
        %c0_53 = arith.constant 0 : index
        %77 = vector.load %arg11[%c0_51, %c0_52, %c0_53] : memref<1x128x128xf32, #tpu.memory_space<vmem>>, vector<1x128x128xf32>
        %78 = vector.shape_cast %77 : vector<1x128x128xf32> to vector<128x128xf32>
        %79 = vector.shape_cast %76 : vector<128x128xf32> to vector<1x128x128xf32>
        tpu.vector_store %arg11[%c0_51, %c0_52, %c0_53], %79 {strides = array<i32>} : memref<1x128x128xf32, #tpu.memory_space<vmem>>, vector<1x128x128xf32>,
      } else {
      }
    } else {
    }
    return
  }
  func.func @transform_0(%arg0: i32, %arg1: i32, %arg2: i32) -> (i32, i32, i32) {
    %c1_i32 = arith.constant 1 : i32
    %0 = arith.minsi %arg0, %c1_i32 : i32
    %c0_i32 = arith.constant 0 : i32
    %c0_i32_0 = arith.constant 0 : i32
    %c0_i32_1 = arith.constant 0 : i32
    return %0, %c0_i32, %c0_i32_0 : i32, i32, i32
  }
  func.func @transform_1(%arg0: i32, %arg1: i32, %arg2: i32) -> (i32, i32, i32, i32) {
    %c1_i32 = arith.constant 1 : i32
    %0 = arith.minsi %arg0, %c1_i32 : i32
    %c0_i32 = arith.constant 0 : i32
    %c0_i32_0 = arith.constant 0 : i32
    return %0, %arg1, %c0_i32, %arg2 : i32, i32, i32, i32
  }
  func.func @transform_2(%arg0: i32, %arg1: i32, %arg2: i32) -> (i32, i32, i32, i32) {
    %c1_i32 = arith.constant 1 : i32
    %0 = arith.minsi %arg0, %c1_i32 : i32
    %c0_i32 = arith.constant 0 : i32
    %c0_i32_0 = arith.constant 0 : i32
    %c0_i32_1 = arith.constant 0 : i32
    return %0, %arg1, %c0_i32, %c0_i32_0 : i32, i32, i32, i32
  }
  func.func @transform_3(%arg0: i32, %arg1: i32, %arg2: i32) -> (i32, i32, i32, i32) {
    %c1_i32 = arith.constant 1 : i32
    %0 = arith.minsi %arg0, %c1_i32 : i32
    %c0_i32 = arith.constant 0 : i32
    %c0_i32_0 = arith.constant 0 : i32
    %c0_i32_1 = arith.constant 0 : i32
    return %0, %arg1, %c0_i32, %c0_i32_0 : i32, i32, i32, i32
  }
  func.func @transform_4(%arg0: i32, %arg1: i32, %arg2: i32) -> (i32, i32, i32) {
    %c1_i32 = arith.constant 1 : i32
    %0 = arith.minsi %arg0, %c1_i32 : i32
    %c0_i32 = arith.constant 0 : i32
    %c0_i32_0 = arith.constant 0 : i32
    %c0_i32_1 = arith.constant 0 : i32
    return %0, %c0_i32, %c0_i32_0 : i32, i32, i32
  }
  func.func @transform_5(%arg0: i32, %arg1: i32, %arg2: i32) -> (i32, i32, i32) {
    %c1_i32 = arith.constant 1 : i32
    %0 = arith.minsi %arg0, %c1_i32 : i32
    %c0_i32 = arith.constant 0 : i32
    %c0_i32_0 = arith.constant 0 : i32
    %c0_i32_1 = arith.constant 0 : i32
    return %0, %c0_i32, %c0_i32_0 : i32, i32, i32
  }
  func.func @transform_6(%arg0: i32, %arg1: i32, %arg2: i32) -> (i32, i32, i32) {
    %c0_i32 = arith.constant 0 : i32
    %c0_i32_0 = arith.constant 0 : i32
    return %arg0, %c0_i32, %arg2 : i32, i32, i32
  }
  func.func @transform_7(%arg0: i32, %arg1: i32, %arg2: i32) -> (i32, i32, i32) {
    %c0_i32 = arith.constant 0 : i32
    %c0_i32_0 = arith.constant 0 : i32
    %c0_i32_1 = arith.constant 0 : i32
    return %arg0, %c0_i32, %c0_i32_0 : i32, i32, i32
  }
  func.func @transform_8(%arg0: i32, %arg1: i32, %arg2: i32) -> (i32, i32, i32) {
    %c0_i32 = arith.constant 0 : i32
    %c0_i32_0 = arith.constant 0 : i32
    %c0_i32_1 = arith.constant 0 : i32
    return %arg0, %c0_i32, %c0_i32_0 : i32, i32, i32
  }
}

</mosaic_0001>

<bundles_post_ra>
// kernel: tpu_custom_call.1
= control target key start
LH: loop header
LB: loop body
LE: loop exit
PB: predicated region body
PF: predicated region fallthrough
CT: control target
= control target key end

     0   :  { %s7692_s0 = inlined_call_operand.hbm [shape: bf16[2,128,128], index: 0, kind: input, shape index: {}]   ;;  %s7693_s1 = inlined_call_operand.hbm [shape: bf16[2,2,128,512], index: 1, kind: input, shape index: {}]   ;;  %s7694_s2 = inlined_call_operand.hbm [shape: bf16[2,2,128,128], index: 2, kind: input, shape index: {}]   ;;  %s7695_s3 = inlined_call_operand.hbm [shape: f32[2,2,1,128], index: 3, kind: input, shape index: {}]   ;;  %s7696_s4 = inlined_call_operand.hbm [shape: bf16[2,256,512], index: 4, kind: input, shape index: {}]   ;;  %s7697_s5 = inlined_call_operand.hbm [shape: f32[2,1,512], index: 5, kind: input, shape index: {}]   ;;  %s7698_s6 = inlined_call_operand.hbm [shape: bf16[3,128,512], index: 6, kind: input, shape index: {}]   ;;  %s7699_s7 = inlined_call_operand.hbm [shape: bf16[3,128,128], index: 7, kind: input, shape index: {}]   ;;  %s7700_s8 = inlined_call_operand.hbm [shape: f32[3,128,128], index: 8, kind: output, shape index: {}]  }
   0x1   :  { %7737 = sst [smem:[#allocation61_spill]] %s7692_s0 }
   0x2   :  { %7738 = sst [smem:[#allocation62_spill]] %s7693_s1 }
   0x3   :  { %7739 = sst [smem:[#allocation63_spill]] %s7694_s2 }
   0x4   :  { %7740 = sst [smem:[#allocation64_spill]] %s7695_s3 }
   0x5   :  { %7741 = sst [smem:[#allocation65_spill]] %s7696_s4 }
   0x6   :  { %7742 = sst [smem:[#allocation66_spill]] %s7697_s5 }
   0x7   :  { %7743 = sst [smem:[#allocation67_spill]] %s7698_s6 }
   0x8   :  { %7744 = sst [smem:[#allocation68_spill]] %s7699_s7 }
   0x9   :  { %7745 = sst [smem:[#allocation69_spill]] %s7700_s8 }
   0xa   :  { %13 = vsyncpa [#allocation6], 0 }
   0xb   :  { %15 = vsyncpa [#allocation6 + $0x1], 0 }
   0xc   :  { %16 = vsyncpa [#allocation9], 0 }
   0xd   :  { %18 = vsyncpa [#allocation9 + $0x1], 0 }
   0xe   :  { %19 = vsyncpa [#allocation12], 0 }
   0xf   :  { %21 = vsyncpa [#allocation12 + $0x1], 0 }
  0x10   :  { %22 = vsyncpa [#allocation15], 0 }
  0x11   :  { %24 = vsyncpa [#allocation15 + $0x1], 0 }
  0x12   :  { %25 = vsyncpa [#allocation18], 0 }
  0x13   :  { %27 = vsyncpa [#allocation18 + $0x1], 0 }
  0x14   :  { %28 = vsyncpa [#allocation7], 0 }
  0x15   :  { %30 = vsyncpa [#allocation7 + $0x1], 0  ;;  %s5438_s27 = smov 0   ;;  %s5440_s28 = smov 0  }
  0x16   :  { %s5442_s29 = smov 0   ;;  %s5444_s30 = smov 0  }
  0x17   :  { %s5446_s9 = smov 0   ;;  %s5448_s10 = smov 0  }
  0x18   :  { %s5450_s11 = smov 0   ;;  %s5452_s12 = smov 0  }
  0x19   :  { %s5454_s13 = smov 0   ;;  %s5456_s14 = smov 0  }
  0x1a   :  { %s5458_s15 = smov 0   ;;  %s5460_s16 = smov 0  }
  0x1b   :  { %s5462_s17 = smov 0   ;;  %s5464_s18 = smov 0  }
  0x1c   :  { %s5466_s19 = smov 0   ;;  %s5468_s20 = smov 0  }
  0x1d   :  { %s5470_s21 = smov 0   ;;  %s5472_s22 = smov 0  }
  0x1e   :  { %s5474_s23 = smov 0   ;;  %s5476_s24 = smov 0  }
  0x1f   :  { %s5478_s25 = smov 0   ;;  %s5480_s26 = smov 0  }
  0x20 LB: > { %7746 = sst [smem:[#allocation29_spill]] %s5298_s27  ;;  %s5549_s8 = sadd.s32 4294967295, %s5382_s26   ;;  %s5382_s26 = sphi %s5480_s26, %s36_s26   ;;  %s5378_s25 = sphi %s5478_s25, %s7985_s25   ;;  %s5374_s24 = sphi %s5476_s24, %s7984_s24   ;;  %s5370_s23 = sphi %s5474_s23, %s7976_s23   ;;  %s5366_s22 = sphi %s5472_s22, %s7983_s22   ;;  %s5362_s21 = sphi %s5470_s21, %s7982_s21   ;;  %s5358_s20 = sphi %s5468_s20, %s7974_s20   ;;  %s5354_s19 = sphi %s5466_s19, %s7973_s19   ;;  %s5350_s18 = sphi %s5464_s18, %s7972_s18   ;;  %s5346_s17 = sphi %s5462_s17, %s7971_s17   ;;  %s5342_s16 = sphi %s5460_s16, %s7970_s16   ;;  %s5338_s15 = sphi %s5458_s15, %s7969_s15   ;;  %s5334_s14 = sphi %s5456_s14, %s7981_s14   ;;  %s5330_s13 = sphi %s5454_s13, %s7980_s13   ;;  %s5326_s12 = sphi %s5452_s12, %s7966_s12   ;;  %s5322_s11 = sphi %s5450_s11, %s7965_s11   ;;  %s5318_s10 = sphi %s5448_s10, %s7979_s10   ;;  %s5314_s9 = sphi %s5446_s9, %s7964_s9   ;;  %s5310_s30 = sphi %s5444_s30, %s7963_s30   ;;  %s5306_s29 = sphi %s5442_s29, %s7975_s29   ;;  %s5302_s28 = sphi %s5440_s28, %s7962_s28   ;;  %s5298_s27 = sphi %s5438_s27, %s7961_s27  }
  0x21   : > { %7747 = sst [smem:[#allocation30_spill]] %s5302_s28  ;;  %p59_p1 = scmp.lt.s32.totalorder %s5378_s25, 1 }
  0x22   : > { %7748 = sst [smem:[#allocation31_spill]] %s5306_s29  ;;  %p7734_p3 = scmp.eq.s32.totalorder %s5382_s26, 0 }
  0x23   : > { %7749 = sst [smem:[#allocation32_spill]] %s5310_s30  ;;  %p80_p4 = scmp.eq.s32.totalorder %s5549_s8, 0 }
  0x24   : > { %7750 = sst [smem:[#allocation33_spill]] %s5314_s9  ;;  %p107_p5 = scmp.ne.s32.totalorder %s5342_s16, %s5338_s15 }
  0x25   : > { %7751 = sst [smem:[#allocation34_spill]] %s5318_s10  ;;  %p113_p7 = scmp.ne.s32.totalorder %s5338_s15, %s5334_s14 }
  0x26   : > { %7752 = sst [smem:[#allocation35_spill]] %s5326_s12  ;;  %p5580_p8 = por %p107_p5, %p7734_p3 }
  0x27   : > { %7753 = sst [smem:[#allocation36_spill]] %s5330_s13  ;;  %p5588_p9 = por %p113_p7, %p80_p4 }
  0x28   : > { %7754 = sst [smem:[#allocation37_spill]] %s5338_s15  ;;  %p7736_p10 = scmp.lt.s32.totalorder %s5382_s26, 12 }
  0x29   : > { %7755 = sst [smem:[#allocation38_spill]] %s5342_s16  ;;  %s5598_s14 = sand.u32 1, %s5382_s26  }
  0x2a   : > { %7756 = sst [smem:[#allocation39_spill]] %s5346_s17  ;;  %s367_s4 = sand.u32 1, %s5342_s16  }
  0x2b   : > { %7757 = sst [smem:[#allocation40_spill]] %s5350_s18  ;;  %s3587_s30 = sshll.u32 %s367_s4, 7 }
  0x2c   : > { %7758 = sst [smem:[#allocation41_spill]] %s5354_s19  ;;  %s3588_s2 = sshll.u32 %s5370_s23, 1 }
  0x2d   : > { %7759 = sst [smem:[#allocation42_spill]] %s5358_s20  ;;  %s51_s20 = sadd.s32 1, %s5374_s24 }
  0x2e   : > { %7760 = sst [smem:[#allocation43_spill]] %s5362_s21  ;;  %s55_s21 = sadd.s32 1, %s5378_s25 }
  0x2f   : > { %7761 = sst [smem:[#allocation44_spill]] %s5366_s22  ;;  %s48_s22 = sadd.s32 1, %s5370_s23 }
  0x30   : > { %7762 = sst [smem:[#allocation45_spill]] %s5370_s23  ;;  %p49_p0 = scmp.ge.s32.totalorder %s48_s22, 2 }
  0x31   : > { %s5561_s7 = scalar_select %p59_p1, %s5378_s25, 1 }
  0x32   : > { %s7987_s22 = smov (%p49_p0, %s48_s22), 0  ;;  %s7989_s20 = smov (!%p49_p0, %s51_s20), %s5374_s24 }
  0x33   : > { %7763 = sst [smem:[#allocation46_spill]] %s7987_s22  ;;  %p53_p2 = scmp.ge.s32.totalorder %s7989_s20, 2 }
  0x34   : > { %s5568_s27 = ssub.s32 %s5370_s23, %s7987_s22  ;;  %s3589_s9 = sshll.u32 %s5374_s24, 6 }
  0x35   : > { %s7991_s21 = smov (!%p53_p2, %s55_s21), %s5378_s25  ;;  %s3590_s10 = sshll.u32 %s5561_s7, 7 }
  0x36   : > { %p57_p6 = scmp.ge.s32.totalorder %s7991_s21, 3  ;;  %s369_s5 = scalar_lea.vmem [#allocation8], %s3587_s30 }
  0x37   : > { %s7766_s22 = scalar_select %p5588_p9, 1, 0 }
  0x38   : > { %s7993_s21 = smov (%p57_p6, %s7991_s21), 0  ;;  %s383_s3 = sshll.u32 %s369_s5, 4  ;;  %s384_s3 = int_to_ptr.vmem [resolvable:$true] %s383_s3 }
  0x39   : > { %7765 = sst [smem:[#allocation47_spill]] %s7993_s21  ;;  %s5595_s29 = ssub.s32 %s5378_s25, %s7993_s21 }
  0x3a   : > { %7767 = sst [smem:[#allocation48_spill]] %s7766_s22  ;;  %s249_s28 = sor.u32 %s5595_s29, %s5568_s27 }
  0x3b   : > { %7768 = sst [smem:[#allocation49_spill]] %s5595_s29  ;;  %p5602_p11 = scmp.eq.s32.totalorder %s249_s28, 0 }
  0x3c   : > { %s376_s22 = sadd.s32 %s3589_s9, %s3588_s2  ;;  %s7770_s1 = sld [smem:[#allocation62_spill]] }
  0x3d   : > { %s378_s0 = sadd.s32 %s3590_s10, %s376_s22  ;;  %p4531_p12 = pnand %p7736_p10, %p5580_p8 }
  0x3e   : > { %s3591_s29 = sshll.u32 %s378_s0, 2  ;;  %s7716_s30 = scalar_lea.sflag [#allocation9], %s5598_s14 }
  0x3f   : > { %s7714_s0 = smov 256   ;;  %s7712_s5 = smov 128  }
  0x40   : > { %s7713_s10 = smov 8   ;;  %s7711_s6 = sshll.u32 %s5378_s25, 6 }
  0x41   : > { %p3609_p13 = scmp.ge.s32.totalorder %s5382_s26, 1  ;;  %p529_p0 = scmp.lt.s32.totalorder %s5382_s26, 13 }
  0x42   : > { %s380_s4 = scalar_lea.hbm %s7770_s1, %s3591_s29  ;;  %s5627_s29 = sadd.s32 %s7711_s6, %s3588_s2 }
  0x43   : > { %s381_s9 = sshll.u32 %s380_s4, 4  ;;  %p5631_p1 = pnand %p3609_p13, %p529_p0  ;;  %s382_s9 = int_to_ptr.hbm [resolvable:$true] %s381_s9 }
  0x44   : > { %4533 = dma.hbm_to_vmem [thread:$0]  (!%p4531_p12), %s382_s9, 2048, %s384_s3, %s7716_s30, %s7714_s0, %s7712_s5, %s7713_s10  }
  0x45   : > { %s7995_s20 = smov (%p53_p2, %s7989_s20), 0  ;;  %p61_p5 = scmp.lt.s32.totalorder %s7993_s21, 1 }
  0x46   : > { %7772 = sst [smem:[#allocation50_spill]] %s7995_s20  ;;  %s132_s3 = sadd.s32 1, %s5330_s13 }
  0x47   : > { %s94_s2 = ssub.s32 %s5374_s24, %s7995_s20  ;;  %p139_p6 = scmp.ne.s32.totalorder %s5330_s13, %s5326_s12 }
  0x48   : > { %s62_s28 = scalar_select %p61_p5, %s7993_s21, 1 }
  0x49   : > { %p5649_p7 = por %p139_p6, %p7734_p3  ;;  %p145_p8 = scmp.ne.s32.totalorder %s5326_s12, %s5322_s11 }
  0x4a   : > { %s63_s9 = ssub.s32 %s5561_s7, %s62_s28  ;;  %s395_s6 = sand.u32 1, %s5330_s13  }
  0x4b   : > { %p64_p2 = scmp.eq.s32.totalorder %s63_s9, 0  ;;  %s95_s5 = sor.u32 %s94_s2, %s63_s9 }
  0x4c   : > { %s97_s10 = sor.u32 %s5568_s27, %s95_s5  ;;  %p130_p12 = scmp.eq.s32.totalorder %s95_s5, 0 }
  0x4d   : > { %p98_p13 = scmp.eq.s32.totalorder %s97_s10, 0  ;;  %p5660_p0 = por %p145_p8, %p80_p4 }
  0x4e   : > { %s5665_s0 = scalar_select %p130_p12, %s5330_s13, %s132_s3  }
  0x4f   : > { %s7774_s17 = scalar_select %p5660_p0, 1, 0 }
  0x50   : > { %7776 = sst [smem:[#allocation52_spill]] %s5665_s0  ;;  %s7777_s30 = sadd.s32 1, %s5342_s16 }
  0x51   : > { %7775 = sst [smem:[#allocation51_spill]] %s7774_s17  ;;  %s3592_s28 = sshll.u32 %s395_s6, 6 }
  0x52   : > { %s5670_s11 = scalar_select %p98_p13, %s5342_s16, %s7777_s30  }
  0x53   : > { %p5676_p5 = pnand %p7736_p10, %p5649_p7  ;;  %s397_s5 = scalar_lea.vmem [#allocation10], %s3592_s28 }
  0x54   : > { %7778 = sst [smem:[#allocation53_spill]] %s5670_s11  ;;  %s5680_s3 = sshll.u32 %s397_s5, 4 }
  0x55   : > { %s7780_s10 = sld [smem:[#allocation39_spill]]  ;;  %s3596_s30 = sshll.u32 %s5561_s7, 1 }
  0x56   : > { %7781 = sst [smem:[#allocation39_spill]] %s5680_s3  ;;  %s422_s2 = scalar_lea.vmem [#allocation11], %s395_s6 }
  0x57   : > { %s433_s4 = sshll.u32 %s422_s2, 4  ;;  %s428_s1 = sadd.s32 %s5374_s24, %s3596_s30  ;;  %s434_s4 = int_to_ptr.vmem [resolvable:$true] %s433_s4 }
  0x58   : > { %s7782_s23 = sld [smem:[#allocation64_spill]]  ;;  %s7722_s5 = scalar_lea.sflag [#allocation12], %s5598_s14 }
  0x59   : > { %s66_s3 = sadd.s32 1, %s5354_s19  ;;  %p73_p6 = scmp.ne.s32.totalorder %s5354_s19, %s5350_s18 }
  0x5a   : > { %s5696_s16 = scalar_select %p64_p2, %s5354_s19, %s66_s3  }
  0x5b   : > { %p79_p7 = scmp.ne.s32.totalorder %s5350_s18, %s7780_s10  ;;  %s5703_s6 = sand.u32 1, %s5354_s19  }
  0x5c   : > { %7783 = sst [smem:[#allocation54_spill]] %s5696_s16  ;;  %p75_p8 = por %p7734_p3, %p73_p6 }
  0x5d   : > { %p5709_p12 = por %p80_p4, %p79_p7  ;;  %s3600_s21 = sshll.u32 %s5703_s6, 2 }
  0x5e   : > { %s429_s28 = scalar_lea.hbm %s7782_s23, %s428_s1  ;;  %p5717_p2 = pnand %p7736_p10, %p75_p8 }
  0x5f   : > { %s431_s11 = sshll.u32 %s429_s28, 4  ;;  %s3601_s9 = sshll.u32 %s5561_s7, 2  ;;  %s432_s11 = int_to_ptr.hbm [resolvable:$true] %s431_s11 }
  0x60   : > { %4539 = dma.hbm_to_vmem [thread:$0]  (!%p5676_p5), %s432_s11, 16, %s434_s4, %s7722_s5  }
  0x61   : > { %s7784_s1 = scalar_select %p5709_p12, 1, 0 }
  0x62   : > { %s468_s11 = scalar_lea.vmem [#allocation14], %s3600_s21  ;;  %s7787_s2 = sld [smem:[#allocation66_spill]] }
  0x63   : > { %7785 = sst [smem:[#allocation55_spill]] %s7784_s1  ;;  %s478_s10 = sshll.u32 %s468_s11, 4  ;;  %s479_s10 = int_to_ptr.vmem [resolvable:$true] %s478_s10 }
  0x64   : > { %s7727_s5 = scalar_lea.sflag [#allocation15], %s5598_s14  ;;  %s3584_s20 = sshll.u32 %s5703_s6, 6 }
  0x65   : > { %s4203_s16 = sshll.u32 %s5561_s7, 6  ;;  %s7788_s11 = sld [smem:[#allocation61_spill]] }
  0x66   : > { %s345_s3 = scalar_lea.vmem [#allocation5], %s3584_s20  ;;  %s7789_s30 = sld [smem:[#allocation39_spill]] }
  0x67   : > { %s5388_s17 = smov 4   ;;  %s7790_s19 = sld [smem:[#allocation34_spill]] }
  0x68   : > { %s474_s4 = scalar_lea.hbm %s7787_s2, %s3601_s9  ;;  %s355_s9 = sshll.u32 %s345_s3, 4  ;;  %s356_s9 = int_to_ptr.vmem [resolvable:$true] %s355_s9 }
  0x69   : > { %s476_s28 = sshll.u32 %s474_s4, 4  ;;  %s342_s2 = scalar_lea.sflag [#allocation6], %s5703_s6  ;;  %s477_s28 = int_to_ptr.hbm [resolvable:$true] %s476_s28 }
  0x6a   : > { %4545 = dma.hbm_to_vmem [thread:$0]  (!%p5717_p2), %s477_s28, 64, %s479_s10, %s7727_s5  }
  0x6b   : > { %s352_s0 = scalar_lea.hbm %s7788_s11, %s4203_s16  ;;  %s7732_s4 = smov 64  }
  0x6c   : > { %s353_s13 = sshll.u32 %s352_s0, 4  ;;  %s3593_s10 = sshll.u32 %s5374_s24, 4  ;;  %s354_s13 = int_to_ptr.hbm [resolvable:$true] %s353_s13 }
  0x6d   : > { %4530 = dma.hbm_to_vmem [thread:$0]  (!%p5717_p2), %s354_s13, 1024, %s356_s9, %s342_s2, %s7732_s4, %s7732_s4, %s5388_s17  }
  0x6e   : > { %s3594_s16 = sshll.u32 %s5561_s7, 5  ;;  %s7791_s28 = sld [smem:[#allocation33_spill]] }
  0x6f   : > { %s404_s0 = sadd.s32 %s3594_s16, %s3593_s10  ;;  %s4204_s21 = sshll.u32 %s5561_s7, 9 }
  0x70   : > { %s3595_s20 = sshll.u32 %s404_s0, 2  ;;  %s7792_s5 = sld [smem:[#allocation63_spill]] }
  0x71   : > { %s7793_s12 = sld [smem:[#allocation32_spill]]  ;;  %s7795_s7 = smov 64  }
  0x72   : > { %s7794_s9 = sld [smem:[#allocation65_spill]]  ;;  %s7796_s16 = scalar_lea.sflag [#allocation9], %s5598_s14 }
  0x73   : > { %s7797_s0 = int_to_ptr.vmem [resolvable:$true] %s7789_s30  ;;  %s5389_s18 = smov 16  }
  0x74   : > { %s252_s3 = sadd.s32 1, %s7790_s19  ;;  %s7801_s27 = sld [smem:[#allocation49_spill]] }
  0x75   : > { %s5771_s13 = scalar_select %p5602_p11, %s7790_s19, %s252_s3  }
  0x76   : > { %s406_s1 = scalar_lea.hbm %s7792_s5, %s3595_s20  ;;  %s7798_s5 = sshll.u32 %s5703_s6, 9 }
  0x77   : > { %s407_s4 = sshll.u32 %s406_s1, 4  ;;  %s444_s20 = scalar_lea.vmem [#allocation13], %s7798_s5  ;;  %s408_s4 = int_to_ptr.hbm [resolvable:$true] %s407_s4 }
  0x78   : > { %s451_s2 = scalar_lea.hbm %s7794_s9, %s4204_s21  ;;  %s454_s11 = sshll.u32 %s444_s20, 4  ;;  %s455_s11 = int_to_ptr.vmem [resolvable:$true] %s454_s11 }
  0x79   : > { %s452_s10 = sshll.u32 %s451_s2, 4  ;;  %s7799_s1 = smov 256   ;;  %s453_s10 = int_to_ptr.hbm [resolvable:$true] %s452_s10 }
  0x7a   : > { %4536 = dma.hbm_to_vmem [thread:$0]  (!%p5676_p5), %s408_s4, 1024, %s7797_s0, %s7796_s16, %s7795_s7, %s7795_s7, %s5388_s17  }
  0x7b   : > { %s7800_s21 = scalar_lea.sflag [#allocation12], %s5598_s14  ;;  %p259_p13 = scmp.ne.s32.totalorder %s7790_s19, %s7791_s28 }
  0x7c   : > { %4542 = dma.hbm_to_vmem [thread:$0]  (!%p5717_p2), %s453_s10, 8192, %s455_s11, %s7800_s21, %s7799_s1, %s7799_s1, %s5389_s18  }
  0x7d   : > { %s7802_s30 = sld [smem:[#allocation31_spill]]  ;;  %p265_p5 = scmp.ne.s32.totalorder %s7791_s28, %s7793_s12 }
  0x7e   : > { %s487_s6 = sand.u32 1, %s7790_s19   ;;  %s7803_s4 = sshll.u32 %s5627_s29, 2 }
  0x7f   : > { %s7804_s23 = sld [smem:[#allocation67_spill]]  ;;  %p261_p6 = por %p259_p13, %p7734_p3 }
  0x80   : > { %s7805_s16 = sld [smem:[#allocation30_spill]]  ;;  %p5787_p11 = por %p265_p5, %p80_p4 }
  0x81   : > { %s7806_s10 = sld [smem:[#allocation29_spill]]  ;;  %s3602_s12 = sshll.u32 %s487_s6, 7 }
  0x82   : > { %s7807_s15 = scalar_select %p5787_p11, 1, 0 }
  0x83   : > { %s489_s29 = scalar_lea.vmem [#allocation16], %s3602_s12  ;;  %p4546_p7 = pnand %p7736_p10, %p261_p6 }
  0x84   : > { %s499_s28 = sshll.u32 %s489_s29, 4  ;;  %s7808_s5 = smov 8   ;;  %s500_s28 = int_to_ptr.vmem [resolvable:$true] %s499_s28 }
  0x85   : > { %s496_s0 = scalar_lea.hbm %s7804_s23, %s7803_s4  ;;  %s7809_s20 = smov 128  }
  0x86   : > { %s497_s19 = sshll.u32 %s496_s0, 4  ;;  %s7810_s11 = scalar_lea.sflag [#allocation15], %s5598_s14  ;;  %s498_s19 = int_to_ptr.hbm [resolvable:$true] %s497_s19 }
  0x87   : > { %4548 = dma.hbm_to_vmem [thread:$0]  (!%p4546_p7), %s498_s19, 2048, %s500_s28, %s7810_s11, %s7799_s1, %s7809_s20, %s7808_s5  }
  0x88   : > { %p276_p8 = scmp.eq.s32.totalorder %s7801_s27, 0  ;;  %s3581_s18 = sadd.s32 4294967294, %s5382_s26  }
  0x89   : > { %s278_s21 = sadd.s32 1, %s7802_s30  ;;  %p285_p2 = scmp.ne.s32.totalorder %s7802_s30, %s7805_s16 }
  0x8a   : > { %s5802_s3 = scalar_select %p276_p8, %s7802_s30, %s278_s21  }
  0x8b   : > { %p291_p13 = scmp.ne.s32.totalorder %s7805_s16, %s7806_s10  ;;  %p315_p5 = scmp.eq.s32.totalorder %s5549_s8, 11 }
  0x8c   : > { %p321_p3 = scmp.eq.s32.totalorder %s3581_s18, 11  ;;  %s509_s4 = sand.u32 1, %s7802_s30  }
  0x8d   : > { %p5811_p11 = por %p291_p13, %p80_p4  ;;  %p5816_p6 = por %p315_p5, %p285_p2 }
  0x8e   : > { %p5820_p7 = por %p321_p3, %p291_p13  ;;  %p7814_p8 = scmp.eq.s32.totalorder %s5382_s26, 0 }
  0x8f   : > { %s3606_s27 = sshll.u32 %s509_s4, 6  ;;  %s7815_s9 = sshll.u32 %s5378_s25, 6 }
  0x90   : > { %p287_p10 = por %p285_p2, %p7814_p8  ;;  %s7816_s16 = sld [smem:[#allocation68_spill]] }
  0x91   : > { %s513_s12 = scalar_lea.vmem [#allocation17], %s3606_s27  ;;  %p7817_p4 = scmp.lt.s32.totalorder %s5382_s26, 12 }
  0x92   : > { %s521_s19 = sshll.u32 %s513_s12, 4  ;;  %s510_s30 = scalar_lea.sflag [#allocation18], %s509_s4  ;;  %s522_s19 = int_to_ptr.vmem [resolvable:$true] %s521_s19 }
  0x93   : > { %p4549_p5 = pnand %p7817_p4, %p287_p10  ;;  %s7818_s29 = sld [smem:[#allocation40_spill]] (!%p5631_p1) }
  0x94   : > { %533 = sbr.rel (%p5631_p1) target bundleno = 1512 (0x5e8), region = 52 }
  0x96   : > { %s518_s0 = scalar_lea.hbm %s7816_s16, %s7815_s9 }
  0x97   : > { %s519_s10 = sshll.u32 %s518_s0, 4  ;;  %s520_s10 = int_to_ptr.hbm [resolvable:$true] %s519_s10 }
  0x98   : > { %4551 = dma.hbm_to_vmem [thread:$0]  (!%p4549_p5), %s520_s10, 1024, %s522_s19, %s510_s30, %s7795_s7, %s7795_s7, %s5388_s17  }
  0x99   : > { %s535_s5 = sand.u32 1, %s7818_s29  }
  0x9a   : > { %s3610_s20 = sshll.u32 %s535_s5, 6  ;;  %s536_s11 = scalar_lea.sflag [#allocation6], %s535_s5 }
  0x9b   : > { %s5839_s18 = scalar_lea.vmem [#allocation5], %s3610_s20 }
  0x9c   : > { %5261 = dma.done.wait (%p5709_p12), %s536_s11, 1024  }
  0x9d   : > { %5263 = vsyncadd (%p5709_p12), %s536_s11, 4294966272  ;;  %s7820_s21 = sld [smem:[#allocation37_spill]]  ;;  %s545_s27 = sand.u32 1, %s5549_s8  }
  0x9e   : > { %s546_s22 = scalar_lea.sflag [#allocation9], %s545_s27 }
  0xa3   : > { %s547_s17 = sand.u32 1, %s7820_s21  }
  0xa4   : > { %s3611_s7 = sshll.u32 %s547_s17, 7 }
  0xa5   : > { %s5847_s9 = scalar_lea.vmem [#allocation8], %s3611_s7 }
  0xa6   : > { %5265 = dma.done.wait (%p5588_p9), %s546_s22, 2048  }
  0xa7   : > { %5267 = vsyncadd (%p5588_p9), %s546_s22, 4294965248  ;;  %s7822_s2 = sld [smem:[#allocation35_spill]] }
  0xad   : > { %s557_s16 = sand.u32 1, %s7822_s2  }
  0xae   : > { %s3612_s0 = sshll.u32 %s557_s16, 6 }
  0xaf   : > { %s5854_s10 = scalar_lea.vmem [#allocation10], %s3612_s0 }
  0xb0   : > { %5269 = dma.done.wait (%p5660_p0), %s546_s22, 1024  }
  0xb1   : > { %5271 = vsyncadd (%p5660_p0), %s546_s22, 4294966272  ;;  %s566_s8 = scalar_lea.sflag [#allocation12], %s545_s27  ;;  %s5860_s12 = scalar_lea.vmem [#allocation11], %s557_s16 }
  0xb2   : > { %5273 = dma.done.wait (%p5660_p0), %s566_s8, 16  }
  0xb3   : > { %5275 = vsyncadd (%p5660_p0), %s566_s8, 4294967280  ;;  %s3613_s19 = sshll.u32 %s535_s5, 9 }
  0xb4   : > { %s5866_s30 = scalar_lea.vmem [#allocation13], %s3613_s19 }
  0xb5   : > { %5277 = dma.done.wait (%p5709_p12), %s566_s8, 8192  }
  0xb6   : > { %5279 = vsyncadd (%p5709_p12), %s566_s8, 4294959104  ;;  %s3614_s29 = sshll.u32 %s535_s5, 2  ;;  %s585_s20 = scalar_lea.sflag [#allocation15], %s545_s27 }
  0xb7   : > { %s5872_s11 = scalar_lea.vmem [#allocation14], %s3614_s29 }
  0xb8   : > { %5281 = dma.done.wait (%p5709_p12), %s585_s20, 64  }
  0xb9   : > { %5283 = vsyncadd (%p5709_p12), %s585_s20, 4294967232  ;;  %s7824_s21 = sld [smem:[#allocation33_spill]]  ;;  %p7825_p3 = scmp.ne.s32.totalorder %s7807_s15, 0 }
  0xbf   : > { %s596_s4 = sand.u32 1, %s7824_s21  }
  0xc0   : > { %s3615_s17 = sshll.u32 %s596_s4, 7 }
  0xc1   : > { %s5879_s7 = scalar_lea.vmem [#allocation16], %s3615_s17 }
  0xc2   : > { %5285 = dma.done.wait (%p7825_p3), %s585_s20, 2048  }
  0xc3   : > { %5287 = vsyncadd (%p7825_p3), %s585_s20, 4294965248  ;;  %s7826_s5 = sld [smem:[#allocation30_spill]] }
  0xc9   : > { %s5886_s27 = sand.u32 1, %s7826_s5  }
  0xca   : > { %s3616_s22 = sshll.u32 %s5886_s27, 6  ;;  %s605_s28 = scalar_lea.sflag [#allocation18], %s5886_s27 }
  0xcb   : > { %s5890_s2 = scalar_lea.vmem [#allocation17], %s3616_s22 }
  0xcc   : > { %5289 = dma.done.wait (%p5811_p11), %s605_s28, 1024  }
  0xcd   : > { %5291 = vsyncadd (%p5811_p11), %s605_s28, 4294966272  ;;  %s7827_s23 = sld [smem:[#allocation43_spill]]  ;;  %s3617_s15 = sshll.u32 %s5886_s27, 7 }
  0xce   : > { %s7828_s16 = sld [smem:[#allocation42_spill]]  ;;  %s5899_s0 = scalar_lea.vmem [#allocation19], %s3617_s15 }
  0xd3   : > { %p690_p9 = scmp.eq.s32.totalorder %s7827_s23, 0 }
  0xd4   : > { %p691_p10 = scmp.eq.s32.totalorder %s7828_s16, 0 }
  0xd6   : > { %p692_p1 = pnand %p691_p10, %p690_p9 }
  0xd8   : > { %695 = sbr.rel (%p692_p1) target bundleno = 230 (0xe6), region = 88 }
  0xdd   : > { %v696_v0 = vld [vmem:[%s5839_s18] sm:$0xff]   ;;  %v698_v1 = vld [vmem:[%s5839_s18 + $0x8] sm:$0xff]   ;;  %v700_v2 = vld [vmem:[%s5839_s18 + $0x10] sm:$0xff]  }
  0xde   : > { %712 = vst [vmem:[#allocation4] sm:$0xff] %v696_v0   ;;  %v702_v3 = vld [vmem:[%s5839_s18 + $0x18] sm:$0xff]   ;;  %v704_v4 = vld [vmem:[%s5839_s18 + $0x20] sm:$0xff]   ;;  %v706_v5 = vld [vmem:[%s5839_s18 + $0x28] sm:$0xff]  }
  0xdf   : > { %714 = vst [vmem:[#allocation4 + $0x8] sm:$0xff] %v698_v1   ;;  %v708_v6 = vld [vmem:[%s5839_s18 + $0x30] sm:$0xff]   ;;  %v710_v7 = vld [vmem:[%s5839_s18 + $0x38] sm:$0xff]  }
  0xe0   : > { %716 = vst [vmem:[#allocation4 + $0x10] sm:$0xff] %v700_v2  }
  0xe1   : > { %718 = vst [vmem:[#allocation4 + $0x18] sm:$0xff] %v702_v3  }
  0xe2   : > { %720 = vst [vmem:[#allocation4 + $0x20] sm:$0xff] %v704_v4  }
  0xe3   : > { %722 = vst [vmem:[#allocation4 + $0x28] sm:$0xff] %v706_v5  }
  0xe4   : > { %724 = vst [vmem:[#allocation4 + $0x30] sm:$0xff] %v708_v6  }
  0xe5   : > { %726 = vst [vmem:[#allocation4 + $0x38] sm:$0xff] %v710_v7  }
  0xe6 PF: > { %s7829_s6 = sld [smem:[#allocation42_spill]] }
  0xec   : > { %p3618_p0 = scmp.ne.s32.totalorder %s7829_s6, 0 }
  0xee   : > { %730 = sbr.rel (%p3618_p0) target bundleno = 260 (0x104), region = 92 }
  0xf3   : > { %v5390_v8 = vmov 0.0  }
  0xf4   : > { %731 = vst [vmem:[#allocation3 + $0x28] sm:$0xff] %v5390_v8 }
  0xf5   : > { %732 = vst [vmem:[#allocation3 + $0x68] sm:$0xff] %v5390_v8 }
  0xf6   : > { %733 = vst [vmem:[#allocation3 + $0x10] sm:$0xff] %v5390_v8 }
  0xf7   : > { %734 = vst [vmem:[#allocation3 + $0x40] sm:$0xff] %v5390_v8 }
  0xf8   : > { %735 = vst [vmem:[#allocation3 + $0x48] sm:$0xff] %v5390_v8 }
  0xf9   : > { %736 = vst [vmem:[#allocation3 + $0x30] sm:$0xff] %v5390_v8 }
  0xfa   : > { %737 = vst [vmem:[#allocation3 + $0x70] sm:$0xff] %v5390_v8 }
  0xfb   : > { %738 = vst [vmem:[#allocation3 + $0x38] sm:$0xff] %v5390_v8 }
  0xfc   : > { %739 = vst [vmem:[#allocation3 + $0x20] sm:$0xff] %v5390_v8 }
  0xfd   : > { %740 = vst [vmem:[#allocation3 + $0x78] sm:$0xff] %v5390_v8 }
  0xfe   : > { %741 = vst [vmem:[#allocation3 + $0x18] sm:$0xff] %v5390_v8 }
  0xff   : > { %742 = vst [vmem:[#allocation3 + $0x58] sm:$0xff] %v5390_v8 }
 0x100   : > { %743 = vst [vmem:[#allocation3] sm:$0xff] %v5390_v8 }
 0x101   : > { %744 = vst [vmem:[#allocation3 + $0x8] sm:$0xff] %v5390_v8 }
 0x102   : > { %745 = vst [vmem:[#allocation3 + $0x60] sm:$0xff] %v5390_v8 }
 0x103   : > { %746 = vst [vmem:[#allocation3 + $0x50] sm:$0xff] %v5390_v8 }
 0x104 PF: > { %v3709_v9 = vld [vmem:[%s5847_s9 + $0x70] sm:$0xf]  ;;  %v4229_v10 = vld [vmem:[%s5847_s9 + $0x74] sm:$0xf0]  ;;  %v4228_v11 = vld [vmem:[%s5847_s9 + $0x74] sm:$0xf] }
 0x105   : > { %v3710_v12 = vor.u32 %v4229_v10, %v3709_v9  ;;  %v3711_v13 = vld [vmem:[%s5847_s9 + $0x78] sm:$0xf0]  ;;  %v3701_v14 = vld [vmem:[%s5847_s9 + $0x60] sm:$0xf]  ;;  %v4227_v15 = vld [vmem:[%s5847_s9 + $0x64] sm:$0xf0] }
 0x106   : > { %v3714_v16 = vor.u32 %v4228_v11, %v3711_v13  ;;  %v4226_v17 = vld [vmem:[%s5847_s9 + $0x64] sm:$0xf]  ;;  %v3703_v18 = vld [vmem:[%s5847_s9 + $0x68] sm:$0xf0]  ;;  %v3702_v19 = vor.u32 %v4227_v15, %v3701_v14  ;;  %v3693_v21 = vld [vmem:[%s5847_s9 + $0x50] sm:$0xf] }
 0x107   : > { %907 = vmatpush.bf16.msra.mxu0 %v3710_v12  ;;  %v3706_v20 = vor.u32 %v4226_v17, %v3703_v18  ;;  %v4225_v22 = vld [vmem:[%s5847_s9 + $0x54] sm:$0xf0]  ;;  %v4224_v23 = vld [vmem:[%s5847_s9 + $0x54] sm:$0xf]  ;;  %v3695_v24 = vld [vmem:[%s5847_s9 + $0x58] sm:$0xf0] }
 0x108   : > { %956 = vmatpush.bf16.msra.mxu1 %v3714_v16  ;;  %v3694_v25 = vor.u32 %v4225_v22, %v3693_v21  ;;  %v3698_v26 = vor.u32 %v4224_v23, %v3695_v24  ;;  %v3685_v27 = vld [vmem:[%s5847_s9 + $0x40] sm:$0xf]  ;;  %v4223_v28 = vld [vmem:[%s5847_s9 + $0x44] sm:$0xf0]  ;;  %v4222_v29 = vld [vmem:[%s5847_s9 + $0x44] sm:$0xf] }
 0x109   : > { %v3687_v30 = vld [vmem:[%s5847_s9 + $0x48] sm:$0xf0]  ;;  %v3686_v31 = vor.u32 %v4223_v28, %v3685_v27  ;;  %v3677_v33 = vld [vmem:[%s5847_s9 + $0x30] sm:$0xf]  ;;  %v4221_v34 = vld [vmem:[%s5847_s9 + $0x34] sm:$0xf0] }
 0x10a   : > { %v3690_v32 = vor.u32 %v4222_v29, %v3687_v30  ;;  %v4220_v35 = vld [vmem:[%s5847_s9 + $0x34] sm:$0xf]  ;;  %v3679_v36 = vld [vmem:[%s5847_s9 + $0x38] sm:$0xf0]  ;;  %v3678_v37 = vor.u32 %v4221_v34, %v3677_v33  ;;  %v3669_v39 = vld [vmem:[%s5847_s9 + $0x20] sm:$0xf] }
 0x10b   : > { %908 = vmatpush.bf16.msra.mxu0 %v3702_v19  ;;  %v3682_v38 = vor.u32 %v4220_v35, %v3679_v36  ;;  %v4219_v40 = vld [vmem:[%s5847_s9 + $0x24] sm:$0xf0]  ;;  %v4218_v41 = vld [vmem:[%s5847_s9 + $0x24] sm:$0xf]  ;;  %v3671_v42 = vld [vmem:[%s5847_s9 + $0x28] sm:$0xf0] }
 0x10c   : > { %957 = vmatpush.bf16.msra.mxu1 %v3706_v20  ;;  %v3670_v43 = vor.u32 %v4219_v40, %v3669_v39  ;;  %v3674_v44 = vor.u32 %v4218_v41, %v3671_v42  ;;  %v3661_v45 = vld [vmem:[%s5847_s9 + $0x10] sm:$0xf]  ;;  %v4217_v46 = vld [vmem:[%s5847_s9 + $0x14] sm:$0xf0]  ;;  %v4216_v47 = vld [vmem:[%s5847_s9 + $0x14] sm:$0xf] }
 0x10d   : > { %v3663_v48 = vld [vmem:[%s5847_s9 + $0x18] sm:$0xf0]  ;;  %v3662_v49 = vor.u32 %v4217_v46, %v3661_v45  ;;  %v3653_v51 = vld [vmem:[%s5847_s9] sm:$0xf]  ;;  %v4215_v52 = vld [vmem:[%s5847_s9 + $0x4] sm:$0xf0] }
 0x10e   : > { %v3666_v50 = vor.u32 %v4216_v47, %v3663_v48  ;;  %v4214_v53 = vld [vmem:[%s5847_s9 + $0x4] sm:$0xf]  ;;  %v3655_v54 = vld [vmem:[%s5847_s9 + $0x8] sm:$0xf0]  ;;  %v3654_v55 = vor.u32 %v4215_v52, %v3653_v51  ;;  %v5950_v59 = vld [vmem:[#allocation4 + $0x10] sm:$0xff]  ;;  %s7830_s18 = sld [smem:[#allocation42_spill]] }
 0x10f   : > { %909 = vmatpush.bf16.msra.mxu0 %v3694_v25  ;;  %v3658_v56 = vor.u32 %v4214_v53, %v3655_v54  ;;  %v5942_v57 = vld [vmem:[#allocation4] sm:$0xff]  ;;  %v5946_v58 = vld [vmem:[#allocation4 + $0x8] sm:$0xff]  ;;  %v5954_v60 = vld [vmem:[#allocation4 + $0x18] sm:$0xff] }
 0x110   : > { %958 = vmatpush.bf16.msra.mxu1 %v3698_v26  ;;  %v5958_v61 = vld [vmem:[#allocation4 + $0x20] sm:$0xff]  ;;  %v5962_v62 = vld [vmem:[#allocation4 + $0x28] sm:$0xff]  ;;  %v5966_v63 = vld [vmem:[#allocation4 + $0x30] sm:$0xff] }
 0x111   : > { %v5970_v0 = vld [vmem:[#allocation4 + $0x38] sm:$0xff] }
 0x113   : > { %910 = vmatpush.bf16.msra.mxu0 %v3686_v31 }
 0x114   : > { %959 = vmatpush.bf16.msra.mxu1 %v3690_v32  ;;  %p3843_p12 = scmp.ne.s32.totalorder %s7830_s18, 1 }
 0x115   : > { %s7831_s9 = sld [smem:[#allocation43_spill]] (!%p3843_p12) }
 0x117   : > { %911 = vmatpush.bf16.msra.mxu0 %v3678_v37 }
 0x118   : > { %960 = vmatpush.bf16.msra.mxu1 %v3682_v38 }
 0x11b   : > { %912 = vmatpush.bf16.msra.mxu0 %v3670_v43  ;;  %p3876_p11 = scmp.ne.s32.totalorder (!%p3843_p12), %s7831_s9, 0 }
 0x11c   : > { %961 = vmatpush.bf16.msra.mxu1 %v3674_v44 }
 0x11f   : > { %913 = vmatpush.bf16.msra.mxu0 %v3662_v49 }
 0x120   : > { %962 = vmatpush.bf16.msra.mxu1 %v3666_v50 }
 0x123   : > { %914 = vmatpush.bf16.msra.mxu0 %v3654_v55 }
 0x124   : > { %963 = vmatpush.bf16.msra.mxu1 %v3658_v56 }
 0x126   : > { %915 = vmatmul.bf16.vlgmr.msra.gmra.mxu0 %v5942_v57 }
 0x127   : > { %964 = vmatmul.bf16.vlgmr.msra.gmra.mxu1 %v5942_v57 }
 0x136   : > { %920 = vmatmul.bf16.gmra.mxu0 %v5946_v58 }
 0x137   : > { %969 = vmatmul.bf16.gmra.mxu1 %v5946_v58 }
 0x146   : > { %925 = vmatmul.bf16.gmra.mxu0 %v5950_v59 }
 0x147   : > { %974 = vmatmul.bf16.gmra.mxu1 %v5950_v59 }
 0x156   : > { %930 = vmatmul.bf16.gmra.mxu0 %v5954_v60 }
 0x157   : > { %979 = vmatmul.bf16.gmra.mxu1 %v5954_v60 }
 0x166   : > { %935 = vmatmul.bf16.gmra.mxu0 %v5958_v61 }
 0x167   : > { %984 = vmatmul.bf16.gmra.mxu1 %v5958_v61 }
 0x176   : > { %940 = vmatmul.bf16.gmra.mxu0 %v5962_v62 }
 0x177   : > { %989 = vmatmul.bf16.gmra.mxu1 %v5962_v62 }
 0x186   : > { %945 = vmatmul.bf16.gmra.mxu0 %v5966_v63 }
 0x187   : > { %994 = vmatmul.bf16.gmra.mxu1 %v5966_v63 }
 0x196   : > { %950 = vmatmul.bf16.gmra.mxu0 %v5970_v0 }
 0x197   : > { %999 = vmatmul.bf16.gmra.mxu1 %v5970_v0 }
 0x1a3   : > { %v916_v1 = vpop.f32.mrf.mxu0 }
 0x1a4   : > { %v965_v2 = vpop.f32.mrf.mxu1 }
 0x1ab   : > { %v918_v3 = vpop.f32.mrf.mxu0 }
 0x1ac   : > { %v4346_v4 = vpack.c.bf16 %v918_v3, %v916_v1  ;;  %v967_v5 = vpop.f32.mrf.mxu1 }
 0x1ad   : > { %v4386_v6 = vpack.c.bf16 %v967_v5, %v965_v2 }
 0x1ae   : > { %4347 = vst [vmem:[#allocation2 + $0x30] sm:$0xff] %v4346_v4  }
 0x1af   : > { %4470 = vst [vmem:[#allocation2 + $0x40] sm:$0xff] %v4386_v6  }
 0x1b3   : > { %v921_v7 = vpop.f32.mrf.mxu0 }
 0x1b4   : > { %v970_v8 = vpop.f32.mrf.mxu1 }
 0x1bb   : > { %v923_v9 = vpop.f32.mrf.mxu0 }
 0x1bc   : > { %v4351_v10 = vpack.c.bf16 %v923_v9, %v921_v7  ;;  %v972_v11 = vpop.f32.mrf.mxu1  ;;  %v3717_v7 = vld [vmem:[%s5879_s7] sm:$0xf]  ;;  %v4230_v9 = vld [vmem:[%s5879_s7 + $0x4] sm:$0xf] }
 0x1bd   : > { %v4391_v12 = vpack.c.bf16 %v972_v11, %v970_v8  ;;  %v4231_v8 = vld [vmem:[%s5879_s7 + $0x4] sm:$0xf0] }
 0x1be   : > { %4463 = vst [vmem:[#allocation2] sm:$0xff] %v4351_v10   ;;  %v3719_v10 = vld [vmem:[%s5879_s7 + $0x8] sm:$0xf0] }
 0x1bf   : > { %4471 = vst [vmem:[#allocation2 + $0x20] sm:$0xff] %v4391_v12   ;;  %v4246_v11 = vld [vmem:[#allocation2 + $0x30] sm:$0xff]  ;;  %v4254_v12 = vld [vmem:[#allocation2 + $0x40] sm:$0xff] }
 0x1c3   : > { %v926_v13 = vpop.f32.mrf.mxu0 }
 0x1c4   : > { %v975_v14 = vpop.f32.mrf.mxu1 }
 0x1c5   : > { %v4247_v5 = vld [vmem:[#allocation2] sm:$0xff] }
 0x1c6   : > { %v4255_v6 = vld [vmem:[#allocation2 + $0x20] sm:$0xff] }
 0x1cb   : > { %v928_v15 = vpop.f32.mrf.mxu0 }
 0x1cc   : > { %v4356_v16 = vpack.c.bf16 %v928_v15, %v926_v13  ;;  %v977_v17 = vpop.f32.mrf.mxu1  ;;  %v3718_v13 = vor.u32 %v4231_v8, %v3717_v7  ;;  %v3725_v15 = vld [vmem:[%s5879_s7 + $0x10] sm:$0xf]  ;;  %v1070_v7 = vld [vmem:[#allocation3 + $0x68] sm:$0xff] }
 0x1cd   : > { %v4396_v18 = vpack.c.bf16 %v977_v17, %v975_v14  ;;  %v3722_v14 = vor.u32 %v4230_v9, %v3719_v10  ;;  %v4232_v17 = vld [vmem:[%s5879_s7 + $0x14] sm:$0xf] }
 0x1ce   : > { %4464 = vst [vmem:[#allocation2 + $0x58] sm:$0xff] %v4356_v16   ;;  %v4233_v16 = vld [vmem:[%s5879_s7 + $0x14] sm:$0xf0] }
 0x1cf   : > { %4472 = vst [vmem:[#allocation2 + $0x10] sm:$0xff] %v4396_v18   ;;  %v3727_v18 = vld [vmem:[%s5879_s7 + $0x18] sm:$0xf0] }
 0x1d3   : > { %v931_v19 = vpop.f32.mrf.mxu0 }
 0x1d4   : > { %v980_v20 = vpop.f32.mrf.mxu1 }
 0x1d5   : > { %v4248_v3 = vld [vmem:[#allocation2 + $0x58] sm:$0xff] }
 0x1d6   : > { %v4256_v4 = vld [vmem:[#allocation2 + $0x10] sm:$0xff] }
 0x1db   : > { %v933_v21 = vpop.f32.mrf.mxu0 }
 0x1dc   : > { %v4361_v22 = vpack.c.bf16 %v933_v21, %v931_v19  ;;  %v982_v23 = vpop.f32.mrf.mxu1  ;;  %v3726_v19 = vor.u32 %v4233_v16, %v3725_v15  ;;  %v3733_v21 = vld [vmem:[%s5879_s7 + $0x20] sm:$0xf] }
 0x1dd   : > { %v4401_v24 = vpack.c.bf16 %v982_v23, %v980_v20  ;;  %v3730_v20 = vor.u32 %v4232_v17, %v3727_v18  ;;  %v4234_v23 = vld [vmem:[%s5879_s7 + $0x24] sm:$0xf]  ;;  %v1072_v17 = vld [vmem:[#allocation3 + $0x40] sm:$0xff] }
 0x1de   : > { %4465 = vst [vmem:[#allocation2 + $0x18] sm:$0xff] %v4361_v22   ;;  %v4235_v22 = vld [vmem:[%s5879_s7 + $0x24] sm:$0xf0] }
 0x1df   : > { %4473 = vst [vmem:[#allocation2 + $0x38] sm:$0xff] %v4401_v24   ;;  %v3735_v24 = vld [vmem:[%s5879_s7 + $0x28] sm:$0xf0] }
 0x1e3   : > { %v936_v25 = vpop.f32.mrf.mxu0 }
 0x1e4   : > { %v985_v26 = vpop.f32.mrf.mxu1 }
 0x1e5   : > { %v4249_v1 = vld [vmem:[#allocation2 + $0x18] sm:$0xff] }
 0x1e6   : > { %v4257_v2 = vld [vmem:[#allocation2 + $0x38] sm:$0xff] }
 0x1eb   : > { %v938_v27 = vpop.f32.mrf.mxu0 }
 0x1ec   : > { %v4366_v28 = vpack.c.bf16 %v938_v27, %v936_v25  ;;  %v987_v29 = vpop.f32.mrf.mxu1  ;;  %v3734_v25 = vor.u32 %v4235_v22, %v3733_v21  ;;  %v3741_v27 = vld [vmem:[%s5879_s7 + $0x30] sm:$0xf]  ;;  %v1073_v22 = vld [vmem:[#allocation3 + $0x48] sm:$0xff] }
 0x1ed   : > { %v4406_v30 = vpack.c.bf16 %v987_v29, %v985_v26  ;;  %v3738_v26 = vor.u32 %v4234_v23, %v3735_v24  ;;  %v4236_v29 = vld [vmem:[%s5879_s7 + $0x34] sm:$0xf] }
 0x1ee   : > { %4466 = vst [vmem:[#allocation2 + $0x50] sm:$0xff] %v4366_v28   ;;  %v4237_v28 = vld [vmem:[%s5879_s7 + $0x34] sm:$0xf0] }
 0x1ef   : > { %4474 = vst [vmem:[#allocation2 + $0x60] sm:$0xff] %v4406_v30   ;;  %v3743_v30 = vld [vmem:[%s5879_s7 + $0x38] sm:$0xf0] }
 0x1f3   : > { %v941_v31 = vpop.f32.mrf.mxu0 }
 0x1f4   : > { %v990_v32 = vpop.f32.mrf.mxu1 }
 0x1f5   : > { %v4250_v55 = vld [vmem:[#allocation2 + $0x50] sm:$0xff] }
 0x1f6   : > { %v4258_v56 = vld [vmem:[#allocation2 + $0x60] sm:$0xff] }
 0x1fb   : > { %v943_v33 = vpop.f32.mrf.mxu0 }
 0x1fc   : > { %v4371_v34 = vpack.c.bf16 %v943_v33, %v941_v31  ;;  %v992_v35 = vpop.f32.mrf.mxu1  ;;  %v3742_v31 = vor.u32 %v4237_v28, %v3741_v27  ;;  %v3749_v33 = vld [vmem:[%s5879_s7 + $0x40] sm:$0xf]  ;;  %v1074_v27 = vld [vmem:[#allocation3 + $0x30] sm:$0xff] }
 0x1fd   : > { %v4411_v36 = vpack.c.bf16 %v992_v35, %v990_v32  ;;  %v3746_v32 = vor.u32 %v4236_v29, %v3743_v30  ;;  %v4238_v35 = vld [vmem:[%s5879_s7 + $0x44] sm:$0xf] }
 0x1fe   : > { %4467 = vst [vmem:[#allocation2 + $0x68] sm:$0xff] %v4371_v34   ;;  %v4239_v34 = vld [vmem:[%s5879_s7 + $0x44] sm:$0xf0] }
 0x1ff   : > { %4475 = vst [vmem:[#allocation2 + $0x70] sm:$0xff] %v4411_v36   ;;  %v3751_v36 = vld [vmem:[%s5879_s7 + $0x48] sm:$0xf0] }
 0x203   : > { %v946_v37 = vpop.f32.mrf.mxu0 }
 0x204   : > { %v995_v38 = vpop.f32.mrf.mxu1 }
 0x205   : > { %v4251_v53 = vld [vmem:[#allocation2 + $0x68] sm:$0xff] }
 0x206   : > { %v4259_v54 = vld [vmem:[#allocation2 + $0x70] sm:$0xff] }
 0x20b   : > { %v948_v39 = vpop.f32.mrf.mxu0 }
 0x20c   : > { %v4376_v40 = vpack.c.bf16 %v948_v39, %v946_v37  ;;  %v997_v41 = vpop.f32.mrf.mxu1  ;;  %v3750_v37 = vor.u32 %v4239_v34, %v3749_v33  ;;  %v3757_v39 = vld [vmem:[%s5879_s7 + $0x50] sm:$0xf] }
 0x20d   : > { %v4416_v42 = vpack.c.bf16 %v997_v41, %v995_v38  ;;  %v3754_v38 = vor.u32 %v4238_v35, %v3751_v36  ;;  %v4240_v41 = vld [vmem:[%s5879_s7 + $0x54] sm:$0xf] }
 0x20e   : > { %4468 = vst [vmem:[#allocation2 + $0x8] sm:$0xff] %v4376_v40   ;;  %v4241_v40 = vld [vmem:[%s5879_s7 + $0x54] sm:$0xf0] }
 0x20f   : > { %4476 = vst [vmem:[#allocation2 + $0x78] sm:$0xff] %v4416_v42   ;;  %v3759_v42 = vld [vmem:[%s5879_s7 + $0x58] sm:$0xf0] }
 0x213   : > { %v951_v43 = vpop.f32.mrf.mxu0 }
 0x214   : > { %v1000_v44 = vpop.f32.mrf.mxu1 }
 0x215   : > { %v4252_v51 = vld [vmem:[#allocation2 + $0x8] sm:$0xff] }
 0x216   : > { %v4260_v52 = vld [vmem:[#allocation2 + $0x78] sm:$0xff] }
 0x21b   : > { %v953_v45 = vpop.f32.mrf.mxu0 }
 0x21c   : > { %v4381_v46 = vpack.c.bf16 %v953_v45, %v951_v43  ;;  %v1002_v47 = vpop.f32.mrf.mxu1  ;;  %v3758_v43 = vor.u32 %v4241_v40, %v3757_v39  ;;  %v3765_v45 = vld [vmem:[%s5879_s7 + $0x60] sm:$0xf] }
 0x21d   : > { %v4421_v48 = vpack.c.bf16 %v1002_v47, %v1000_v44  ;;  %v3762_v44 = vor.u32 %v4240_v41, %v3759_v42  ;;  %v4242_v47 = vld [vmem:[%s5879_s7 + $0x64] sm:$0xf]  ;;  %v1077_v42 = vld [vmem:[#allocation3 + $0x20] sm:$0xff] }
 0x21e   : > { %4469 = vst [vmem:[#allocation2 + $0x48] sm:$0xff] %v4381_v46   ;;  %v4243_v46 = vld [vmem:[%s5879_s7 + $0x64] sm:$0xf0] }
 0x21f   : > { %4477 = vst [vmem:[#allocation2 + $0x28] sm:$0xff] %v4421_v48   ;;  %v3767_v48 = vld [vmem:[%s5879_s7 + $0x68] sm:$0xf0] }
 0x225   : > { %v4253_v49 = vld [vmem:[#allocation2 + $0x48] sm:$0xff] }
 0x226   : > { %v4261_v50 = vld [vmem:[#allocation2 + $0x28] sm:$0xff]  ;;  %1309 = vmatpush.bf16.msra.mxu2 %v4253_v49  ;;  %v3766_v49 = vor.u32 %v4243_v46, %v3765_v45 }
 0x227   : > { %1358 = vmatpush.bf16.msra.mxu3 %v4261_v50  ;;  %v3770_v50 = vor.u32 %v4242_v47, %v3767_v48  ;;  %v1078_v47 = vld [vmem:[#allocation3 + $0x78] sm:$0xff] }
 0x22a   : > { %1310 = vmatpush.bf16.msra.mxu2 %v4252_v51  ;;  %v3773_v51 = vld [vmem:[%s5879_s7 + $0x70] sm:$0xf] }
 0x22b   : > { %1359 = vmatpush.bf16.msra.mxu3 %v4260_v52  ;;  %v4245_v52 = vld [vmem:[%s5879_s7 + $0x74] sm:$0xf0] }
 0x22e   : > { %1311 = vmatpush.bf16.msra.mxu2 %v4251_v53  ;;  %v4244_v53 = vld [vmem:[%s5879_s7 + $0x74] sm:$0xf] }
 0x22f   : > { %1360 = vmatpush.bf16.msra.mxu3 %v4259_v54  ;;  %v3775_v54 = vld [vmem:[%s5879_s7 + $0x78] sm:$0xf0] }
 0x232   : > { %1312 = vmatpush.bf16.msra.mxu2 %v4250_v55  ;;  %v3774_v55 = vor.u32 %v4245_v52, %v3773_v51  ;;  %v1079_v52 = vld [vmem:[#allocation3 + $0x18] sm:$0xff] }
 0x233   : > { %1361 = vmatpush.bf16.msra.mxu3 %v4258_v56  ;;  %v3778_v56 = vor.u32 %v4244_v53, %v3775_v54 }
 0x236   : > { %1313 = vmatpush.bf16.msra.mxu2 %v4249_v1 }
 0x237   : > { %1362 = vmatpush.bf16.msra.mxu3 %v4257_v2  ;;  %v1069_v2 = vld [vmem:[#allocation3 + $0x28] sm:$0xff] }
 0x23a   : > { %1314 = vmatpush.bf16.msra.mxu2 %v4248_v3 }
 0x23b   : > { %1363 = vmatpush.bf16.msra.mxu3 %v4256_v4 }
 0x23e   : > { %1315 = vmatpush.bf16.msra.mxu2 %v4247_v5 }
 0x23f   : > { %1364 = vmatpush.bf16.msra.mxu3 %v4255_v6 }
 0x242   : > { %1316 = vmatpush.bf16.msra.mxu2 %v4246_v11 }
 0x243   : > { %1365 = vmatpush.bf16.msra.mxu3 %v4254_v12  ;;  %v1071_v12 = vld [vmem:[#allocation3 + $0x10] sm:$0xff] }
 0x245   : > { %1317 = vmatmul.bf16.vlgmr.msra.gmra.mxu2 %v3718_v13 }
 0x246   : > { %1366 = vmatmul.bf16.vlgmr.msra.gmra.mxu3 %v3722_v14 }
 0x255   : > { %1322 = vmatmul.bf16.gmra.mxu2 %v3726_v19 }
 0x256   : > { %1371 = vmatmul.bf16.gmra.mxu3 %v3730_v20 }
 0x265   : > { %1327 = vmatmul.bf16.gmra.mxu2 %v3734_v25 }
 0x266   : > { %1376 = vmatmul.bf16.gmra.mxu3 %v3738_v26 }
 0x275   : > { %1332 = vmatmul.bf16.gmra.mxu2 %v3742_v31 }
 0x276   : > { %1381 = vmatmul.bf16.gmra.mxu3 %v3746_v32  ;;  %v1075_v32 = vld [vmem:[#allocation3 + $0x70] sm:$0xff] }
 0x285   : > { %1337 = vmatmul.bf16.gmra.mxu2 %v3750_v37  ;;  %v1076_v37 = vld [vmem:[#allocation3 + $0x38] sm:$0xff] }
 0x286   : > { %1386 = vmatmul.bf16.gmra.mxu3 %v3754_v38 }
 0x295   : > { %1342 = vmatmul.bf16.gmra.mxu2 %v3758_v43 }
 0x296   : > { %1391 = vmatmul.bf16.gmra.mxu3 %v3762_v44 }
 0x2a5   : > { %1347 = vmatmul.bf16.gmra.mxu2 %v3766_v49 }
 0x2a6   : > { %1396 = vmatmul.bf16.gmra.mxu3 %v3770_v50 }
 0x2b5   : > { %1352 = vmatmul.bf16.gmra.mxu2 %v3774_v55 }
 0x2b6   : > { %1401 = vmatmul.bf16.gmra.mxu3 %v3778_v56 }
 0x2c8   : > { %v1318_v1 = vpop.f32.mrf.mxu2 }
 0x2c9   : > { %v1367_v3 = vpop.f32.mrf.mxu3 }
 0x2ca   : > { %v1368_v4 = vadd.f32 %v1367_v3, %v1318_v1  ;;  %v1080_v1 = vld [vmem:[#allocation3 + $0x58] sm:$0xff] }
 0x2cc   : > { %v1407_v5 = vadd.f32 %v1368_v4, %v1069_v2 }
 0x2ce   : > { %1423 = vst [vmem:[#allocation3 + $0x28] sm:$0xff] %v1407_v5 }
 0x2d0   : > { %v1320_v6 = vpop.f32.mrf.mxu2 }
 0x2d1   : > { %v1369_v8 = vpop.f32.mrf.mxu3 }
 0x2d2   : > { %v1370_v9 = vadd.f32 %v1369_v8, %v1320_v6  ;;  %v1081_v6 = vld [vmem:[#allocation3] sm:$0xff] }
 0x2d4   : > { %v1408_v10 = vadd.f32 %v1370_v9, %v1070_v7 }
 0x2d6   : > { %1424 = vst [vmem:[#allocation3 + $0x68] sm:$0xff] %v1408_v10 }
 0x2d8   : > { %v1323_v11 = vpop.f32.mrf.mxu2 }
 0x2d9   : > { %v1372_v13 = vpop.f32.mrf.mxu3 }
 0x2da   : > { %v1373_v14 = vadd.f32 %v1372_v13, %v1323_v11  ;;  %v1082_v11 = vld [vmem:[#allocation3 + $0x8] sm:$0xff] }
 0x2dc   : > { %v1409_v15 = vadd.f32 %v1373_v14, %v1071_v12 }
 0x2de   : > { %1425 = vst [vmem:[#allocation3 + $0x10] sm:$0xff] %v1409_v15 }
 0x2e0   : > { %v1325_v16 = vpop.f32.mrf.mxu2 }
 0x2e1   : > { %v1374_v18 = vpop.f32.mrf.mxu3 }
 0x2e2   : > { %v1375_v19 = vadd.f32 %v1374_v18, %v1325_v16  ;;  %v1083_v16 = vld [vmem:[#allocation3 + $0x60] sm:$0xff] }
 0x2e4   : > { %v1410_v20 = vadd.f32 %v1375_v19, %v1072_v17 }
 0x2e6   : > { %1426 = vst [vmem:[#allocation3 + $0x40] sm:$0xff] %v1410_v20 }
 0x2e8   : > { %v1328_v21 = vpop.f32.mrf.mxu2 }
 0x2e9   : > { %v1377_v23 = vpop.f32.mrf.mxu3 }
 0x2ea   : > { %v1378_v24 = vadd.f32 %v1377_v23, %v1328_v21  ;;  %v1084_v21 = vld [vmem:[#allocation3 + $0x50] sm:$0xff] }
 0x2ec   : > { %v1411_v25 = vadd.f32 %v1378_v24, %v1073_v22 }
 0x2ee   : > { %1427 = vst [vmem:[#allocation3 + $0x48] sm:$0xff] %v1411_v25 }
 0x2f0   : > { %v1330_v26 = vpop.f32.mrf.mxu2 }
 0x2f1   : > { %v1379_v28 = vpop.f32.mrf.mxu3 }
 0x2f2   : > { %v1380_v29 = vadd.f32 %v1379_v28, %v1330_v26 }
 0x2f4   : > { %v1412_v30 = vadd.f32 %v1380_v29, %v1074_v27 }
 0x2f6   : > { %1428 = vst [vmem:[#allocation3 + $0x30] sm:$0xff] %v1412_v30 }
 0x2f8   : > { %v1333_v31 = vpop.f32.mrf.mxu2 }
 0x2f9   : > { %v1382_v33 = vpop.f32.mrf.mxu3 }
 0x2fa   : > { %v1383_v34 = vadd.f32 %v1382_v33, %v1333_v31 }
 0x2fc   : > { %v1413_v35 = vadd.f32 %v1383_v34, %v1075_v32 }
 0x2fe   : > { %1429 = vst [vmem:[#allocation3 + $0x70] sm:$0xff] %v1413_v35 }
 0x300   : > { %v1335_v36 = vpop.f32.mrf.mxu2 }
 0x301   : > { %v1384_v38 = vpop.f32.mrf.mxu3 }
 0x302   : > { %v1385_v39 = vadd.f32 %v1384_v38, %v1335_v36 }
 0x304   : > { %v1414_v40 = vadd.f32 %v1385_v39, %v1076_v37 }
 0x306   : > { %1430 = vst [vmem:[#allocation3 + $0x38] sm:$0xff] %v1414_v40 }
 0x308   : > { %v1338_v41 = vpop.f32.mrf.mxu2 }
 0x309   : > { %v1387_v43 = vpop.f32.mrf.mxu3 }
 0x30a   : > { %v1388_v44 = vadd.f32 %v1387_v43, %v1338_v41 }
 0x30c   : > { %v1415_v45 = vadd.f32 %v1388_v44, %v1077_v42 }
 0x30e   : > { %1431 = vst [vmem:[#allocation3 + $0x20] sm:$0xff] %v1415_v45 }
 0x310   : > { %v1340_v46 = vpop.f32.mrf.mxu2 }
 0x311   : > { %v1389_v48 = vpop.f32.mrf.mxu3 }
 0x312   : > { %v1390_v49 = vadd.f32 %v1389_v48, %v1340_v46 }
 0x314   : > { %v1416_v50 = vadd.f32 %v1390_v49, %v1078_v47 }
 0x316   : > { %1432 = vst [vmem:[#allocation3 + $0x78] sm:$0xff] %v1416_v50 }
 0x318   : > { %v1343_v51 = vpop.f32.mrf.mxu2 }
 0x319   : > { %v1392_v53 = vpop.f32.mrf.mxu3 }
 0x31a   : > { %v1393_v54 = vadd.f32 %v1392_v53, %v1343_v51 }
 0x31c   : > { %v1417_v55 = vadd.f32 %v1393_v54, %v1079_v52 }
 0x31e   : > { %1433 = vst [vmem:[#allocation3 + $0x18] sm:$0xff] %v1417_v55 }
 0x320   : > { %v1345_v56 = vpop.f32.mrf.mxu2 }
 0x321   : > { %v1394_v2 = vpop.f32.mrf.mxu3 }
 0x322   : > { %v1395_v3 = vadd.f32 %v1394_v2, %v1345_v56 }
 0x324   : > { %v1418_v4 = vadd.f32 %v1395_v3, %v1080_v1 }
 0x326   : > { %1434 = vst [vmem:[#allocation3 + $0x58] sm:$0xff] %v1418_v4 }
 0x328   : > { %v1348_v5 = vpop.f32.mrf.mxu2 }
 0x329   : > { %v1397_v7 = vpop.f32.mrf.mxu3 }
 0x32a   : > { %v1398_v8 = vadd.f32 %v1397_v7, %v1348_v5 }
 0x32c   : > { %v1419_v9 = vadd.f32 %v1398_v8, %v1081_v6 }
 0x32e   : > { %1435 = vst [vmem:[#allocation3] sm:$0xff] %v1419_v9 }
 0x330   : > { %v1350_v10 = vpop.f32.mrf.mxu2 }
 0x331   : > { %v1399_v12 = vpop.f32.mrf.mxu3 }
 0x332   : > { %v1400_v13 = vadd.f32 %v1399_v12, %v1350_v10 }
 0x334   : > { %v1420_v14 = vadd.f32 %v1400_v13, %v1082_v11 }
 0x336   : > { %1436 = vst [vmem:[#allocation3 + $0x8] sm:$0xff] %v1420_v14 }
 0x338   : > { %v1353_v15 = vpop.f32.mrf.mxu2 }
 0x339   : > { %v1402_v17 = vpop.f32.mrf.mxu3 }
 0x33a   : > { %v1403_v18 = vadd.f32 %v1402_v17, %v1353_v15 }
 0x33c   : > { %v1421_v19 = vadd.f32 %v1403_v18, %v1083_v16 }
 0x33e   : > { %1437 = vst [vmem:[#allocation3 + $0x60] sm:$0xff] %v1421_v19 }
 0x340   : > { %v1355_v20 = vpop.f32.mrf.mxu2 }
 0x341   : > { %v1404_v22 = vpop.f32.mrf.mxu3 }
 0x342   : > { %v1405_v23 = vadd.f32 %v1404_v22, %v1355_v20  ;;  %1442 = sbr.rel (%p3843_p12) target bundleno = 1490 (0x5d2), region = 96 }
 0x344   : > { %v1422_v24 = vadd.f32 %v1405_v23, %v1084_v21 }
 0x346   : > { %1438 = vst [vmem:[#allocation3 + $0x50] sm:$0xff] %v1422_v24 }
 0x347   : > { %v4269_v25 = vld [vmem:[%s5854_s10 + $0x38] sm:$0xff]  ;;  %v4268_v26 = vld [vmem:[%s5854_s10 + $0x30] sm:$0xff]  ;;  %v4267_v27 = vld [vmem:[%s5854_s10 + $0x28] sm:$0xff] }
 0x348   : > { %1523 = vmatpush.bf16.msra.mxu0 %v4269_v25  ;;  %4485 = vmatpush.bf16.msra.mxu1 %v4269_v25  ;;  %v4266_v28 = vld [vmem:[%s5854_s10 + $0x20] sm:$0xff]  ;;  %v4265_v29 = vld [vmem:[%s5854_s10 + $0x18] sm:$0xff]  ;;  %v4264_v30 = vld [vmem:[%s5854_s10 + $0x10] sm:$0xff] }
 0x349   : > { %4486 = vmatpush.bf16.msra.mxu2 %v4269_v25  ;;  %4487 = vmatpush.bf16.msra.mxu3 %v4269_v25  ;;  %v4263_v31 = vld [vmem:[%s5854_s10 + $0x8] sm:$0xff]  ;;  %v4262_v32 = vld [vmem:[%s5854_s10] sm:$0xff]  ;;  %v1448_v40 = vld [vmem:[#allocation3 + $0x30] sm:$0xff] }
 0x34a   : > { %v1443_v33 = vld [vmem:[#allocation3 + $0x28] sm:$0xff]  ;;  %v4743_v35 = vld [vmem:[%s5860_s12] ss:$0 sm:$0xff]  ;;  %v1452_v50 = vld [vmem:[#allocation3 + $0x78] sm:$0xff] }
 0x34b   : > { %v1447_v34 = vld [vmem:[#allocation3 + $0x48] sm:$0xff]  ;;  %v1455_v39 = vld [vmem:[#allocation3] sm:$0xff]  ;;  %v1445_v52 = vld [vmem:[#allocation3 + $0x10] sm:$0xff] }
 0x34c   : > { %1524 = vmatpush.bf16.msra.mxu0 %v4268_v26  ;;  %4488 = vmatpush.bf16.msra.mxu1 %v4268_v26  ;;  %v1456_v51 = vld [vmem:[#allocation3 + $0x8] sm:$0xff]  ;;  %v1449_v53 = vld [vmem:[#allocation3 + $0x70] sm:$0xff]  ;;  %v1453_v10 = vld [vmem:[#allocation3 + $0x18] sm:$0xff] }
 0x34d   : > { %4489 = vmatpush.bf16.msra.mxu2 %v4268_v26  ;;  %4490 = vmatpush.bf16.msra.mxu3 %v4268_v26  ;;  %v1457_v11 = vld [vmem:[#allocation3 + $0x60] sm:$0xff]  ;;  %v1450_v13 = vld [vmem:[#allocation3 + $0x38] sm:$0xff] }
 0x34e   : > { %v1446_v12 = vld [vmem:[#allocation3 + $0x40] sm:$0xff]  ;;  %v1454_v26 = vld [vmem:[#allocation3 + $0x58] sm:$0xff] }
 0x350   : > { %1525 = vmatpush.bf16.msra.mxu0 %v4267_v27  ;;  %4491 = vmatpush.bf16.msra.mxu1 %v4267_v27 }
 0x351   : > { %4492 = vmatpush.bf16.msra.mxu2 %v4267_v27  ;;  %4493 = vmatpush.bf16.msra.mxu3 %v4267_v27  ;;  %v1458_v27 = vld [vmem:[#allocation3 + $0x50] sm:$0xff] }
 0x354   : > { %1526 = vmatpush.bf16.msra.mxu0 %v4266_v28  ;;  %4494 = vmatpush.bf16.msra.mxu1 %v4266_v28 }
 0x355   : > { %4495 = vmatpush.bf16.msra.mxu2 %v4266_v28  ;;  %4496 = vmatpush.bf16.msra.mxu3 %v4266_v28 }
 0x358   : > { %1527 = vmatpush.bf16.msra.mxu0 %v4265_v29  ;;  %4497 = vmatpush.bf16.msra.mxu1 %v4265_v29 }
 0x359   : > { %4498 = vmatpush.bf16.msra.mxu2 %v4265_v29  ;;  %4499 = vmatpush.bf16.msra.mxu3 %v4265_v29 }
 0x35c   : > { %1528 = vmatpush.bf16.msra.mxu0 %v4264_v30  ;;  %4500 = vmatpush.bf16.msra.mxu1 %v4264_v30 }
 0x35d   : > { %4501 = vmatpush.bf16.msra.mxu2 %v4264_v30  ;;  %4502 = vmatpush.bf16.msra.mxu3 %v4264_v30 }
 0x360   : > { %1529 = vmatpush.bf16.msra.mxu0 %v4263_v31  ;;  %4503 = vmatpush.bf16.msra.mxu1 %v4263_v31 }
 0x361   : > { %4504 = vmatpush.bf16.msra.mxu2 %v4263_v31  ;;  %4505 = vmatpush.bf16.msra.mxu3 %v4263_v31 }
 0x364   : > { %1530 = vmatpush.bf16.msra.mxu0 %v4262_v32  ;;  %4506 = vmatpush.bf16.msra.mxu1 %v4262_v32 }
 0x365   : > { %4507 = vmatpush.bf16.msra.mxu2 %v4262_v32  ;;  %4508 = vmatpush.bf16.msra.mxu3 %v4262_v32 }
 0x367   : > { %1531 = vmatmul.bf16.vlgmr.msra.gmra.mxu0 %v5942_v57  ;;  %1541 = vmatmul.bf16.vlgmr.msra.gmra.mxu1 %v5950_v59 }
 0x368   : > { %1551 = vmatmul.bf16.vlgmr.msra.gmra.mxu2 %v5958_v61  ;;  %1561 = vmatmul.bf16.vlgmr.msra.gmra.mxu3 %v5966_v63  ;;  %v1451_v63 = vld [vmem:[#allocation3 + $0x20] sm:$0xff] }
 0x377   : > { %1536 = vmatmul.bf16.gmra.mxu0 %v5946_v58  ;;  %1546 = vmatmul.bf16.gmra.mxu1 %v5954_v60  ;;  %v1444_v58 = vld [vmem:[#allocation3 + $0x68] sm:$0xff] }
 0x378   : > { %1556 = vmatmul.bf16.gmra.mxu2 %v5962_v62  ;;  %1566 = vmatmul.bf16.gmra.mxu3 %v5970_v0 }
 0x3e4   : > { %v1532_v36 = vpop.f32.mrf.mxu0  ;;  %v1542_v37 = vpop.f32.mrf.mxu1 }
 0x3e5   : > { %v1572_v57 = vadd.f32 %v1532_v36, %v1443_v33  ;;  %v1576_v38 = vadd.f32 %v1542_v37, %v1447_v34 }
 0x3e7   : > { %v6024_v59 = vadd.f32 %v4743_v35, %v1572_v57  ;;  %v6026_v61 = vadd.f32 %v4743_v35, %v1576_v38 }
 0x3eb   : > { %v1552_v60 = vpop.f32.mrf.mxu2  ;;  %v1562_v41 = vpop.f32.mrf.mxu3 }
 0x3ec   : > { %v1580_v62 = vadd.f32 %v1552_v60, %v1451_v63  ;;  %v1584_v42 = vadd.f32 %v1562_v41, %v1455_v39  ;;  %v1534_v0 = vpop.f32.mrf.mxu0  ;;  %v1544_v43 = vpop.f32.mrf.mxu1 }
 0x3ed   : > { %v1573_v44 = vadd.f32 %v1534_v0, %v1444_v58  ;;  %v1577_v45 = vadd.f32 %v1544_v43, %v1448_v40 }
 0x3ee   : > { %v6028_v46 = vadd.f32 %v4743_v35, %v1580_v62  ;;  %v6030_v47 = vadd.f32 %v4743_v35, %v1584_v42 }
 0x3ef   : > { %v6032_v48 = vadd.f32 %v4743_v35, %v1573_v44  ;;  %v6034_v49 = vadd.f32 %v4743_v35, %v1577_v45 }
 0x3f3   : > { %v1554_v54 = vpop.f32.mrf.mxu2  ;;  %v1564_v55 = vpop.f32.mrf.mxu3 }
 0x3f4   : > { %v1581_v56 = vadd.f32 %v1554_v54, %v1452_v50  ;;  %v1585_v1 = vadd.f32 %v1564_v55, %v1456_v51  ;;  %v1537_v2 = vpop.f32.mrf.mxu0  ;;  %v1547_v3 = vpop.f32.mrf.mxu1 }
 0x3f5   : > { %v1574_v4 = vadd.f32 %v1537_v2, %v1445_v52  ;;  %v1578_v5 = vadd.f32 %v1547_v3, %v1449_v53 }
 0x3f6   : > { %v6036_v6 = vadd.f32 %v4743_v35, %v1581_v56  ;;  %v6038_v7 = vadd.f32 %v4743_v35, %v1585_v1 }
 0x3f7   : > { %v6040_v8 = vadd.f32 %v4743_v35, %v1574_v4  ;;  %v6042_v9 = vadd.f32 %v4743_v35, %v1578_v5 }
 0x3fb   : > { %v1557_v14 = vpop.f32.mrf.mxu2  ;;  %v1567_v15 = vpop.f32.mrf.mxu3 }
 0x3fc   : > { %v1582_v16 = vadd.f32 %v1557_v14, %v1453_v10  ;;  %v1586_v17 = vadd.f32 %v1567_v15, %v1457_v11  ;;  %v1539_v18 = vpop.f32.mrf.mxu0  ;;  %v1549_v19 = vpop.f32.mrf.mxu1 }
 0x3fd   : > { %v1575_v20 = vadd.f32 %v1539_v18, %v1446_v12  ;;  %v1579_v21 = vadd.f32 %v1549_v19, %v1450_v13 }
 0x3fe   : > { %v6044_v22 = vadd.f32 %v4743_v35, %v1582_v16  ;;  %v6046_v23 = vadd.f32 %v4743_v35, %v1586_v17 }
 0x3ff   : > { %v6048_v24 = vadd.f32 %v4743_v35, %v1575_v20  ;;  %v6050_v25 = vadd.f32 %v4743_v35, %v1579_v21 }
 0x402   : > { %1610 = sbr.rel (%p3876_p11) target bundleno = 1041 (0x411), region = 100 }
 0x403   : > { %v1559_v28 = vpop.f32.mrf.mxu2  ;;  %v1569_v29 = vpop.f32.mrf.mxu3 }
 0x404   : > { %v1583_v30 = vadd.f32 %v1559_v28, %v1454_v26  ;;  %v1587_v31 = vadd.f32 %v1569_v29, %v1458_v27 }
 0x406   : > { %v6052_v32 = vadd.f32 %v4743_v35, %v1583_v30  ;;  %v6054_v33 = vadd.f32 %v4743_v35, %v1587_v31 }
 0x407   : > { %v4426_v34 = vpack.c.bf16 %v6032_v48, %v6024_v59  ;;  %v4431_v36 = vpack.c.bf16 %v6048_v24, %v6040_v8  ;;  %v4436_v37 = vpack.c.bf16 %v6034_v49, %v6026_v61  ;;  %v4441_v57 = vpack.c.bf16 %v6050_v25, %v6042_v9 }
 0x408   : > { %v4446_v35 = vpack.c.bf16 %v6036_v6, %v6028_v46  ;;  %v4451_v38 = vpack.c.bf16 %v6052_v32, %v6044_v22  ;;  %v4456_v63 = vpack.c.bf16 %v6038_v7, %v6030_v47  ;;  %v4461_v39 = vpack.c.bf16 %v6054_v33, %v6046_v23 }
 0x409   : > { %4427 = vst [vmem:[#allocation4] sm:$0xff] %v4426_v34  }
 0x40a   : > { %4478 = vst [vmem:[#allocation4 + $0x8] sm:$0xff] %v4431_v36  }
 0x40b   : > { %4479 = vst [vmem:[#allocation4 + $0x10] sm:$0xff] %v4436_v37  }
 0x40c   : > { %4480 = vst [vmem:[#allocation4 + $0x18] sm:$0xff] %v4441_v57  }
 0x40d   : > { %4481 = vst [vmem:[#allocation4 + $0x20] sm:$0xff] %v4446_v35  }
 0x40e   : > { %4482 = vst [vmem:[#allocation4 + $0x28] sm:$0xff] %v4451_v38  }
 0x40f   : > { %4483 = vst [vmem:[#allocation4 + $0x30] sm:$0xff] %v4456_v63  }
 0x410   : > { %4484 = vst [vmem:[#allocation4 + $0x38] sm:$0xff] %v4461_v39  }
 0x411 PF: > { %s7832_s10 = sld [smem:[#allocation43_spill]] }
 0x417   : > { %p3877_p2 = scmp.ne.s32.totalorder %s7832_s10, 1 }
 0x419   : > { %1646 = sbr.rel (%p3877_p2) target bundleno = 1490 (0x5d2), region = 104 }
 0x41e   : > { %v4024_v58 = vld [vmem:[%s5866_s30 + $0xe0] sm:$0xf]  ;;  %v4308_v40 = vld [vmem:[%s5866_s30 + $0xec] sm:$0xf0]  ;;  %v4306_v60 = vld [vmem:[%s5866_s30 + $0xe4] sm:$0xf] }
 0x41f   : > { %v4025_v41 = vor.u32 %v4308_v40, %v4024_v58  ;;  %v4026_v62 = vld [vmem:[%s5866_s30 + $0xf0] sm:$0xf0]  ;;  %v4338_v42 = vld [vmem:[%s5866_s30 + $0x1e4] sm:$0xf]  ;;  %v4152_v45 = vld [vmem:[%s5866_s30 + $0x1e0] sm:$0xf] }
 0x420   : > { %v4154_v0 = vld [vmem:[%s5866_s30 + $0x1f0] sm:$0xf0]  ;;  %v4029_v43 = vor.u32 %v4306_v60, %v4026_v62  ;;  %v4340_v50 = vld [vmem:[%s5866_s30 + $0x1ec] sm:$0xf0]  ;;  %v4008_v51 = vld [vmem:[%s5866_s30 + $0xc0] sm:$0xf] }
 0x421   : > { %v4157_v44 = vor.u32 %v4338_v42, %v4154_v0  ;;  %2169 = vmatpush.bf16.msra.mxu0 %v4025_v41  ;;  %v4153_v52 = vor.u32 %v4340_v50, %v4152_v45  ;;  %v4304_v53 = vld [vmem:[%s5866_s30 + $0xcc] sm:$0xf0]  ;;  %v4302_v54 = vld [vmem:[%s5866_s30 + $0xc4] sm:$0xf]  ;;  %v4010_v55 = vld [vmem:[%s5866_s30 + $0xd0] sm:$0xf0] }
 0x422   : > { %2267 = vmatpush.bf16.msra.mxu2 %v4029_v43  ;;  %v4009_v56 = vor.u32 %v4304_v53, %v4008_v51  ;;  %v4013_v1 = vor.u32 %v4302_v54, %v4010_v55  ;;  %v4334_v2 = vld [vmem:[%s5866_s30 + $0x1c4] sm:$0xf]  ;;  %v4138_v3 = vld [vmem:[%s5866_s30 + $0x1d0] sm:$0xf0]  ;;  %v4136_v4 = vld [vmem:[%s5866_s30 + $0x1c0] sm:$0xf] }
 0x423   : > { %2316 = vmatpush.bf16.msra.mxu3 %v4157_v44  ;;  %2218 = vmatpush.bf16.msra.mxu1 %v4153_v52  ;;  %v4141_v5 = vor.u32 %v4334_v2, %v4138_v3  ;;  %v4336_v10 = vld [vmem:[%s5866_s30 + $0x1cc] sm:$0xf0]  ;;  %v3992_v11 = vld [vmem:[%s5866_s30 + $0xa0] sm:$0xf]  ;;  %v4298_v14 = vld [vmem:[%s5866_s30 + $0xa4] sm:$0xf] }
 0x424   : > { %v4300_v12 = vld [vmem:[%s5866_s30 + $0xac] sm:$0xf0]  ;;  %v4137_v13 = vor.u32 %v4336_v10, %v4136_v4  ;;  %v3994_v15 = vld [vmem:[%s5866_s30 + $0xb0] sm:$0xf0]  ;;  %v4330_v16 = vld [vmem:[%s5866_s30 + $0x1a4] sm:$0xf] }
 0x425   : > { %2170 = vmatpush.bf16.msra.mxu0 %v4009_v56  ;;  %v3993_v17 = vor.u32 %v4300_v12, %v3992_v11  ;;  %v4122_v18 = vld [vmem:[%s5866_s30 + $0x1b0] sm:$0xf0]  ;;  %v4120_v19 = vld [vmem:[%s5866_s30 + $0x1a0] sm:$0xf]  ;;  %v4332_v20 = vld [vmem:[%s5866_s30 + $0x1ac] sm:$0xf0]  ;;  %v3997_v21 = vor.u32 %v4298_v14, %v3994_v15 }
 0x426   : > { %2268 = vmatpush.bf16.msra.mxu2 %v4013_v1  ;;  %v4125_v26 = vor.u32 %v4330_v16, %v4122_v18  ;;  %v3976_v27 = vld [vmem:[%s5866_s30 + $0x80] sm:$0xf]  ;;  %v4296_v28 = vld [vmem:[%s5866_s30 + $0x8c] sm:$0xf0]  ;;  %v4294_v29 = vld [vmem:[%s5866_s30 + $0x84] sm:$0xf]  ;;  %v4121_v30 = vor.u32 %v4332_v20, %v4120_v19  ;;  %v1663_v20 = vpack.c.bf16 %v6024_v59, %v6024_v59 }
 0x427   : > { %2317 = vmatpush.bf16.msra.mxu3 %v4141_v5  ;;  %2219 = vmatpush.bf16.msra.mxu1 %v4137_v13  ;;  %v3978_v31 = vld [vmem:[%s5866_s30 + $0x90] sm:$0xf0]  ;;  %v4326_v34 = vld [vmem:[%s5866_s30 + $0x184] sm:$0xf]  ;;  %v4104_v37 = vld [vmem:[%s5866_s30 + $0x180] sm:$0xf]  ;;  %v3977_v35 = vor.u32 %v4296_v28, %v3976_v27 }
 0x428   : > { %v4106_v36 = vld [vmem:[%s5866_s30 + $0x190] sm:$0xf0]  ;;  %v4328_v57 = vld [vmem:[%s5866_s30 + $0x18c] sm:$0xf0]  ;;  %v3981_v38 = vor.u32 %v4294_v29, %v3978_v31  ;;  %v3960_v39 = vld [vmem:[%s5866_s30 + $0x60] sm:$0xf] }
 0x429   : > { %2171 = vmatpush.bf16.msra.mxu0 %v3993_v17  ;;  %v4109_v63 = vor.u32 %v4326_v34, %v4106_v36  ;;  %v4292_v58 = vld [vmem:[%s5866_s30 + $0x6c] sm:$0xf0]  ;;  %v4290_v40 = vld [vmem:[%s5866_s30 + $0x64] sm:$0xf]  ;;  %v4105_v60 = vor.u32 %v4328_v57, %v4104_v37  ;;  %v3962_v41 = vld [vmem:[%s5866_s30 + $0x70] sm:$0xf0] }
 0x42a   : > { %2269 = vmatpush.bf16.msra.mxu2 %v3997_v21  ;;  %v4322_v62 = vld [vmem:[%s5866_s30 + $0x164] sm:$0xf]  ;;  %v4090_v42 = vld [vmem:[%s5866_s30 + $0x170] sm:$0xf0]  ;;  %v4088_v0 = vld [vmem:[%s5866_s30 + $0x160] sm:$0xf]  ;;  %v3961_v44 = vor.u32 %v4292_v58, %v3960_v39  ;;  %v3965_v45 = vor.u32 %v4290_v40, %v3962_v41  ;;  %v1664_v21 = vpack.c.bf16 %v6032_v48, %v6032_v48 }
 0x42b   : > { %2318 = vmatpush.bf16.msra.mxu3 %v4125_v26  ;;  %2220 = vmatpush.bf16.msra.mxu1 %v4121_v30  ;;  %v4324_v43 = vld [vmem:[%s5866_s30 + $0x16c] sm:$0xf0]  ;;  %v4093_v50 = vor.u32 %v4322_v62, %v4090_v42  ;;  %v3944_v51 = vld [vmem:[%s5866_s30 + $0x40] sm:$0xf]  ;;  %v4286_v53 = vld [vmem:[%s5866_s30 + $0x44] sm:$0xf] }
 0x42c   : > { %v4288_v52 = vld [vmem:[%s5866_s30 + $0x4c] sm:$0xf0]  ;;  %v4089_v54 = vor.u32 %v4324_v43, %v4088_v0  ;;  %v3946_v55 = vld [vmem:[%s5866_s30 + $0x50] sm:$0xf0]  ;;  %v4318_v56 = vld [vmem:[%s5866_s30 + $0x144] sm:$0xf] }
 0x42d   : > { %2172 = vmatpush.bf16.msra.mxu0 %v3977_v35  ;;  %v4074_v1 = vld [vmem:[%s5866_s30 + $0x150] sm:$0xf0]  ;;  %v4072_v2 = vld [vmem:[%s5866_s30 + $0x140] sm:$0xf]  ;;  %v4320_v3 = vld [vmem:[%s5866_s30 + $0x14c] sm:$0xf0]  ;;  %v3945_v4 = vor.u32 %v4288_v52, %v3944_v51  ;;  %v3949_v5 = vor.u32 %v4286_v53, %v3946_v55  ;;  %v1695_v35 = vunpack.c.l.b16 %v1663_v20 }
 0x42e   : > { %2270 = vmatpush.bf16.msra.mxu2 %v3981_v38  ;;  %v4077_v10 = vor.u32 %v4318_v56, %v4074_v1  ;;  %v3928_v11 = vld [vmem:[%s5866_s30 + $0x20] sm:$0xf]  ;;  %v4284_v12 = vld [vmem:[%s5866_s30 + $0x2c] sm:$0xf0]  ;;  %v4282_v13 = vld [vmem:[%s5866_s30 + $0x24] sm:$0xf]  ;;  %v4073_v14 = vor.u32 %v4320_v3, %v4072_v2  ;;  %v1696_v38 = vunpack.c.l.b16 %v1664_v21 }
 0x42f   : > { %2319 = vmatpush.bf16.msra.mxu3 %v4109_v63  ;;  %2221 = vmatpush.bf16.msra.mxu1 %v4105_v60  ;;  %v3930_v15 = vld [vmem:[%s5866_s30 + $0x30] sm:$0xf0]  ;;  %v4314_v16 = vld [vmem:[%s5866_s30 + $0x124] sm:$0xf]  ;;  %v4056_v18 = vld [vmem:[%s5866_s30 + $0x120] sm:$0xf]  ;;  %v3929_v26 = vor.u32 %v4284_v12, %v3928_v11 }
 0x430   : > { %v4058_v17 = vld [vmem:[%s5866_s30 + $0x130] sm:$0xf0]  ;;  %v4316_v19 = vld [vmem:[%s5866_s30 + $0x12c] sm:$0xf0]  ;;  %v3912_v27 = vld [vmem:[%s5866_s30] sm:$0xf]  ;;  %v3933_v28 = vor.u32 %v4282_v13, %v3930_v15 }
 0x431   : > { %2173 = vmatpush.bf16.msra.mxu0 %v3961_v44  ;;  %v4061_v29 = vor.u32 %v4314_v16, %v4058_v17  ;;  %v4280_v30 = vld [vmem:[%s5866_s30 + $0xc] sm:$0xf0]  ;;  %v4278_v31 = vld [vmem:[%s5866_s30 + $0x4] sm:$0xf]  ;;  %v3914_v34 = vld [vmem:[%s5866_s30 + $0x10] sm:$0xf0]  ;;  %v4057_v59 = vor.u32 %v4316_v19, %v4056_v18 }
 0x432   : > { %2271 = vmatpush.bf16.msra.mxu2 %v3965_v45  ;;  %v4310_v36 = vld [vmem:[%s5866_s30 + $0x104] sm:$0xf]  ;;  %v4042_v37 = vld [vmem:[%s5866_s30 + $0x110] sm:$0xf0]  ;;  %v4040_v48 = vld [vmem:[%s5866_s30 + $0x100] sm:$0xf]  ;;  %v3913_v58 = vor.u32 %v4280_v30, %v3912_v27  ;;  %v3917_v41 = vor.u32 %v4278_v31, %v3914_v34  ;;  %v1665_v27 = vpack.c.bf16 %v6040_v8, %v6040_v8 }
 0x433   : > { %2320 = vmatpush.bf16.msra.mxu3 %v4093_v50  ;;  %2222 = vmatpush.bf16.msra.mxu1 %v4089_v54  ;;  %v4312_v57 = vld [vmem:[%s5866_s30 + $0x10c] sm:$0xf0]  ;;  %v4307_v63 = vld [vmem:[%s5866_s30 + $0xec] sm:$0xf]  ;;  %v4034_v39 = vld [vmem:[%s5866_s30 + $0xf8] sm:$0xf0]  ;;  %v4045_v62 = vor.u32 %v4310_v36, %v4042_v37  ;;  %v6149_v50 = vpack.c.b16 %v1696_v38, %v1695_v35 }
 0x434   : > { %v4339_v40 = vld [vmem:[%s5866_s30 + $0x1ec] sm:$0xf]  ;;  %v4162_v60 = vld [vmem:[%s5866_s30 + $0x1f8] sm:$0xf0]  ;;  %v4041_v42 = vor.u32 %v4312_v57, %v4040_v48  ;;  %v4037_v0 = vor.u32 %v4307_v63, %v4034_v39  ;;  %v4032_v43 = vld [vmem:[%s5866_s30 + $0xe8] sm:$0xf]  ;;  %v1697_v36 = vunpack.c.l.b16 %v1665_v27 }
 0x435   : > { %2174 = vmatpush.bf16.msra.mxu0 %v3945_v4  ;;  %v4309_v44 = vld [vmem:[%s5866_s30 + $0xf4] sm:$0xf0]  ;;  %v4160_v45 = vld [vmem:[%s5866_s30 + $0x1e8] sm:$0xf]  ;;  %v4165_v51 = vor.u32 %v4339_v40, %v4162_v60  ;;  %v4303_v53 = vld [vmem:[%s5866_s30 + $0xcc] sm:$0xf] }
 0x436   : > { %2272 = vmatpush.bf16.msra.mxu2 %v3949_v5  ;;  %v4341_v52 = vld [vmem:[%s5866_s30 + $0x1f4] sm:$0xf0]  ;;  %v4018_v54 = vld [vmem:[%s5866_s30 + $0xd8] sm:$0xf0]  ;;  %v6155_v55 = vld [vmem:[%s5890_s2] sm:$0xff]  ;;  %v4033_v2 = vor.u32 %v4309_v44, %v4032_v43 }
 0x437   : > { %2321 = vmatpush.bf16.msra.mxu3 %v4077_v10  ;;  %2223 = vmatpush.bf16.msra.mxu1 %v4073_v14  ;;  %v4335_v56 = vld [vmem:[%s5866_s30 + $0x1cc] sm:$0xf]  ;;  %v4146_v1 = vld [vmem:[%s5866_s30 + $0x1d8] sm:$0xf0]  ;;  %v4161_v3 = vor.u32 %v4341_v52, %v4160_v45  ;;  %v4021_v4 = vor.u32 %v4303_v53, %v4018_v54  ;;  %v4016_v5 = vld [vmem:[%s5866_s30 + $0xc8] sm:$0xf] }
 0x438   : > { %v4305_v10 = vld [vmem:[%s5866_s30 + $0xd4] sm:$0xf0]  ;;  %v4149_v11 = vor.u32 %v4335_v56, %v4146_v1  ;;  %v4144_v12 = vld [vmem:[%s5866_s30 + $0x1c8] sm:$0xf]  ;;  %v4299_v14 = vld [vmem:[%s5866_s30 + $0xac] sm:$0xf] }
 0x439   : > { %2175 = vmatpush.bf16.msra.mxu0 %v3929_v26  ;;  %v4337_v13 = vld [vmem:[%s5866_s30 + $0x1d4] sm:$0xf0]  ;;  %v4002_v15 = vld [vmem:[%s5866_s30 + $0xb8] sm:$0xf0]  ;;  %v4017_v16 = vor.u32 %v4305_v10, %v4016_v5  ;;  %v4331_v17 = vld [vmem:[%s5866_s30 + $0x1ac] sm:$0xf]  ;;  %v1669_v10 = vpack.c.bf16 %v6042_v9, %v6042_v9 }
 0x43a   : > { %2273 = vmatpush.bf16.msra.mxu2 %v3933_v28  ;;  %v4130_v18 = vld [vmem:[%s5866_s30 + $0x1b8] sm:$0xf0]  ;;  %v4145_v19 = vor.u32 %v4337_v13, %v4144_v12  ;;  %v4005_v20 = vor.u32 %v4299_v14, %v4002_v15  ;;  %v4000_v21 = vld [vmem:[%s5866_s30 + $0xa8] sm:$0xf]  ;;  %v4301_v26 = vld [vmem:[%s5866_s30 + $0xb4] sm:$0xf0]  ;;  %v1666_v28 = vpack.c.bf16 %v6048_v24, %v6048_v24 }
 0x43b   : > { %2322 = vmatpush.bf16.msra.mxu3 %v4061_v29  ;;  %2224 = vmatpush.bf16.msra.mxu1 %v4057_v59  ;;  %v4133_v29 = vor.u32 %v4331_v17, %v4130_v18  ;;  %v4128_v30 = vld [vmem:[%s5866_s30 + $0x1a8] sm:$0xf]  ;;  %v4333_v31 = vld [vmem:[%s5866_s30 + $0x1b4] sm:$0xf0]  ;;  %v4001_v34 = vor.u32 %v4301_v26, %v4000_v21  ;;  %v6182_v37 = vld [vmem:[%s5890_s2 + $0x8] sm:$0xff]  ;;  %v1701_v14 = vunpack.c.l.b16 %v1669_v10  ;;  %v1675_v10 = vpack.c.bf16 %v6030_v47, %v6030_v47 }
 0x43c   : > { %v4129_v59 = vor.u32 %v4333_v31, %v4128_v30  ;;  %v1698_v8 = vunpack.c.l.b16 %v1666_v28  ;;  %v4295_v48 = vld [vmem:[%s5866_s30 + $0x8c] sm:$0xf]  ;;  %v3986_v57 = vld [vmem:[%s5866_s30 + $0x98] sm:$0xf0]  ;;  %v3984_v39 = vld [vmem:[%s5866_s30 + $0x88] sm:$0xf]  ;;  %v1671_v30 = vpack.c.bf16 %v6028_v46, %v6028_v46  ;;  %v1672_v31 = vpack.c.bf16 %v6036_v6, %v6036_v6 }
 0x43d   : > { %2176 = vmatpush.bf16.msra.mxu0 %v3913_v58  ;;  %v3989_v35 = vor.u32 %v4295_v48, %v3986_v57  ;;  %v4327_v38 = vld [vmem:[%s5866_s30 + $0x18c] sm:$0xf]  ;;  %v4114_v63 = vld [vmem:[%s5866_s30 + $0x198] sm:$0xf0]  ;;  %v4297_v40 = vld [vmem:[%s5866_s30 + $0x94] sm:$0xf0]  ;;  %v1677_v47 = vpack.c.bf16 %v6046_v23, %v6046_v23 }
 0x43e   : > { %2274 = vmatpush.bf16.msra.mxu2 %v3917_v41  ;;  %v6179_v24 = vpack.c.b16 %v1698_v8, %v1697_v36  ;;  %v4117_v58 = vor.u32 %v4327_v38, %v4114_v63  ;;  %v4112_v60 = vld [vmem:[%s5866_s30 + $0x188] sm:$0xf]  ;;  %v4329_v41 = vld [vmem:[%s5866_s30 + $0x194] sm:$0xf0]  ;;  %v3970_v52 = vld [vmem:[%s5866_s30 + $0x78] sm:$0xf0]  ;;  %v1703_v36 = vunpack.c.l.b16 %v1671_v30  ;;  %v1704_v8 = vunpack.c.l.b16 %v1672_v31 }
 0x43f   : > { %2323 = vmatpush.bf16.msra.mxu3 %v4045_v62  ;;  %2225 = vmatpush.bf16.msra.mxu1 %v4041_v42  ;;  %v1667_v62 = vpack.c.bf16 %v6026_v61, %v6026_v61  ;;  %v1668_v42 = vpack.c.bf16 %v6034_v49, %v6034_v49  ;;  %v4113_v43 = vor.u32 %v4329_v41, %v4112_v60  ;;  %v6203_v61 = vld [vmem:[%s5890_s2 + $0x10] sm:$0xff]  ;;  %v4291_v49 = vld [vmem:[%s5866_s30 + $0x6c] sm:$0xf]  ;;  %v3968_v1 = vld [vmem:[%s5866_s30 + $0x68] sm:$0xf] }
 0x440   : > { %2177 = vmatmul.bf16.vlgmr.msra.gmra.mxu0 %v6149_v50  ;;  %v3973_v53 = vor.u32 %v4291_v49, %v3970_v52  ;;  %v4323_v54 = vld [vmem:[%s5866_s30 + $0x16c] sm:$0xf]  ;;  %v4098_v56 = vld [vmem:[%s5866_s30 + $0x178] sm:$0xf0]  ;;  %v4325_v5 = vld [vmem:[%s5866_s30 + $0x174] sm:$0xf0]  ;;  %v6242_v48 = vpack.c.b16 %v1704_v8, %v1703_v36 }
 0x441   : > { %2275 = vmatmul.bf16.vlgmr.msra.gmra.mxu2 %v6149_v50  ;;  %2365 = vmatpush.bf16.msrb.mxu0 %v4033_v2  ;;  %v1699_v44 = vunpack.c.l.b16 %v1667_v62  ;;  %v1700_v45 = vunpack.c.l.b16 %v1668_v42  ;;  %v4101_v2 = vor.u32 %v4323_v54, %v4098_v56  ;;  %v6224_v9 = vld [vmem:[%s5890_s2 + $0x18] sm:$0xff]  ;;  %v3954_v17 = vld [vmem:[%s5866_s30 + $0x58] sm:$0xf0]  ;;  %v3952_v21 = vld [vmem:[%s5866_s30 + $0x48] sm:$0xf]  ;;  %v1673_v62 = vpack.c.bf16 %v6044_v22, %v6044_v22 }
 0x442   : > { %2463 = vmatpush.bf16.msrb.mxu2 %v4037_v0  ;;  %2324 = vmatmul.bf16.vlgmr.msra.gmra.mxu3 %v6155_v55  ;;  %v3985_v0 = vor.u32 %v4297_v40, %v3984_v39  ;;  %v4289_v27 = vld [vmem:[%s5866_s30 + $0x54] sm:$0xf0]  ;;  %v4080_v28 = vld [vmem:[%s5866_s30 + $0x148] sm:$0xf]  ;;  %v4283_v6 = vld [vmem:[%s5866_s30 + $0x2c] sm:$0xf]  ;;  %v1674_v42 = vpack.c.bf16 %v6052_v32, %v6052_v32 }
 0x443   : > { %2512 = vmatpush.bf16.msrb.mxu3 %v4165_v51  ;;  %2226 = vmatmul.bf16.vlgmr.msra.gmra.mxu1 %v6155_v55  ;;  %v6200_v51 = vpack.c.b16 %v1700_v45, %v1699_v44  ;;  %v6245_v46 = vld [vmem:[%s5890_s2 + $0x20] sm:$0xff]  ;;  %v3938_v57 = vld [vmem:[%s5866_s30 + $0x38] sm:$0xf0]  ;;  %v4285_v40 = vld [vmem:[%s5866_s30 + $0x34] sm:$0xf0]  ;;  %v1705_v44 = vunpack.c.l.b16 %v1673_v62 }
 0x444   : > { %2414 = vmatpush.bf16.msrb.mxu1 %v4161_v3  ;;  %v4293_v3 = vld [vmem:[%s5866_s30 + $0x74] sm:$0xf0]  ;;  %v4315_v38 = vld [vmem:[%s5866_s30 + $0x12c] sm:$0xf]  ;;  %v4066_v63 = vld [vmem:[%s5866_s30 + $0x138] sm:$0xf0]  ;;  %v1706_v45 = vunpack.c.l.b16 %v1674_v42 }
 0x445   : > { %2366 = vmatpush.bf16.msrb.mxu0 %v4017_v16  ;;  %v3969_v12 = vor.u32 %v4293_v3, %v3968_v1  ;;  %v3936_v39 = vld [vmem:[%s5866_s30 + $0x28] sm:$0xf]  ;;  %v4317_v41 = vld [vmem:[%s5866_s30 + $0x134] sm:$0xf0]  ;;  %v6266_v22 = vld [vmem:[%s5890_s2 + $0x28] sm:$0xff] }
 0x446   : > { %2464 = vmatpush.bf16.msrb.mxu2 %v4021_v4  ;;  %v4096_v4 = vld [vmem:[%s5866_s30 + $0x168] sm:$0xf]  ;;  %v6263_v49 = vpack.c.b16 %v1706_v45, %v1705_v44  ;;  %v4279_v32 = vld [vmem:[%s5866_s30 + $0xc] sm:$0xf]  ;;  %v3922_v52 = vld [vmem:[%s5866_s30 + $0x18] sm:$0xf0] }
 0x447   : > { %2513 = vmatpush.bf16.msrb.mxu3 %v4149_v11  ;;  %v1670_v11 = vpack.c.bf16 %v6050_v25, %v6050_v25  ;;  %v4097_v13 = vor.u32 %v4325_v5, %v4096_v4  ;;  %v4287_v25 = vld [vmem:[%s5866_s30 + $0x4c] sm:$0xf]  ;;  %v4064_v60 = vld [vmem:[%s5866_s30 + $0x128] sm:$0xf]  ;;  %v4050_v56 = vld [vmem:[%s5866_s30 + $0x118] sm:$0xf0] }
 0x448   : > { %2415 = vmatpush.bf16.msrb.mxu1 %v4145_v19  ;;  %v3957_v18 = vor.u32 %v4287_v25, %v3954_v17  ;;  %v4319_v19 = vld [vmem:[%s5866_s30 + $0x14c] sm:$0xf]  ;;  %v3920_v1 = vld [vmem:[%s5866_s30 + $0x8] sm:$0xf]  ;;  %v4281_v3 = vld [vmem:[%s5866_s30 + $0x14] sm:$0xf0] }
 0x449   : > { %2367 = vmatpush.bf16.msrb.mxu0 %v4001_v34  ;;  %v1702_v15 = vunpack.c.l.b16 %v1670_v11  ;;  %v3953_v34 = vor.u32 %v4289_v27, %v3952_v21  ;;  %v4311_v54 = vld [vmem:[%s5866_s30 + $0x10c] sm:$0xf]  ;;  %v4048_v4 = vld [vmem:[%s5866_s30 + $0x108] sm:$0xf]  ;;  %v4313_v5 = vld [vmem:[%s5866_s30 + $0x114] sm:$0xf0]  ;;  %v1676_v11 = vpack.c.bf16 %v6038_v7, %v6038_v7  ;;  %v1678_v7 = vpack.c.bf16 %v6054_v33, %v6054_v33 }
 0x44a   : > { %2465 = vmatpush.bf16.msrb.mxu2 %v4005_v20  ;;  %v4082_v20 = vld [vmem:[%s5866_s30 + $0x158] sm:$0xf0]  ;;  %v6300_v21 = vld [vmem:[%s5890_s2 + $0x38] sm:$0xff] }
 0x44b   : > { %2514 = vmatpush.bf16.msrb.mxu3 %v4133_v29  ;;  %v6221_v16 = vpack.c.b16 %v1702_v15, %v1701_v14  ;;  %v4085_v26 = vor.u32 %v4319_v19, %v4082_v20  ;;  %v4321_v29 = vld [vmem:[%s5866_s30 + $0x154] sm:$0xf0]  ;;  %v1707_v14 = vunpack.c.l.b16 %v1675_v10  ;;  %v1708_v15 = vunpack.c.l.b16 %v1676_v11 }
 0x44c   : > { %2416 = vmatpush.bf16.msrb.mxu1 %v4129_v59  ;;  %v4081_v59 = vor.u32 %v4321_v29, %v4080_v28  ;;  %v6287_v17 = vld [vmem:[%s5890_s2 + $0x30] sm:$0xff]  ;;  %v1710_v19 = vunpack.c.l.b16 %v1678_v7 }
 0x44d   : > { %2368 = vmatpush.bf16.msrb.mxu0 %v3985_v0  ;;  %v3937_v0 = vor.u32 %v4285_v40, %v3936_v39  ;;  %v6284_v25 = vpack.c.b16 %v1708_v15, %v1707_v14 }
 0x44e   : > { %2466 = vmatpush.bf16.msrb.mxu2 %v3989_v35  ;;  %v3941_v35 = vor.u32 %v4283_v6, %v3938_v57 }
 0x44f   : > { %2515 = vmatpush.bf16.msrb.mxu3 %v4117_v58  ;;  %v4069_v58 = vor.u32 %v4315_v38, %v4066_v63 }
 0x450   : > { %2182 = vmatmul.bf16.gmra.mxu0 %v6179_v24  ;;  %2417 = vmatpush.bf16.msrb.mxu1 %v4113_v43  ;;  %v4065_v43 = vor.u32 %v4317_v41, %v4064_v60 }
 0x451   : > { %2280 = vmatmul.bf16.gmra.mxu2 %v6179_v24  ;;  %2369 = vmatpush.bf16.msrb.mxu0 %v3969_v12  ;;  %v3921_v12 = vor.u32 %v4281_v3, %v3920_v1 }
 0x452   : > { %2329 = vmatmul.bf16.gmra.mxu3 %v6182_v37  ;;  %2467 = vmatpush.bf16.msrb.mxu2 %v3973_v53  ;;  %v3925_v53 = vor.u32 %v4279_v32, %v3922_v52 }
 0x453   : > { %2231 = vmatmul.bf16.gmra.mxu1 %v6182_v37  ;;  %2516 = vmatpush.bf16.msrb.mxu3 %v4101_v2  ;;  %v4053_v2 = vor.u32 %v4311_v54, %v4050_v56 }
 0x454   : > { %2418 = vmatpush.bf16.msrb.mxu1 %v4097_v13  ;;  %v4049_v13 = vor.u32 %v4313_v5, %v4048_v4 }
 0x455   : > { %2370 = vmatpush.bf16.msrb.mxu0 %v3953_v34 }
 0x456   : > { %2468 = vmatpush.bf16.msrb.mxu2 %v3957_v18  ;;  %v1709_v18 = vunpack.c.l.b16 %v1677_v47 }
 0x457   : > { %2517 = vmatpush.bf16.msrb.mxu3 %v4085_v26  ;;  %v6307_v26 = vld [vmem:[%s5872_s11] sm:$0xf] }
 0x458   : > { %2419 = vmatpush.bf16.msrb.mxu1 %v4081_v59  ;;  %v6297_v20 = vpack.c.b16 %v1710_v19, %v1709_v18  ;;  %v6310_v23 = vperm.slane %v6307_v26, 0  ;;  %v6319_v30 = vperm.slane %v6307_v26, 1 }
 0x459   : > { %2371 = vmatpush.bf16.msrb.mxu0 %v3937_v0 }
 0x45a   : > { %2469 = vmatpush.bf16.msrb.mxu2 %v3941_v35 }
 0x45b   : > { %2518 = vmatpush.bf16.msrb.mxu3 %v4069_v58 }
 0x45c   : > { %2420 = vmatpush.bf16.msrb.mxu1 %v4065_v43 }
 0x45d   : > { %2372 = vmatpush.bf16.msrb.mxu0 %v3921_v12 }
 0x45e   : > { %2470 = vmatpush.bf16.msrb.mxu2 %v3925_v53 }
 0x45f   : > { %2519 = vmatpush.bf16.msrb.mxu3 %v4053_v2 }
 0x460   : > { %2187 = vmatmul.bf16.gmra.mxu0 %v6200_v51  ;;  %2421 = vmatpush.bf16.msrb.mxu1 %v4049_v13 }
 0x461   : > { %2285 = vmatmul.bf16.gmra.mxu2 %v6200_v51 }
 0x462   : > { %2334 = vmatmul.bf16.gmra.mxu3 %v6203_v61 }
 0x463   : > { %2236 = vmatmul.bf16.gmra.mxu1 %v6203_v61 }
 0x470   : > { %2192 = vmatmul.bf16.gmra.mxu0 %v6221_v16 }
 0x471   : > { %2290 = vmatmul.bf16.gmra.mxu2 %v6221_v16 }
 0x472   : > { %2339 = vmatmul.bf16.gmra.mxu3 %v6224_v9 }
 0x473   : > { %2241 = vmatmul.bf16.gmra.mxu1 %v6224_v9 }
 0x480   : > { %2197 = vmatmul.bf16.gmra.mxu0 %v6242_v48 }
 0x481   : > { %2295 = vmatmul.bf16.gmra.mxu2 %v6242_v48 }
 0x482   : > { %2344 = vmatmul.bf16.gmra.mxu3 %v6245_v46 }
 0x483   : > { %2246 = vmatmul.bf16.gmra.mxu1 %v6245_v46 }
 0x490   : > { %2202 = vmatmul.bf16.gmra.mxu0 %v6263_v49 }
 0x491   : > { %2300 = vmatmul.bf16.gmra.mxu2 %v6263_v49 }
 0x492   : > { %2349 = vmatmul.bf16.gmra.mxu3 %v6266_v22 }
 0x493   : > { %2251 = vmatmul.bf16.gmra.mxu1 %v6266_v22 }
 0x4a0   : > { %2207 = vmatmul.bf16.gmra.mxu0 %v6284_v25 }
 0x4a1   : > { %2305 = vmatmul.bf16.gmra.mxu2 %v6284_v25 }
 0x4a2   : > { %2354 = vmatmul.bf16.gmra.mxu3 %v6287_v17 }
 0x4a3   : > { %2256 = vmatmul.bf16.gmra.mxu1 %v6287_v17 }
 0x4b0   : > { %2212 = vmatmul.bf16.gmra.mxu0 %v6297_v20 }
 0x4b1   : > { %2310 = vmatmul.bf16.gmra.mxu2 %v6297_v20 }
 0x4b2   : > { %2359 = vmatmul.bf16.gmra.mxu3 %v6300_v21 }
 0x4b3   : > { %2261 = vmatmul.bf16.gmra.mxu1 %v6300_v21 }
 0x4bd   : > { %v2178_v33 = vpop.f32.mrf.mxu0 }
 0x4be   : > { %v2179_v27 = vadd.f32 %v2178_v33, %v6310_v23 }
 0x4c0   : > { %v2227_v28 = vpop.f32.mrf.mxu1  ;;  %2373 = vmatmul.bf16.vlgmr.msrb.gmra.mxu0 %v6149_v50 }
 0x4c1   : > { %v6313_v29 = vadd.f32 %v2227_v28, %v2179_v27  ;;  %2471 = vmatmul.bf16.vlgmr.msrb.gmra.mxu2 %v6149_v50 }
 0x4c2   : > { %2520 = vmatmul.bf16.vlgmr.msrb.gmra.mxu3 %v6155_v55 }
 0x4c3   : > { %2422 = vmatmul.bf16.vlgmr.msrb.gmra.mxu1 %v6155_v55 }
 0x4c4   : > { %v2276_v31 = vpop.f32.mrf.mxu2 }
 0x4c5   : > { %v2325_v34 = vpop.f32.mrf.mxu3  ;;  %v2277_v59 = vadd.f32 %v2276_v31, %v6319_v30  ;;  %v2180_v36 = vpop.f32.mrf.mxu0 }
 0x4c6   : > { %v2181_v8 = vadd.f32 %v2180_v36, %v6310_v23 }
 0x4c7   : > { %v6324_v6 = vadd.f32 %v2325_v34, %v2277_v59 }
 0x4c8   : > { %v2229_v57 = vpop.f32.mrf.mxu1 }
 0x4c9   : > { %v6326_v35 = vadd.f32 %v2229_v57, %v2181_v8 }
 0x4cc   : > { %v2278_v50 = vpop.f32.mrf.mxu2 }
 0x4cd   : > { %v2327_v38 = vpop.f32.mrf.mxu3  ;;  %v2279_v63 = vadd.f32 %v2278_v50, %v6319_v30  ;;  %v2183_v39 = vpop.f32.mrf.mxu0 }
 0x4ce   : > { %v2184_v58 = vadd.f32 %v2183_v39, %v6310_v23 }
 0x4cf   : > { %v6330_v55 = vadd.f32 %v2327_v38, %v2279_v63 }
 0x4d0   : > { %v2232_v40 = vpop.f32.mrf.mxu1  ;;  %2378 = vmatmul.bf16.gmra.mxu0 %v6179_v24 }
 0x4d1   : > { %v6332_v60 = vadd.f32 %v2232_v40, %v2184_v58  ;;  %2476 = vmatmul.bf16.gmra.mxu2 %v6179_v24 }
 0x4d2   : > { %2525 = vmatmul.bf16.gmra.mxu3 %v6182_v37 }
 0x4d3   : > { %2427 = vmatmul.bf16.gmra.mxu1 %v6182_v37 }
 0x4d4   : > { %v2281_v41 = vpop.f32.mrf.mxu2 }
 0x4d5   : > { %v2330_v62 = vpop.f32.mrf.mxu3  ;;  %v2282_v42 = vadd.f32 %v2281_v41, %v6319_v30  ;;  %v2185_v0 = vpop.f32.mrf.mxu0 }
 0x4d6   : > { %v2186_v43 = vadd.f32 %v2185_v0, %v6310_v23 }
 0x4d7   : > { %v6340_v44 = vadd.f32 %v2330_v62, %v2282_v42  ;;  %v4182_v62 = vmul.f32 -1.442695, %v6324_v6  ;;  %v4183_v6 = vmul.f32 -1.442695, %v6330_v55 }
 0x4d8   : > { %v2234_v45 = vpop.f32.mrf.mxu1 }
 0x4d9   : > { %v6342_v32 = vadd.f32 %v2234_v45, %v2186_v43 }
 0x4dc   : > { %v2283_v52 = vpop.f32.mrf.mxu2 }
 0x4dd   : > { %v2332_v53 = vpop.f32.mrf.mxu3  ;;  %v2284_v24 = vadd.f32 %v2283_v52, %v6319_v30  ;;  %v2188_v54 = vpop.f32.mrf.mxu0 }
 0x4de   : > { %v2189_v56 = vadd.f32 %v2188_v54, %v6310_v23 }
 0x4df   : > { %v6346_v37 = vadd.f32 %v2332_v53, %v2284_v24 }
 0x4e0   : > { %v2237_v1 = vpop.f32.mrf.mxu1  ;;  %2383 = vmatmul.bf16.gmra.mxu0 %v6200_v51 }
 0x4e1   : > { %v6348_v2 = vadd.f32 %v2237_v1, %v2189_v56  ;;  %2481 = vmatmul.bf16.gmra.mxu2 %v6200_v51 }
 0x4e2   : > { %2530 = vmatmul.bf16.gmra.mxu3 %v6203_v61 }
 0x4e3   : > { %2432 = vmatmul.bf16.gmra.mxu1 %v6203_v61 }
 0x4e4   : > { %v2286_v3 = vpop.f32.mrf.mxu2 }
 0x4e5   : > { %v2335_v4 = vpop.f32.mrf.mxu3  ;;  %v2287_v5 = vadd.f32 %v2286_v3, %v6319_v30  ;;  %v2190_v10 = vpop.f32.mrf.mxu0 }
 0x4e6   : > { %v2191_v11 = vadd.f32 %v2190_v10, %v6310_v23 }
 0x4e7   : > { %v6356_v12 = vadd.f32 %v2335_v4, %v2287_v5 }
 0x4e8   : > { %v2239_v13 = vpop.f32.mrf.mxu1 }
 0x4e9   : > { %v6358_v14 = vadd.f32 %v2239_v13, %v2191_v11 }
 0x4ec   : > { %v2288_v15 = vpop.f32.mrf.mxu2 }
 0x4ed   : > { %v2337_v47 = vpop.f32.mrf.mxu3  ;;  %v2289_v51 = vadd.f32 %v2288_v15, %v6319_v30  ;;  %v2193_v7 = vpop.f32.mrf.mxu0  ;;  %v4184_v15 = vmul.f32 -1.442695, %v6340_v44 }
 0x4ee   : > { %v2194_v18 = vadd.f32 %v2193_v7, %v6310_v23 }
 0x4ef   : > { %v6362_v61 = vadd.f32 %v2337_v47, %v2289_v51  ;;  %v4168_v51 = vmul.f32 -1.442695, %v6332_v60 }
 0x4f0   : > { %v2242_v19 = vpop.f32.mrf.mxu1  ;;  %2388 = vmatmul.bf16.gmra.mxu0 %v6221_v16 }
 0x4f1   : > { %v6364_v33 = vadd.f32 %v2242_v19, %v2194_v18  ;;  %2486 = vmatmul.bf16.gmra.mxu2 %v6221_v16  ;;  %v4166_v16 = vmul.f32 -1.442695, %v6313_v29 }
 0x4f2   : > { %2535 = vmatmul.bf16.gmra.mxu3 %v6224_v9 }
 0x4f3   : > { %2437 = vmatmul.bf16.gmra.mxu1 %v6224_v9  ;;  %4744 = vpow2.f32 %v4166_v16 }
 0x4f4   : > { %v2291_v27 = vpop.f32.mrf.mxu2  ;;  %4746 = vpow2.f32 %v4182_v62 }
 0x4f5   : > { %v2340_v28 = vpop.f32.mrf.mxu3  ;;  %v2292_v31 = vadd.f32 %v2291_v27, %v6319_v30  ;;  %v2195_v34 = vpop.f32.mrf.mxu0 }
 0x4f6   : > { %v2196_v59 = vadd.f32 %v2195_v34, %v6310_v23 }
 0x4f7   : > { %v6372_v36 = vadd.f32 %v2340_v28, %v2292_v31 }
 0x4f8   : > { %v2244_v8 = vpop.f32.mrf.mxu1 }
 0x4f9   : > { %v6374_v57 = vadd.f32 %v2244_v8, %v2196_v59  ;;  %v4745_v52 = vpop.eup %4744 }
 0x4fa   : > { %v6396_v56 = vadd.f32 1.0, %v4745_v52 }
 0x4fc   : > { %v2293_v50 = vpop.f32.mrf.mxu2  ;;  %vm2646_vm0 = vweird.f32 %v6396_v56 }
 0x4fd   : > { %v2342_v38 = vpop.f32.mrf.mxu3  ;;  %v2294_v63 = vadd.f32 %v2293_v50, %v6319_v30  ;;  %v2198_v39 = vpop.f32.mrf.mxu0 }
 0x4fe   : > { %v2199_v9 = vadd.f32 %v2198_v39, %v6310_v23 }
 0x4ff   : > { %v6379_v58 = vadd.f32 %v2342_v38, %v2294_v63  ;;  %v4185_v38 = vmul.f32 -1.442695, %v6346_v37 }
 0x500   : > { %v2247_v40 = vpop.f32.mrf.mxu1  ;;  %2393 = vmatmul.bf16.gmra.mxu0 %v6242_v48 }
 0x501   : > { %v6381_v41 = vadd.f32 %v2247_v40, %v2199_v9  ;;  %2491 = vmatmul.bf16.gmra.mxu2 %v6242_v48  ;;  %v4167_v48 = vmul.f32 -1.442695, %v6326_v35  ;;  %v4169_v40 = vmul.f32 -1.442695, %v6342_v32 }
 0x502   : > { %2540 = vmatmul.bf16.gmra.mxu3 %v6245_v46 }
 0x503   : > { %2442 = vmatmul.bf16.gmra.mxu1 %v6245_v46  ;;  %v4747_v46 = vpop.eup %4746  ;;  %4748 = vpow2.f32 %v4167_v48 }
 0x504   : > { %v2296_v29 = vpop.f32.mrf.mxu2  ;;  %4750 = vpow2.f32 %v4183_v6  ;;  %v6401_v11 = vadd.f32 1.0, %v4747_v46  ;;  %v2650_v46 = vand.u32 2147483647, %v6396_v56 }
 0x505   : > { %v2345_v42 = vpop.f32.mrf.mxu3  ;;  %v2297_v0 = vadd.f32 %v2296_v29, %v6319_v30  ;;  %v2200_v43 = vpop.f32.mrf.mxu0  ;;  %4752 = vrcp.f32 %v6396_v56 }
 0x506   : > { %v2201_v45 = vadd.f32 %v2200_v43, %v6310_v23  ;;  %4754 = vrcp.f32 %v6401_v11  ;;  %vm6475_vm2 = vcmp.eq.f32.partialorder %v2650_v46, 8.507059e+37  ;;  %vm2950_vm3 = vweird.f32 %v6401_v11 }
 0x507   : > { %v6390_v53 = vadd.f32 %v2345_v42, %v2297_v0  ;;  %4756 = vpow2.f32 %v4184_v15  ;;  %v2954_v15 = vand.u32 2147483647, %v6401_v11 }
 0x508   : > { %v2249_v24 = vpop.f32.mrf.mxu1  ;;  %4758 = vpow2.f32 %v4168_v51 }
 0x509   : > { %v6393_v54 = vadd.f32 %v2249_v24, %v2201_v45  ;;  %v4749_v47 = vpop.eup %4748  ;;  %v6441_v45 = vld [vmem:[%s5890_s2] sm:$0xff]   ;;  %vm6483_vm5 = vcmp.eq.f32.partialorder %v2954_v15, 8.507059e+37 }
 0x50a   : > { %v4751_v7 = vpop.eup %4750  ;;  %v6416_v28 = vadd.f32 1.0, %v4749_v47  ;;  %v2562_v47 = vunpack.c.h.bf16 %v6441_v45 }
 0x50b   : > { %v6414_v18 = vpop.eup %4752  ;;  %v6419_v31 = vadd.f32 1.0, %v4751_v7 }
 0x50c   : > { %v2298_v1 = vpop.f32.mrf.mxu2  ;;  %v2642_v59 = vmul.f32 %v6414_v18, %v6396_v56  ;;  %v6428_v50 = vpop.eup %4754  ;;  %4760 = vrcp.f32 %v6416_v28  ;;  %vm2647_vm1 = vweird.f32 %v6414_v18  ;;  %vm2661_vm8 = vweird.f32 %v6416_v28 }
 0x50d   : > { %v2347_v3 = vpop.f32.mrf.mxu3  ;;  %v2299_v4 = vadd.f32 %v2298_v1, %v6319_v30  ;;  %v2203_v5 = vpop.f32.mrf.mxu0  ;;  %4762 = vrcp.f32 %v6419_v31  ;;  %v2946_v9 = vmul.f32 %v6428_v50, %v6401_v11  ;;  %vm2951_vm4 = vweird.f32 %v6428_v50  ;;  %vm6495_vm6 = vmor %vm2646_vm0, %vm2647_vm1 }
 0x50e   : > { %v2204_v10 = vadd.f32 %v2203_v5, %v6310_v23  ;;  %v4757_v16 = vpop.eup %4756  ;;  %v2643_v63 = vsub.f32 1.0, %v2642_v59  ;;  %4764 = vpow2.f32 %v4185_v38  ;;  %v2652_v5 = vand.u32 2147483648, %v6396_v56  ;;  %vm6530_vm9 = vmor %vm2950_vm3, %vm2951_vm4 }
 0x50f   : > { %v6403_v35 = vadd.f32 %v2347_v3, %v2299_v4  ;;  %v4759_v39 = vpop.eup %4758  ;;  %v6437_v43 = vadd.f32 1.0, %v4757_v16  ;;  %v2947_v3 = vsub.f32 1.0, %v2946_v9  ;;  %4766 = vpow2.f32 %v4169_v40 }
 0x510   : > { %v2252_v13 = vpop.f32.mrf.mxu1  ;;  %2398 = vmatmul.bf16.gmra.mxu0 %v6263_v49  ;;  %v6445_v24 = vadd.f32 1.0, %v4759_v39  ;;  %v2644_v32 = vmul.f32 %v6414_v18, %v2643_v63  ;;  %v2667_v63 = vand.u32 2147483648, %v6416_v28  ;;  %v2971_v9 = vand.u32 2147483648, %v6419_v31 }
 0x511   : > { %v6405_v55 = vadd.f32 %v2252_v13, %v2204_v10  ;;  %2496 = vmatmul.bf16.gmra.mxu2 %v6263_v49  ;;  %v2956_v10 = vand.u32 2147483648, %v6401_v11  ;;  %v2561_v13 = vunpack.c.l.bf16 %v6441_v45  ;;  %4768 = vrcp.f32 %v6437_v43 }
 0x512   : > { %2545 = vmatmul.bf16.gmra.mxu3 %v6266_v22  ;;  %v6443_v52 = vpop.eup %4760  ;;  %4770 = vrcp.f32 %v6445_v24  ;;  %v2645_v7 = vadd.f32 %v6414_v18, %v2644_v32  ;;  %v4170_v56 = vmul.f32 -1.442695, %v6348_v2  ;;  %vm2965_vm7 = vweird.f32 %v6419_v31 }
 0x513   : > { %2447 = vmatmul.bf16.gmra.mxu1 %v6266_v22  ;;  %v6451_v1 = vpop.eup %4762  ;;  %v2957_v59 = vor.u32 1.1754944e-38, %v2956_v10  ;;  %v6524_v2 = vor.u32 1.1754944e-38, %v2667_v63  ;;  %vm2662_vm10 = vweird.f32 %v6443_v52  ;;  %vm2676_vm14 = vweird.f32 %v6445_v24 }
 0x514   : > { %v2301_v19 = vpop.f32.mrf.mxu2  ;;  %v4765_v51 = vpop.eup %4764  ;;  %v2649_v32 = vsel %vm6495_vm6, %v6414_v18, %v2645_v7  ;;  %v4187_v7 = vmul.f32 -1.442695, %v6362_v61  ;;  %vm2966_vm12 = vweird.f32 %v6451_v1  ;;  %vm2980_vm0 = vweird.f32 %v6437_v43  ;;  %vm6612_vm1 = vmor %vm2661_vm8, %vm2662_vm10 }
 0x515   : > { %v2350_v27 = vpop.f32.mrf.mxu3  ;;  %v2302_v44 = vadd.f32 %v2301_v19, %v6319_v30  ;;  %v2205_v49 = vpop.f32.mrf.mxu0  ;;  %v2657_v19 = vmul.f32 %v6443_v52, %v6416_v28  ;;  %v6488_v40 = vadd.f32 1.0, %v4765_v51  ;;  %v2969_v51 = vand.u32 2147483647, %v6419_v31  ;;  %vm6589_vm15 = vmor %vm2965_vm7, %vm2966_vm12 }
 0x516   : > { %v2206_v60 = vadd.f32 %v2205_v49, %v6310_v23  ;;  %v4767_v39 = vpop.eup %4766 }
 0x517   : > { %v6422_v34 = vadd.f32 %v2350_v27, %v2302_v44  ;;  %v2948_v27 = vmul.f32 %v6428_v50, %v2947_v3  ;;  %v4186_v44 = vmul.f32 -1.442695, %v6356_v12  ;;  %v2658_v46 = vsub.f32 1.0, %v2657_v19  ;;  %v6507_v3 = vpop.eup %4768 }
 0x518   : > { %v2254_v22 = vpop.f32.mrf.mxu1  ;;  %v6513_v15 = vpop.eup %4770  ;;  %vm6552_vm11 = vcmp.eq.f32.partialorder %v2969_v51, 8.507059e+37  ;;  %v4171_v51 = vmul.f32 -1.442695, %v6358_v14  ;;  %v2680_v14 = vand.u32 2147483647, %v6445_v24  ;;  %vm2981_vm3 = vweird.f32 %v6507_v3 }
 0x519   : > { %v6426_v8 = vadd.f32 %v2254_v22, %v2206_v60  ;;  %v2653_v22 = vor.u32 1.1754944e-38, %v2652_v5  ;;  %v2949_v5 = vadd.f32 %v6428_v50, %v2948_v27  ;;  %4772 = vpow2.f32 %v4186_v44  ;;  %vm6667_vm7 = vmor %vm2980_vm0, %vm2981_vm3 }
 0x51a   : > { %4774 = vrcp.f32 %v6488_v40  ;;  %v6535_v44 = vor.u32 1.1754944e-38, %v2971_v9  ;;  %v2659_v63 = vmul.f32 %v6443_v52, %v2658_v46  ;;  %vm2995_vm6 = vweird.f32 %v6488_v40 }
 0x51b   : > { %v6541_v61 = vsel %vm6475_vm2, %v2653_v22, %v2649_v32  ;;  %4776 = vpow2.f32 %v4170_v56  ;;  %v2953_v11 = vsel %vm6530_vm9, %v6428_v50, %v2949_v5  ;;  %v2986_v50 = vand.u32 2147483648, %v6437_v43 }
 0x51c   : > { %v2303_v62 = vpop.f32.mrf.mxu2  ;;  %v6564_v5 = vsel %vm6483_vm5, %v2957_v59, %v2953_v11  ;;  %v2984_v59 = vand.u32 2147483647, %v6437_v43  ;;  %vm2677_vm2 = vweird.f32 %v6513_v15  ;;  %vm6651_vm5 = vcmp.eq.f32.partialorder %v2680_v14, 8.507059e+37 }
 0x51d   : > { %v2352_v29 = vpop.f32.mrf.mxu3  ;;  %v2304_v42 = vadd.f32 %v2303_v62, %v6319_v30  ;;  %v2208_v0 = vpop.f32.mrf.mxu0  ;;  %v6594_v11 = vor.u32 1.1754944e-38, %v2986_v50  ;;  %vm6684_vm8 = vmor %vm2676_vm14, %vm2677_vm2 }
 0x51e   : > { %v2209_v37 = vadd.f32 %v2208_v0, %v6310_v23  ;;  %vm6626_vm4 = vcmp.eq.f32.partialorder %v2984_v59, 8.507059e+37 }
 0x51f   : > { %v6447_v48 = vadd.f32 %v2352_v29, %v2304_v42  ;;  %v6500_v42 = vld [vmem:[%s5890_s2 + $0x8] sm:$0xff]   ;;  %v4773_v22 = vpop.eup %4772 }
 0x520   : > { %v2257_v6 = vpop.f32.mrf.mxu1  ;;  %2403 = vmatmul.bf16.gmra.mxu0 %v6284_v25  ;;  %v2563_v18 = vunpack.c.l.bf16 %v6500_v42  ;;  %v6566_v56 = vpop.eup %4774  ;;  %v6579_v12 = vadd.f32 1.0, %v4773_v22  ;;  %v4188_v22 = vmul.f32 -1.442695, %v6372_v36 }
 0x521   : > { %v6453_v4 = vadd.f32 %v2257_v6, %v2209_v37  ;;  %2501 = vmatmul.bf16.gmra.mxu2 %v6284_v25  ;;  %v2961_v25 = vmul.f32 %v6451_v1, %v6419_v31  ;;  %vm2996_vm9 = vweird.f32 %v6566_v56 }
 0x522   : > { %2550 = vmatmul.bf16.gmra.mxu3 %v6287_v17  ;;  %vm6742_vm10 = vmor %vm2995_vm6, %vm2996_vm9  ;;  %vm3010_vm0 = vweird.f32 %v6579_v12 }
 0x523   : > { %2452 = vmatmul.bf16.gmra.mxu1 %v6287_v17  ;;  %v2962_v0 = vsub.f32 1.0, %v2961_v25  ;;  %v6516_v25 = vadd.f32 1.0, %v4767_v39  ;;  %v2672_v39 = vmul.f32 %v6513_v15, %v6445_v24 }
 0x524   : > { %v2306_v17 = vpop.f32.mrf.mxu2 }
 0x525   : > { %v2355_v49 = vpop.f32.mrf.mxu3  ;;  %v2307_v38 = vadd.f32 %v2306_v17, %v6319_v30  ;;  %v2210_v16 = vpop.f32.mrf.mxu0  ;;  %v2665_v17 = vand.u32 2147483647, %v6416_v28  ;;  %v2963_v27 = vmul.f32 %v6451_v1, %v2962_v0  ;;  %4778 = vrcp.f32 %v6516_v25 }
 0x526   : > { %v2211_v62 = vadd.f32 %v2210_v16, %v6310_v23  ;;  %4780 = vpow2.f32 %v4187_v7  ;;  %v2660_v7 = vadd.f32 %v6443_v52, %v2659_v63  ;;  %v6601_v63 = vmul.f32 %v6564_v5, %v2561_v13 }
 0x527   : > { %v6502_v37 = vadd.f32 %v2355_v49, %v2307_v38  ;;  %v2976_v49 = vmul.f32 %v6507_v3, %v6437_v43  ;;  %v2964_v0 = vadd.f32 %v6451_v1, %v2963_v27  ;;  %vm6573_vm13 = vcmp.eq.f32.partialorder %v2665_v17, 8.507059e+37 }
 0x528   : > { %v2259_v6 = vpop.f32.mrf.mxu1  ;;  %4782 = vpow2.f32 %v4171_v51  ;;  %v2664_v28 = vsel %vm6612_vm1, %v6443_v52, %v2660_v7  ;;  %v4189_v27 = vmul.f32 -1.442695, %v6379_v58  ;;  %vm2691_vm12 = vweird.f32 %v6516_v25 }
 0x529   : > { %v6511_v10 = vadd.f32 %v2259_v6, %v2211_v62  ;;  %v2977_v6 = vsub.f32 1.0, %v2976_v49  ;;  %v2673_v49 = vsub.f32 1.0, %v2672_v39  ;;  %v2968_v13 = vsel %vm6589_vm15, %v6451_v1, %v2964_v0 }
 0x52a   : > { %v3001_v1 = vand.u32 2147483648, %v6488_v40  ;;  %4784 = vrcp.f32 %v6579_v12  ;;  %v6639_v52 = vsel %vm6552_vm11, %v6535_v44, %v2968_v13  ;;  %v2999_v44 = vand.u32 2147483647, %v6488_v40 }
 0x52b   : > { %v2978_v31 = vmul.f32 %v6507_v3, %v2977_v6  ;;  %v2674_v6 = vmul.f32 %v6513_v15, %v2673_v49  ;;  %4786 = vpow2.f32 %v4188_v22  ;;  %v6695_v58 = vmul.f32 %v6639_v52, %v2562_v47 }
 0x52c   : > { %v2308_v38 = vpop.f32.mrf.mxu2  ;;  %v4173_v47 = vmul.f32 -1.442695, %v6374_v57  ;;  %vm3000_vm14 = vcmp.eq.f32.partialorder %v2999_v44, 8.507059e+37 }
 0x52d   : > { %v2357_v16 = vpop.f32.mrf.mxu3  ;;  %v2309_v9 = vadd.f32 %v2308_v38, %v6319_v30  ;;  %v2213_v62 = vpop.f32.mrf.mxu0  ;;  %v2682_v38 = vand.u32 2147483648, %v6445_v24  ;;  %v2979_v49 = vadd.f32 %v6507_v3, %v2978_v31  ;;  %v4172_v31 = vmul.f32 -1.442695, %v6364_v33 }
 0x52e   : > { %v2214_v29 = vadd.f32 %v2213_v62, %v6310_v23  ;;  %v4174_v33 = vmul.f32 -1.442695, %v6381_v41 }
 0x52f   : > { %v6560_v32 = vadd.f32 %v2357_v16, %v2309_v9  ;;  %v4777_v16 = vpop.eup %4776  ;;  %v2991_v9 = vmul.f32 %v6566_v56, %v6488_v40 }
 0x530   : > { %v2262_v46 = vpop.f32.mrf.mxu1  ;;  %2408 = vmatmul.bf16.gmra.mxu0 %v6297_v20  ;;  %v6603_v39 = vpop.eup %4778  ;;  %v6633_v51 = vadd.f32 1.0, %v4777_v16 }
 0x531   : > { %7843 = vst [vmem:[#allocation56_spill] sm:$0xff] %v6560_v32  ;;  %v6569_v19 = vadd.f32 %v2262_v46, %v2214_v29  ;;  %2506 = vmatmul.bf16.gmra.mxu2 %v6297_v20  ;;  %v4781_v62 = vpop.eup %4780  ;;  %v2687_v7 = vmul.f32 %v6603_v39, %v6516_v25  ;;  %v2992_v59 = vsub.f32 1.0, %v2991_v9  ;;  %v6661_v9 = vsel %vm6573_vm13, %v6524_v2, %v2664_v28 }
 0x532   : > { %2555 = vmatmul.bf16.gmra.mxu3 %v6300_v21  ;;  %v4783_v13 = vpop.eup %4782  ;;  %4788 = vrcp.f32 %v6633_v51  ;;  %v2983_v28 = vsel %vm6667_vm7, %v6507_v3, %v2979_v49  ;;  %vm2692_vm11 = vweird.f32 %v6603_v39  ;;  %vm2706_vm3 = vweird.f32 %v6633_v51 }
 0x533   : > { %7844 = vst [vmem:[#allocation57_spill] sm:$0xff] %v6569_v19  ;;  %2457 = vmatmul.bf16.gmra.mxu1 %v6300_v21  ;;  %v6644_v21 = vadd.f32 1.0, %v4781_v62  ;;  %v6671_v62 = vor.u32 1.1754944e-38, %v3001_v1  ;;  %v2688_v22 = vsub.f32 1.0, %v2687_v7  ;;  %v2993_v2 = vmul.f32 %v6566_v56, %v2992_v59  ;;  %vm6768_vm13 = vmor %vm2691_vm12, %vm2692_vm11 }
 0x534   : > { %v2311_v50 = vpop.f32.mrf.mxu2  ;;  %v6710_v59 = vsel %vm6626_vm4, %v6594_v11, %v2983_v28 }
 0x535   : > { %v2360_v29 = vpop.f32.mrf.mxu3  ;;  %v2312_v36 = vadd.f32 %v2311_v50, %v6319_v30  ;;  %v2215_v0 = vpop.f32.mrf.mxu0  ;;  %4790 = vrcp.f32 %v6644_v21 }
 0x536   : > { %v2216_v17 = vadd.f32 %v2215_v0, %v6310_v23  ;;  %v2675_v23 = vadd.f32 %v6513_v15, %v2674_v6  ;;  %v3016_v6 = vand.u32 2147483648, %v6579_v12  ;;  %v2683_v0 = vor.u32 1.1754944e-38, %v2682_v38 }
 0x537   : > { %v6646_v20 = vadd.f32 %v2360_v29, %v2312_v36  ;;  %v6675_v29 = vpop.eup %4784  ;;  %4792 = vpow2.f32 %v4172_v31  ;;  %v2994_v38 = vadd.f32 %v6566_v56, %v2993_v2  ;;  %v6735_v2 = vperm.slane %v6307_v26, 3 }
 0x538   : > { %v2264_v50 = vpop.f32.mrf.mxu1  ;;  %v2679_v24 = vsel %vm6684_vm8, %v6513_v15, %v2675_v23  ;;  %v4787_v49 = vpop.eup %4786  ;;  %v3006_v45 = vmul.f32 %v6675_v29, %v6579_v12  ;;  %v2689_v15 = vmul.f32 %v6603_v39, %v2688_v22  ;;  %4794 = vpow2.f32 %v4189_v27 }
 0x539   : > { %7853 = vst [vmem:[#allocation58_spill] sm:$0xff] %v6646_v20  ;;  %v6648_v16 = vadd.f32 %v2264_v50, %v2216_v17  ;;  %v6701_v17 = vadd.f32 1.0, %v4783_v13  ;;  %v6719_v31 = vpop.eup %4788  ;;  %v6722_v13 = vor.u32 1.1754944e-38, %v3016_v6  ;;  %v6726_v11 = vsel %vm6651_vm5, %v2683_v0, %v2679_v24 }
 0x53a   : > { %v6732_v22 = vadd.f32 1.0, %v4787_v49  ;;  %v3007_v43 = vsub.f32 1.0, %v3006_v45  ;;  %v2690_v28 = vadd.f32 %v6603_v39, %v2689_v15  ;;  %v2998_v24 = vsel %vm6742_vm10, %v6566_v56, %v2994_v38 }
 0x53b   : > { %7854 = vst [vmem:[#allocation59_spill] sm:$0xff] %v6648_v16  ;;  %v6729_v14 = vpop.eup %4790  ;;  %4796 = vrcp.f32 %v6701_v17  ;;  %vm3011_vm15 = vweird.f32 %v6675_v29  ;;  %vm2707_vm4 = vweird.f32 %v6719_v31  ;;  %vm3025_vm8 = vweird.f32 %v6644_v21 }
 0x53c   : > { %v2313_v1 = vpop.f32.mrf.mxu2  ;;  %4798 = vpow2.f32 %v4173_v47  ;;  %v3021_v0 = vmul.f32 %v6729_v14, %v6644_v21  ;;  %v3031_v47 = vand.u32 2147483648, %v6644_v21  ;;  %v3008_v38 = vmul.f32 %v6675_v29, %v3007_v43  ;;  %vm6847_vm5 = vmor %vm3010_vm0, %vm3011_vm15 }
 0x53d   : > { %v2362_v36 = vpop.f32.mrf.mxu3  ;;  %v2314_v3 = vadd.f32 %v2313_v1, %v6319_v30  ;;  %v2374_v7 = vpop.f32.mrf.mxu0  ;;  %v6717_v30 = vperm.slane %v6307_v26, 2  ;;  %v4190_v26 = vmul.f32 -1.442695, %v6390_v53  ;;  %v2695_v53 = vand.u32 2147483647, %v6516_v25  ;;  %vm6896_vm9 = vmor %vm2706_vm3, %vm2707_vm4 }
 0x53e   : > { %v4793_v6 = vpop.eup %4792  ;;  %4800 = vrcp.f32 %v6732_v22  ;;  %v2694_v60 = vsel %vm6768_vm13, %v6603_v39, %v2690_v28  ;;  %v2702_v39 = vmul.f32 %v6719_v31, %v6633_v51  ;;  %v6793_v28 = vor.u32 1.1754944e-38, %v3031_v47 }
 0x53f   : > { %v6714_v50 = vadd.f32 %v2362_v36, %v2314_v3  ;;  %v2375_v1 = vadd.f32 %v2374_v7, %v6717_v30  ;;  %v6753_v36 = vmul.f32 %v6710_v59, %v2563_v18  ;;  %v2697_v7 = vand.u32 2147483648, %v6516_v25  ;;  %v4795_v45 = vpop.eup %4794 }
 0x540   : > { %v2423_v23 = vpop.f32.mrf.mxu1  ;;  %v6776_v25 = vadd.f32 1.0, %v4793_v6  ;;  %4802 = vpow2.f32 %v4190_v26  ;;  %v3022_v6 = vsub.f32 1.0, %v3021_v0  ;;  %v6788_v46 = vadd.f32 1.0, %v4795_v45  ;;  %v6809_v45 = vld [vmem:[%s5890_s2 + $0x10] sm:$0xff]  }
 0x541   : > { %7861 = vst [vmem:[#allocation60_spill] sm:$0xff] %v6714_v50  ;;  %v6784_v27 = vpop.eup %4796  ;;  %v2424_v40 = vadd.f32 %v2423_v23, %v2375_v1  ;;  %v2698_v56 = vor.u32 1.1754944e-38, %v2697_v7  ;;  %vm2696_vm1 = vcmp.eq.f32.partialorder %v2695_v53, 8.507059e+37  ;;  %v6797_v23 = vadd.f32 %v6675_v29, %v3008_v38 }
 0x542   : > { %v4799_v43 = vpop.eup %4798  ;;  %4804 = vrcp.f32 %v6776_v25  ;;  %v3046_v0 = vand.u32 2147483648, %v6732_v22  ;;  %vm3026_vm7 = vweird.f32 %v6729_v14  ;;  %vm2721_vm10 = vweird.f32 %v6701_v17 }
 0x543   : > { %v6800_v26 = vsel %vm2696_vm1, %v2698_v56, %v2694_v60  ;;  %4806 = vpow2.f32 %v4174_v33  ;;  %v2703_v60 = vsub.f32 1.0, %v2702_v39  ;;  %v3013_v16 = vsel %vm6847_vm5, %v6675_v29, %v6797_v23  ;;  %vm6950_vm12 = vmor %vm3025_vm8, %vm3026_vm7 }
 0x544   : > { %v2472_v3 = vpop.f32.mrf.mxu2  ;;  %4808 = vrcp.f32 %v6788_v46  ;;  %v6832_v1 = vor.u32 1.1754944e-38, %v3046_v0  ;;  %v2717_v0 = vmul.f32 %v6784_v27, %v6701_v17  ;;  %vm2722_vm11 = vweird.f32 %v6784_v27 }
 0x545   : > { %v2521_v49 = vpop.f32.mrf.mxu3  ;;  %v2473_v18 = vadd.f32 %v2472_v3, %v6735_v2  ;;  %v2376_v15 = vpop.f32.mrf.mxu0  ;;  %v6782_v3 = vsel %vm3000_vm14, %v6671_v62, %v2998_v24  ;;  %v2704_v50 = vmul.f32 %v6719_v31, %v2703_v60  ;;  %vm6985_vm15 = vmor %vm2721_vm10, %vm2722_vm11  ;;  %vm3040_vm1 = vweird.f32 %v6732_v22 }
 0x546   : > { %v6803_v24 = vpop.eup %4800  ;;  %v2718_v33 = vsub.f32 1.0, %v2717_v0  ;;  %vm2736_vm3 = vweird.f32 %v6776_v25  ;;  %vm3055_vm10 = vweird.f32 %v6788_v46 }
 0x547   : > { %v2522_v44 = vadd.f32 %v2521_v49, %v2473_v18  ;;  %v6806_v49 = vadd.f32 1.0, %v4799_v43  ;;  %v7866_v18 = vunpack.c.h.bf16 %v6500_v42  ;;  %v7867_v43 = vand.u32 2147483647, %v6579_v12 }
 0x548   : > { %v2425_v57 = vpop.f32.mrf.mxu1  ;;  %v3036_v42 = vmul.f32 %v6803_v24, %v6732_v22  ;;  %v2712_v12 = vand.u32 2147483648, %v6633_v51  ;;  %v2705_v20 = vadd.f32 %v6719_v31, %v2704_v50  ;;  %vm3041_vm0 = vweird.f32 %v6803_v24 }
 0x549   : > { %v3185_v41 = vmul.f32 %v6541_v61, %v2522_v44  ;;  %v3023_v61 = vmul.f32 %v6729_v14, %v3022_v6  ;;  %v6816_v38 = vmul.f32 %v6782_v3, %v7866_v18  ;;  %v4803_v44 = vpop.eup %4802  ;;  %vm6820_vm2 = vcmp.eq.f32.partialorder %v7867_v43, 8.507059e+37  ;;  %vm7069_vm5 = vmor %vm3040_vm1, %vm3041_vm0 }
 0x54a   : > { %v2377_v6 = vadd.f32 %v2376_v15, %v6717_v30  ;;  %v2710_v43 = vand.u32 2147483647, %v6633_v51  ;;  %v6836_v62 = vpop.eup %4804  ;;  %vm2751_vm11 = vweird.f32 %v6806_v49 }
 0x54b   : > { %v3201_v7 = vadd.f32 %v3185_v41, %v2424_v40  ;;  %v4191_v40 = vmul.f32 -1.442695, %v6403_v35  ;;  %v4175_v35 = vmul.f32 -1.442695, %v6393_v54  ;;  %v4807_v39 = vpop.eup %4806  ;;  %v6852_v54 = vadd.f32 %v6729_v14, %v3023_v61 }
 0x54c   : > { %v2474_v53 = vpop.f32.mrf.mxu2  ;;  %vm6857_vm6 = vcmp.eq.f32.partialorder %v2710_v43, 8.507059e+37  ;;  %vm2737_vm4 = vweird.f32 %v6836_v62 }
 0x54d   : > { %v2523_v47 = vpop.f32.mrf.mxu3  ;;  %4810 = vtanh.f32 %v3201_v7  ;;  %v2475_v56 = vadd.f32 %v2474_v53, %v6735_v2  ;;  %v2379_v41 = vpop.f32.mrf.mxu0  ;;  %v6838_v53 = vadd.f32 1.0, %v4803_v44  ;;  %vm7108_vm7 = vmor %vm2736_vm3, %vm2737_vm4 }
 0x54e   : > { %4812 = vrcp.f32 %v6806_v49  ;;  %v6855_v44 = vpop.eup %4808 }
 0x54f   : > { %v2524_v7 = vadd.f32 %v2523_v47, %v2475_v56  ;;  %4814 = vpow2.f32 %v4191_v40  ;;  %v2426_v47 = vadd.f32 %v2425_v57, %v2377_v6  ;;  %v3037_v56 = vsub.f32 1.0, %v3036_v42 }
 0x550   : > { %v2428_v15 = vpop.f32.mrf.mxu1  ;;  %v3061_v40 = vand.u32 2147483648, %v6788_v46  ;;  %4816 = vpow2.f32 %v4175_v35  ;;  %v7874_v6 = vsub.f32 1.0, %v6564_v5  ;;  %v3051_v23 = vmul.f32 %v6855_v44, %v6788_v46 }
 0x551   : > { %v3186_v60 = vmul.f32 %v6661_v9, %v2524_v7  ;;  %v2380_v9 = vadd.f32 %v2379_v41, %v6717_v30  ;;  %4818 = vrcp.f32 %v6838_v53  ;;  %v6879_v41 = vadd.f32 1.0, %v4807_v39 }
 0x552   : > { %v3076_v0 = vand.u32 2147483648, %v6838_v53  ;;  %vm3056_vm8 = vweird.f32 %v6855_v44  ;;  %vm3070_vm0 = vweird.f32 %v6838_v53 }
 0x553   : > { %v4811_v61 = vpop.eup %4810  ;;  %v3202_v57 = vadd.f32 %v3186_v60, %v2426_v47  ;;  %v3038_v47 = vmul.f32 %v6803_v24, %v3037_v56  ;;  %v2713_v60 = vor.u32 1.1754944e-38, %v2712_v12  ;;  %v3052_v56 = vsub.f32 1.0, %v3051_v23 }
 0x554   : > { %v3249_v42 = vmul.f32 %v4811_v61, %v7874_v6  ;;  %v2477_v43 = vpop.f32.mrf.mxu2  ;;  %v6874_v29 = vpop.eup %4812  ;;  %v6887_v61 = vsel %vm6820_vm2, %v6722_v13, %v3013_v16  ;;  %v6900_v16 = vor.u32 1.1754944e-38, %v3061_v40  ;;  %v4192_v13 = vmul.f32 -1.442695, %v6422_v34 }
 0x555   : > { %v2526_v7 = vpop.f32.mrf.mxu3  ;;  %4820 = vtanh.f32 %v3202_v57  ;;  %v2478_v5 = vadd.f32 %v2477_v43, %v6735_v2  ;;  %v2381_v35 = vpop.f32.mrf.mxu0  ;;  %v4176_v57 = vmul.f32 -1.442695, %v6405_v55  ;;  %v2429_v43 = vadd.f32 %v2428_v15, %v2380_v9 }
 0x556   : > { %v3281_v50 = vadd.f32 %v6601_v63, %v3249_v42  ;;  %v4815_v6 = vpop.eup %4814  ;;  %v2709_v55 = vsel %vm6896_vm9, %v6719_v31, %v2705_v20  ;;  %4822 = vrcp.f32 %v6879_v41  ;;  %v3237_v12 = vsub.f32 1.0, %v6887_v61 }
 0x557   : > { %v2527_v19 = vadd.f32 %v2526_v7, %v2478_v5  ;;  %v4817_v15 = vpop.eup %4816  ;;  %v6913_v40 = vadd.f32 %v6803_v24, %v3038_v47  ;;  %v6915_v34 = vadd.f32 1.0, %v4815_v6  ;;  %v7877_v42 = vunpack.c.l.bf16 %v6809_v45 }
 0x558   : > { %v2430_v32 = vpop.f32.mrf.mxu1  ;;  %3297 = vst [vmem:[%s5899_s0] sm:$0xff] %v3281_v50  ;;  %v6910_v9 = vpop.eup %4818  ;;  %v2566_v31 = vunpack.c.h.bf16 %v6809_v45  ;;  %4824 = vpow2.f32 %v4176_v57  ;;  %v6928_v23 = vadd.f32 1.0, %v4817_v15  ;;  %v7878_v5 = vsub.f32 1.0, %v6639_v52 }
 0x559   : > { %v3187_v51 = vmul.f32 %v6726_v11, %v2527_v19  ;;  %v6920_v20 = vmul.f32 %v6887_v61, %v7877_v42  ;;  %v6926_v11 = vsel %vm6857_vm6, %v2713_v60, %v2709_v55  ;;  %4826 = vpow2.f32 %v4192_v13 }
 0x55a   : > { %v2719_v63 = vmul.f32 %v6784_v27, %v2718_v33  ;;  %v3053_v42 = vmul.f32 %v6855_v44, %v3052_v56  ;;  %v2382_v57 = vadd.f32 %v2381_v35, %v6717_v30  ;;  %v3066_v60 = vmul.f32 %v6910_v9, %v6838_v53 }
 0x55b   : > { %v4821_v7 = vpop.eup %4820  ;;  %v3203_v19 = vadd.f32 %v3187_v51, %v2429_v43  ;;  %v2725_v13 = vand.u32 2147483647, %v6701_v17  ;;  %v4177_v33 = vmul.f32 -1.442695, %v6426_v8  ;;  %v6955_v51 = vor.u32 1.1754944e-38, %v3076_v0 }
 0x55c   : > { %v3250_v47 = vmul.f32 %v4821_v7, %v7878_v5  ;;  %v2479_v50 = vpop.f32.mrf.mxu2  ;;  %v6941_v55 = vpop.eup %4822  ;;  %v2720_v8 = vadd.f32 %v6784_v27, %v2719_v63  ;;  %v6967_v0 = vadd.f32 %v6855_v44, %v3053_v42  ;;  %vm2752_vm9 = vweird.f32 %v6874_v29 }
 0x55d   : > { %v2528_v6 = vpop.f32.mrf.mxu3  ;;  %4828 = vtanh.f32 %v3203_v19  ;;  %v2480_v43 = vadd.f32 %v2479_v50, %v6735_v2  ;;  %v2384_v18 = vpop.f32.mrf.mxu0  ;;  %v2431_v19 = vadd.f32 %v2430_v32, %v2382_v57  ;;  %v3028_v50 = vsel %vm6950_vm12, %v6729_v14, %v6852_v54  ;;  %vm7151_vm12 = vmor %vm2751_vm11, %vm2752_vm9 }
 0x55e   : > { %4830 = vrcp.f32 %v6915_v34  ;;  %v3282_v52 = vadd.f32 %v6695_v58, %v3250_v47  ;;  %v4825_v7 = vpop.eup %4824  ;;  %v2727_v47 = vand.u32 2147483648, %v6701_v17  ;;  %vm6969_vm13 = vcmp.eq.f32.partialorder %v2725_v13, 8.507059e+37 }
 0x55f   : > { %v2529_v15 = vadd.f32 %v2528_v6, %v2480_v43  ;;  %4832 = vrcp.f32 %v6928_v23  ;;  %v4827_v6 = vpop.eup %4826  ;;  %v3067_v43 = vsub.f32 1.0, %v3066_v60  ;;  %v7883_v32 = vand.u32 2147483647, %v6644_v21 }
 0x560   : > { %v2433_v56 = vpop.f32.mrf.mxu1  ;;  %3298 = vst [vmem:[%s5899_s0 + $0x8] sm:$0xff] %v3282_v52  ;;  %4834 = vpow2.f32 %v4177_v33  ;;  %v4193_v57 = vmul.f32 -1.442695, %v6447_v48  ;;  %v2385_v54 = vadd.f32 %v2384_v18, %v6717_v30  ;;  %v3091_v60 = vand.u32 2147483648, %v6915_v34 }
 0x561   : > { %v3188_v5 = vmul.f32 %v6800_v26, %v2529_v15  ;;  %vm6975_vm14 = vcmp.eq.f32.partialorder %v7883_v32, 8.507059e+37  ;;  %v6993_v13 = vadd.f32 1.0, %v4825_v7  ;;  %v7888_v48 = vsub.f32 1.0, %v6710_v59 }
 0x562   : > { %v2724_v17 = vsel %vm6985_vm15, %v6784_v27, %v2720_v8  ;;  %v7000_v35 = vadd.f32 1.0, %v4827_v6  ;;  %v2732_v7 = vmul.f32 %v6836_v62, %v6776_v25  ;;  %v3068_v59 = vmul.f32 %v6910_v9, %v3067_v43 }
 0x563   : > { %v4829_v63 = vpop.eup %4828  ;;  %v3204_v14 = vadd.f32 %v3188_v5, %v2431_v19  ;;  %v2728_v27 = vor.u32 1.1754944e-38, %v2727_v47  ;;  %v7013_v8 = vsel %vm6975_vm14, %v6793_v28, %v3028_v50  ;;  %v7021_v43 = vor.u32 1.1754944e-38, %v3091_v60 }
 0x564   : > { %v6989_v21 = vpop.eup %4830  ;;  %v3251_v33 = vmul.f32 %v4829_v63, %v7888_v48  ;;  %v2482_v18 = vpop.f32.mrf.mxu2  ;;  %v2733_v50 = vsub.f32 1.0, %v2732_v7  ;;  %v7889_v26 = vand.u32 2147483647, %v6732_v22  ;;  %v7043_v60 = vmul.f32 %v7013_v8, %v2566_v31 }
 0x565   : > { %v2531_v15 = vpop.f32.mrf.mxu3  ;;  %4836 = vtanh.f32 %v3204_v14  ;;  %v2483_v19 = vadd.f32 %v2482_v18, %v6735_v2  ;;  %v2386_v5 = vpop.f32.mrf.mxu0  ;;  %v3081_v6 = vmul.f32 %v6989_v21, %v6915_v34  ;;  %v2434_v14 = vadd.f32 %v2433_v56, %v2385_v54  ;;  %v7018_v18 = vld [vmem:[%s5890_s2 + $0x18] sm:$0xff]  }
 0x566   : > { %v7005_v32 = vpop.eup %4832  ;;  %v3283_v63 = vadd.f32 %v6753_v36, %v3251_v33  ;;  %4838 = vpow2.f32 %v4193_v57  ;;  %v4178_v36 = vmul.f32 -1.442695, %v6453_v4  ;;  %v2729_v56 = vsel %vm6969_vm13, %v2728_v27, %v2724_v17 }
 0x567   : > { %v2532_v42 = vadd.f32 %v2531_v15, %v2483_v19  ;;  %4840 = vrcp.f32 %v6993_v13  ;;  %v4835_v28 = vpop.eup %4834  ;;  %vm7032_vm2 = vcmp.eq.f32.partialorder %v7889_v26, 8.507059e+37  ;;  %v7037_v54 = vadd.f32 %v6910_v9, %v3068_v59 }
 0x568   : > { %v2435_v48 = vpop.f32.mrf.mxu1  ;;  %3299 = vst [vmem:[%s5899_s0 + $0x10] sm:$0xff] %v3283_v63  ;;  %4842 = vrcp.f32 %v7000_v35  ;;  %v3082_v33 = vsub.f32 1.0, %v3081_v6  ;;  %v3106_v15 = vand.u32 2147483648, %v7000_v35  ;;  %v7048_v19 = vadd.f32 1.0, %v4835_v28 }
 0x569   : > { %v3189_v47 = vmul.f32 %v6926_v11, %v2532_v42  ;;  %v2567_v11 = vunpack.c.l.bf16 %v7018_v18  ;;  %4844 = vpow2.f32 %v4178_v36  ;;  %v7892_v7 = vsub.f32 1.0, %v6782_v3 }
 0x56a   : > { %v2747_v31 = vmul.f32 %v6874_v29, %v6806_v49  ;;  %v2387_v6 = vadd.f32 %v2386_v5, %v6717_v30  ;;  %v2734_v28 = vmul.f32 %v6836_v62, %v2733_v50  ;;  %v2740_v36 = vand.u32 2147483647, %v6776_v25 }
 0x56b   : > { %v4837_v52 = vpop.eup %4836  ;;  %v3205_v17 = vadd.f32 %v3189_v47, %v2434_v14  ;;  %v2742_v26 = vand.u32 2147483648, %v6776_v25  ;;  %v3043_v22 = vsel %vm7069_vm5, %v6803_v24, %v6913_v40  ;;  %vm3071_vm13 = vweird.f32 %v6910_v9 }
 0x56c   : > { %v3252_v59 = vmul.f32 %v4837_v52, %v7892_v7  ;;  %v2484_v63 = vpop.f32.mrf.mxu2  ;;  %v4839_v27 = vpop.eup %4838  ;;  %v2748_v58 = vsub.f32 1.0, %v2747_v31  ;;  %v2436_v50 = vadd.f32 %v2435_v48, %v2387_v6  ;;  %v2735_v4 = vadd.f32 %v6836_v62, %v2734_v28  ;;  %vm7249_vm9 = vmor %vm3070_vm0, %vm3071_vm13 }
 0x56d   : > { %v2533_v45 = vpop.f32.mrf.mxu3  ;;  %4846 = vtanh.f32 %v3205_v17  ;;  %v2485_v42 = vadd.f32 %v2484_v63, %v6735_v2  ;;  %v2389_v14 = vpop.f32.mrf.mxu0  ;;  %v7074_v17 = vor.u32 1.1754944e-38, %v3106_v15  ;;  %v3083_v63 = vmul.f32 %v6989_v21, %v3082_v33 }
 0x56e   : > { %v7057_v47 = vpop.eup %4840  ;;  %v3284_v3 = vadd.f32 %v6816_v38, %v3252_v59  ;;  %v4194_v38 = vmul.f32 -1.442695, %v6502_v37  ;;  %v7078_v39 = vadd.f32 1.0, %v4839_v27  ;;  %4848 = vrcp.f32 %v7048_v19 }
 0x56f   : > { %v7063_v52 = vpop.eup %4842  ;;  %v2534_v7 = vadd.f32 %v2533_v45, %v2485_v42  ;;  %v4179_v33 = vmul.f32 -1.442695, %v6511_v10  ;;  %vm7090_vm6 = vcmp.eq.f32.partialorder %v2740_v36, 8.507059e+37  ;;  %v2743_v42 = vor.u32 1.1754944e-38, %v2742_v26 }
 0x570   : > { %v2438_v59 = vpop.f32.mrf.mxu1  ;;  %3300 = vst [vmem:[%s5899_s0 + $0x18] sm:$0xff] %v3284_v3  ;;  %v4845_v37 = vpop.eup %4844  ;;  %v3096_v45 = vmul.f32 %v7063_v52, %v7000_v35  ;;  %4850 = vpow2.f32 %v4194_v38  ;;  %v2390_v40 = vadd.f32 %v2389_v14, %v6717_v30  ;;  %v7098_v48 = vsel %vm7032_vm2, %v6832_v1, %v3043_v22  ;;  %vm7191_vm2 = vmor %vm3055_vm10, %vm3056_vm8 }
 0x571   : > { %v3190_v15 = vmul.f32 %v2729_v56, %v2534_v7  ;;  %4852 = vrcp.f32 %v7078_v39  ;;  %v3121_v56 = vand.u32 2147483648, %v7078_v39  ;;  %v2749_v1 = vmul.f32 %v6874_v29, %v2748_v58 }
 0x572   : > { %v2739_v61 = vsel %vm7108_vm7, %v6836_v62, %v2735_v4  ;;  %v2762_v28 = vmul.f32 %v6941_v55, %v6879_v41  ;;  %v7120_v25 = vadd.f32 %v6989_v21, %v3083_v63  ;;  %v3097_v36 = vsub.f32 1.0, %v3096_v45 }
 0x573   : > { %v4847_v3 = vpop.eup %4846  ;;  %v3206_v24 = vadd.f32 %v3190_v15, %v2436_v50  ;;  %v7122_v26 = vadd.f32 1.0, %v4845_v37  ;;  %v2439_v50 = vadd.f32 %v2438_v59, %v2390_v40  ;;  %v3239_v7 = vsub.f32 1.0, %v7098_v48  ;;  %v7899_v40 = vld [vmem:[#allocation56_spill] sm:$0xff] }
 0x574   : > { %v3253_v10 = vmul.f32 %v4847_v3, %v3237_v12  ;;  %v2487_v31 = vpop.f32.mrf.mxu2  ;;  %v7125_v5 = vpop.eup %4848  ;;  %v2568_v62 = vunpack.c.h.bf16 %v7018_v18  ;;  %v3119_v4 = vand.u32 2147483647, %v7078_v39  ;;  %v2744_v63 = vsel %vm7090_vm6, %v2743_v42, %v2739_v61 }
 0x575   : > { %v2536_v6 = vpop.f32.mrf.mxu3  ;;  %4854 = vtanh.f32 %v3206_v24  ;;  %v2488_v57 = vadd.f32 %v2487_v31, %v6735_v2  ;;  %v2391_v12 = vpop.f32.mrf.mxu0  ;;  %v2750_v15 = vadd.f32 %v6874_v29, %v2749_v1  ;;  %v7136_v59 = vor.u32 1.1754944e-38, %v3121_v56 }
 0x576   : > { %v3285_v58 = vadd.f32 %v6920_v20, %v3253_v10  ;;  %v4851_v20 = vpop.eup %4850  ;;  %4856 = vpow2.f32 %v4179_v33  ;;  %v2763_v45 = vsub.f32 1.0, %v2762_v28  ;;  %v3098_v24 = vmul.f32 %v7063_v52, %v3097_v36 }
 0x577   : > { %v2537_v38 = vadd.f32 %v2536_v6, %v2488_v57  ;;  %v7138_v3 = vpop.eup %4852  ;;  %4858 = vrcp.f32 %v7122_v26  ;;  %v2757_v27 = vand.u32 2147483648, %v6806_v49  ;;  %v4195_v10 = vmul.f32 -1.442695, %v7899_v40 }
 0x578   : > { %v2440_v22 = vpop.f32.mrf.mxu1  ;;  %3301 = vst [vmem:[%s5899_s0 + $0x20] sm:$0xff] %v3285_v58  ;;  %v3271_v33 = vmul.f32 %v7098_v48, %v2567_v11  ;;  %v2755_v6 = vand.u32 2147483647, %v6806_v49  ;;  %v7156_v14 = vadd.f32 1.0, %v4851_v20  ;;  %v7902_v1 = vsub.f32 1.0, %v7013_v8 }
 0x579   : > { %v3191_v37 = vmul.f32 %v2744_v63, %v2537_v38  ;;  %v2754_v36 = vsel %vm7151_vm12, %v6874_v29, %v2750_v15  ;;  %v2777_v11 = vmul.f32 %v7005_v32, %v6928_v23  ;;  %v2392_v58 = vadd.f32 %v2391_v12, %v6717_v30  ;;  %v7903_v12 = vld [vmem:[#allocation57_spill] sm:$0xff] }
 0x57a   : > { %v2764_v38 = vmul.f32 %v6941_v55, %v2763_v45  ;;  %v7169_v8 = vadd.f32 %v7063_v52, %v3098_v24  ;;  %v3111_v63 = vmul.f32 %v7138_v3, %v7078_v39  ;;  %v2758_v15 = vor.u32 1.1754944e-38, %v2757_v27 }
 0x57b   : > { %v4855_v42 = vpop.eup %4854  ;;  %v3207_v56 = vadd.f32 %v3191_v37, %v2439_v50  ;;  %v4180_v37 = vmul.f32 -1.442695, %v7903_v12  ;;  %vm2756_vm14 = vcmp.eq.f32.partialorder %v2755_v6, 8.507059e+37  ;;  %vm2766_vm15 = vweird.f32 %v6879_v41 }
 0x57c   : > { %v3254_v57 = vmul.f32 %v4855_v42, %v7902_v1  ;;  %v2489_v61 = vpop.f32.mrf.mxu2  ;;  %v4857_v20 = vpop.eup %4856  ;;  %v2759_v45 = vsel %vm2756_vm14, %v2758_v15, %v2754_v36  ;;  %v2778_v24 = vsub.f32 1.0, %v2777_v11  ;;  %vm2767_vm1 = vweird.f32 %v6941_v55 }
 0x57d   : > { %v2538_v28 = vpop.f32.mrf.mxu3  ;;  %4860 = vtanh.f32 %v3207_v56  ;;  %v2490_v50 = vadd.f32 %v2489_v61, %v6735_v2  ;;  %v2394_v49 = vpop.f32.mrf.mxu0  ;;  %v3112_v31 = vsub.f32 1.0, %v3111_v63  ;;  %v3134_v6 = vand.u32 2147483647, %v7156_v14  ;;  %vm7209_vm3 = vmor %vm2766_vm15, %vm2767_vm1 }
 0x57e   : > { %v3286_v29 = vadd.f32 %v7043_v60, %v3254_v57  ;;  %4862 = vpow2.f32 %v4195_v10  ;;  %v7176_v56 = vpop.eup %4858  ;;  %v2441_v60 = vadd.f32 %v2440_v22, %v2392_v58  ;;  %v2765_v10 = vadd.f32 %v6941_v55, %v2764_v38 }
 0x57f   : > { %v2539_v42 = vadd.f32 %v2538_v28, %v2490_v50  ;;  %4864 = vrcp.f32 %v7156_v14  ;;  %v3136_v1 = vand.u32 2147483648, %v7156_v14  ;;  %v2772_v57 = vand.u32 2147483648, %v6879_v41 }
 0x580   : > { %v2443_v40 = vpop.f32.mrf.mxu1  ;;  %3302 = vst [vmem:[%s5899_s0 + $0x28] sm:$0xff] %v3286_v29  ;;  %v7195_v22 = vadd.f32 1.0, %v4857_v20  ;;  %v2395_v11 = vadd.f32 %v2394_v49, %v6717_v30  ;;  %v2770_v58 = vand.u32 2147483647, %v6879_v41  ;;  %4866 = vpow2.f32 %v4180_v37 }
 0x581   : > { %v3192_v27 = vmul.f32 %v2759_v45, %v2539_v42  ;;  %v3058_v38 = vsel %vm7191_vm2, %v6855_v44, %v6967_v0  ;;  %v2779_v49 = vmul.f32 %v7005_v32, %v2778_v24  ;;  %v2769_v44 = vsel %vm7209_vm3, %v6941_v55, %v2765_v10  ;;  %v7234_v10 = vld [vmem:[%s5890_s2 + $0x20] sm:$0xff]  }
 0x582   : > { %v2792_v41 = vmul.f32 %v7057_v47, %v6993_v13  ;;  %v7908_v12 = vand.u32 2147483647, %v6838_v53  ;;  %v7228_v42 = vor.u32 1.1754944e-38, %v3136_v1  ;;  %v7911_v24 = vand.u32 2147483647, %v6788_v46  ;;  %v7912_v46 = vld [vmem:[#allocation58_spill] sm:$0xff] }
 0x583   : > { %v4861_v61 = vpop.eup %4860  ;;  %v3208_v36 = vadd.f32 %v3192_v27, %v2441_v60  ;;  %v2773_v55 = vor.u32 1.1754944e-38, %v2772_v57  ;;  %v2444_v27 = vadd.f32 %v2443_v40, %v2395_v11  ;;  %vm2771_vm6 = vcmp.eq.f32.partialorder %v2770_v58, 8.507059e+37 }
 0x584   : > { %v3255_v50 = vmul.f32 %v4861_v61, %v3239_v7  ;;  %v2492_v63 = vpop.f32.mrf.mxu2  ;;  %v4863_v48 = vpop.eup %4862  ;;  %vm7224_vm4 = vcmp.eq.f32.partialorder %v7908_v12, 8.507059e+37  ;;  %vm3060_vm5 = vcmp.eq.f32.partialorder %v7911_v24, 8.507059e+37  ;;  %vm3086_vm7 = vweird.f32 %v6989_v21 }
 0x585   : > { %v2541_v29 = vpop.f32.mrf.mxu3  ;;  %4868 = vtanh.f32 %v3208_v36  ;;  %v2493_v7 = vadd.f32 %v2492_v63, %v6735_v2  ;;  %v2396_v0 = vpop.f32.mrf.mxu0  ;;  %v3063_v60 = vsel %vm3060_vm5, %v6900_v16, %v3058_v38  ;;  %v7238_v36 = vmul.f32 %v7138_v3, %v3112_v31 }
 0x586   : > { %v7220_v20 = vpop.eup %4864  ;;  %v3287_v45 = vadd.f32 %v3271_v33, %v3255_v50  ;;  %v2774_v1 = vsel %vm2771_vm6, %v2773_v55, %v2769_v44  ;;  %v2780_v33 = vadd.f32 %v7005_v32, %v2779_v49  ;;  %vm2782_vm8 = vweird.f32 %v7005_v32 }
 0x587   : > { %v2542_v61 = vadd.f32 %v2541_v29, %v2493_v7  ;;  %4870 = vrcp.f32 %v7195_v22  ;;  %v4196_v16 = vmul.f32 -1.442695, %v7912_v46  ;;  %v2793_v57 = vsub.f32 1.0, %v2792_v41  ;;  %v4867_v11 = vpop.eup %4866 }
 0x588   : > { %v2445_v28 = vpop.f32.mrf.mxu1  ;;  %3303 = vst [vmem:[%s5899_s0 + $0x30] sm:$0xff] %v3287_v45  ;;  %vm3085_vm10 = vweird.f32 %v6915_v34  ;;  %v3240_v58 = vsub.f32 1.0, %v3063_v60  ;;  %v2569_v50 = vunpack.c.l.bf16 %v7234_v10  ;;  %vm2781_vm11 = vweird.f32 %v6928_v23 }
 0x589   : > { %v3193_v40 = vmul.f32 %v2774_v1, %v2542_v61  ;;  %v2787_v38 = vand.u32 2147483648, %v6928_v23  ;;  %v7257_v29 = vadd.f32 1.0, %v4863_v48  ;;  %v3272_v15 = vmul.f32 %v3063_v60, %v2568_v62  ;;  %vm7263_vm12 = vmor %vm2781_vm11, %vm2782_vm8  ;;  %v7920_v60 = vld [vmem:[#allocation59_spill] sm:$0xff] }
 0x58a   : > { %v2785_v7 = vand.u32 2147483647, %v6928_v23  ;;  %v3073_v41 = vsel %vm7249_vm9, %v6910_v9, %v7037_v54  ;;  %v2784_v18 = vsel %vm7263_vm12, %v7005_v32, %v2780_v33  ;;  %v2807_v62 = vmul.f32 %v7125_v5, %v7048_v19  ;;  %vm7311_vm3 = vmor %vm3085_vm10, %vm3086_vm7 }
 0x58b   : > { %v4869_v63 = vpop.eup %4868  ;;  %v3209_v53 = vadd.f32 %v3193_v40, %v2444_v27  ;;  %v2397_v45 = vadd.f32 %v2396_v0, %v6717_v30  ;;  %v2794_v55 = vmul.f32 %v7057_v47, %v2793_v57  ;;  %v7917_v9 = vand.u32 2147483647, %v6915_v34 }
 0x58c   : > { %v3256_v44 = vmul.f32 %v4869_v63, %v3240_v58  ;;  %v2494_v48 = vpop.f32.mrf.mxu2  ;;  %v7288_v32 = vmul.f32 %v7220_v20, %v7156_v14  ;;  %v4181_v27 = vmul.f32 -1.442695, %v7920_v60  ;;  %v2788_v0 = vor.u32 1.1754944e-38, %v2787_v38 }
 0x58d   : > { %v2543_v12 = vpop.f32.mrf.mxu3  ;;  %4872 = vtanh.f32 %v3209_v53  ;;  %v2495_v23 = vadd.f32 %v2494_v48, %v6735_v2  ;;  %v2399_v24 = vpop.f32.mrf.mxu0  ;;  %vm7282_vm13 = vcmp.eq.f32.partialorder %v7917_v9, 8.507059e+37  ;;  %vm3101_vm14 = vweird.f32 %v7063_v52  ;;  %v7928_v9 = vld [vmem:[#allocation60_spill] sm:$0xff] }
 0x58e   : > { %v3288_v61 = vadd.f32 %v3272_v15, %v3256_v44  ;;  %v7291_v1 = vpop.eup %4870  ;;  %4874 = vpow2.f32 %v4196_v16  ;;  %v3078_v33 = vsel %vm7224_vm4, %v6955_v51, %v3073_v41  ;;  %vm2786_vm15 = vcmp.eq.f32.partialorder %v2785_v7, 8.507059e+37 }
 0x58f   : > { %v2544_v46 = vadd.f32 %v2543_v12, %v2495_v23  ;;  %4876 = vrcp.f32 %v7257_v29  ;;  %v2789_v57 = vsel %vm2786_vm15, %v2788_v0, %v2784_v18  ;;  %vm2796_vm0 = vweird.f32 %v6993_v13 }
 0x590   : > { %v2448_v40 = vpop.f32.mrf.mxu1  ;;  %3304 = vst [vmem:[%s5899_s0 + $0x38] sm:$0xff] %v3288_v61  ;;  %v2808_v31 = vsub.f32 1.0, %v2807_v62  ;;  %vm3100_vm1 = vweird.f32 %v7000_v35  ;;  %v2446_v58 = vadd.f32 %v2445_v28, %v2397_v45  ;;  %v2795_v16 = vadd.f32 %v7057_v47, %v2794_v55 }
 0x591   : > { %v3194_v38 = vmul.f32 %v2789_v57, %v2544_v46  ;;  %vm2797_vm2 = vweird.f32 %v7057_v47  ;;  %v3127_v51 = vsub.f32 1.0, %v7288_v32  ;;  %v7304_v37 = vadd.f32 1.0, %v4867_v11  ;;  %vm7363_vm9 = vmor %vm3100_vm1, %vm3101_vm14 }
 0x592   : > { %v3241_v63 = vsub.f32 1.0, %v3078_v33  ;;  %v2802_v15 = vand.u32 2147483648, %v6993_v13  ;;  %4878 = vpow2.f32 %v4181_v27  ;;  %v2400_v7 = vadd.f32 %v2399_v24, %v6717_v30  ;;  %vm7325_vm4 = vmor %vm2796_vm0, %vm2797_vm2 }
 0x593   : > { %v4873_v53 = vpop.eup %4872  ;;  %v3210_v28 = vadd.f32 %v3194_v38, %v2446_v58  ;;  %v2800_v44 = vand.u32 2147483647, %v6993_v13  ;;  %v3273_v41 = vmul.f32 %v3078_v33, %v2569_v50  ;;  %v3088_v48 = vsel %vm7311_vm3, %v6989_v21, %v7120_v25 }
 0x594   : > { %v3257_v11 = vmul.f32 %v4873_v53, %v3241_v63  ;;  %v2497_v12 = vpop.f32.mrf.mxu2  ;;  %v2809_v62 = vmul.f32 %v7125_v5, %v2808_v31  ;;  %v4875_v45 = vpop.eup %4874  ;;  %v2799_v21 = vsel %vm7325_vm4, %v7057_v47, %v2795_v16  ;;  %v2822_v23 = vmul.f32 %v7176_v56, %v7122_v26 }
 0x595   : > { %v2546_v18 = vpop.f32.mrf.mxu3  ;;  %4880 = vtanh.f32 %v3210_v28  ;;  %v2498_v50 = vadd.f32 %v2497_v12, %v6735_v2  ;;  %v2401_v25 = vpop.f32.mrf.mxu0  ;;  %v7925_v24 = vand.u32 2147483647, %v7000_v35  ;;  %v4197_v32 = vmul.f32 -1.442695, %v7928_v9 }
 0x596   : > { %v7336_v13 = vpop.eup %4876  ;;  %v3289_v60 = vadd.f32 %v3273_v41, %v3257_v11  ;;  %v2570_v27 = vunpack.c.h.bf16 %v7234_v10  ;;  %v2803_v61 = vor.u32 1.1754944e-38, %v2802_v15  ;;  %v3093_v47 = vsel %vm7282_vm13, %v7021_v43, %v3088_v48 }
 0x597   : > { %vm7340_vm5 = vcmp.eq.f32.partialorder %v7925_v24, 8.507059e+37  ;;  %v2449_v0 = vadd.f32 %v2448_v40, %v2400_v7  ;;  %v2547_v33 = vadd.f32 %v2546_v18, %v2498_v50  ;;  %vm2801_vm6 = vcmp.eq.f32.partialorder %v2800_v44, 8.507059e+37  ;;  %v7380_v7 = vld [vmem:[%s5890_s2 + $0x28] sm:$0xff]  }
 0x598   : > { %v2450_v46 = vpop.f32.mrf.mxu1  ;;  %v7351_v57 = vadd.f32 %v7138_v3, %v7238_v36  ;;  %vm3116_vm7 = vweird.f32 %v7138_v3  ;;  %3305 = vst [vmem:[%s5899_s0 + $0x40] sm:$0xff] %v3289_v60  ;;  %v2804_v31 = vsel %vm2801_vm6, %v2803_v61, %v2799_v21  ;;  %v2810_v58 = vadd.f32 %v7125_v5, %v2809_v62  ;;  %v4879_v10 = vpop.eup %4878 }
 0x599   : > { %vm2812_vm8 = vweird.f32 %v7125_v5  ;;  %v3128_v54 = vmul.f32 %v7220_v20, %v3127_v51  ;;  %4882 = vrcp.f32 %v7304_v37  ;;  %v3195_v43 = vmul.f32 %v2804_v31, %v2547_v33 }
 0x59a   : > { %v2823_v40 = vsub.f32 1.0, %v2822_v23  ;;  %vm3115_vm10 = vweird.f32 %v7078_v39  ;;  %v7368_v38 = vadd.f32 1.0, %v4875_v45  ;;  %v3242_v16 = vsub.f32 1.0, %v3093_v47 }
 0x59b   : > { %vm2811_vm11 = vweird.f32 %v7048_v19  ;;  %v2817_v51 = vand.u32 2147483648, %v7048_v19  ;;  %v4881_v63 = vpop.eup %4880  ;;  %4884 = vpow2.f32 %v4197_v32  ;;  %v3274_v15 = vmul.f32 %v3093_v47, %v2570_v27  ;;  %vm7426_vm3 = vmor %vm3115_vm10, %vm3116_vm7 }
 0x59c   : > { %v3211_v53 = vadd.f32 %v3195_v43, %v2449_v0  ;;  %vm7374_vm12 = vmor %vm2811_vm11, %vm2812_vm8  ;;  %v2815_v49 = vand.u32 2147483647, %v7048_v19  ;;  %v3258_v28 = vmul.f32 %v4881_v63, %v3242_v16  ;;  %v3103_v44 = vsel %vm7363_vm9, %v7063_v52, %v7169_v8  ;;  %v2499_v11 = vpop.f32.mrf.mxu2 }
 0x59d   : > { %v2548_v41 = vpop.f32.mrf.mxu3  ;;  %v2814_v48 = vsel %vm7374_vm12, %v7125_v5, %v2810_v58  ;;  %v2837_v12 = vmul.f32 %v7291_v1, %v7195_v22  ;;  %v2402_v19 = vadd.f32 %v2401_v25, %v6717_v30  ;;  %v2500_v18 = vadd.f32 %v2499_v11, %v6735_v2  ;;  %v2404_v34 = vpop.f32.mrf.mxu0 }
 0x59e   : > { %4886 = vtanh.f32 %v3211_v53  ;;  %v2824_v62 = vmul.f32 %v7176_v56, %v2823_v40  ;;  %vm7396_vm13 = vcmp.eq.f32.partialorder %v3119_v4, 8.507059e+37  ;;  %v3141_v5 = vmul.f32 %v7336_v13, %v7257_v29 }
 0x59f   : > { %v7402_v8 = vadd.f32 1.0, %v4879_v10  ;;  %v3290_v45 = vadd.f32 %v3274_v15, %v3258_v28  ;;  %v2818_v50 = vor.u32 1.1754944e-38, %v2817_v51  ;;  %v7404_v21 = vpop.eup %4882  ;;  %vm3131_vm14 = vweird.f32 %v7220_v20 }
 0x5a0   : > { %v2571_v25 = vunpack.c.l.bf16 %v7380_v7  ;;  %v3108_v4 = vsel %vm7340_vm5, %v7074_v17, %v3103_v44  ;;  %v2549_v23 = vadd.f32 %v2548_v41, %v2500_v18  ;;  %vm2816_vm15 = vcmp.eq.f32.partialorder %v2815_v49, 8.507059e+37  ;;  %v2453_v24 = vpop.f32.mrf.mxu1 }
 0x5a1   : > { %4888 = vrcp.f32 %v7368_v38  ;;  %3306 = vst [vmem:[%s5899_s0 + $0x48] sm:$0xff] %v3290_v45  ;;  %v2819_v9 = vsel %vm2816_vm15, %v2818_v50, %v2814_v48  ;;  %vm2826_vm0 = vweird.f32 %v7122_v26  ;;  %v2838_v32 = vsub.f32 1.0, %v2837_v12  ;;  %v4885_v60 = vpop.eup %4884 }
 0x5a2   : > { %vm3130_vm1 = vweird.f32 %v7156_v14  ;;  %v2451_v27 = vadd.f32 %v2450_v46, %v2402_v19  ;;  %v3196_v61 = vmul.f32 %v2819_v9, %v2549_v23  ;;  %v2825_v47 = vadd.f32 %v7176_v56, %v2824_v62 }
 0x5a3   : > { %vm2827_vm2 = vweird.f32 %v7176_v56  ;;  %v7418_v17 = vadd.f32 %v7220_v20, %v3128_v54  ;;  %4890 = vrcp.f32 %v7402_v8  ;;  %v3243_v55 = vsub.f32 1.0, %v3108_v4  ;;  %vm7477_vm8 = vmor %vm3130_vm1, %vm3131_vm14 }
 0x5a4   : > { %v2832_v0 = vand.u32 2147483648, %v7122_v26  ;;  %v4887_v33 = vpop.eup %4886  ;;  %v3275_v31 = vmul.f32 %v3108_v4, %v2571_v25  ;;  %v3212_v58 = vadd.f32 %v3196_v61, %v2451_v27  ;;  %v2405_v10 = vadd.f32 %v2404_v34, %v6717_v30  ;;  %v2502_v36 = vpop.f32.mrf.mxu2  ;;  %vm7440_vm4 = vmor %vm2826_vm0, %vm2827_vm2 }
 0x5a5   : > { %v2830_v54 = vand.u32 2147483647, %v7122_v26  ;;  %v3259_v43 = vmul.f32 %v4887_v33, %v3243_v55  ;;  %v3118_v40 = vsel %vm7426_vm3, %v7138_v3, %v7351_v57  ;;  %v2551_v16 = vpop.f32.mrf.mxu3  ;;  %v2839_v51 = vmul.f32 %v7291_v1, %v2838_v32  ;;  %v2406_v11 = vpop.f32.mrf.mxu0 }
 0x5a6   : > { %v2852_v63 = vmul.f32 %v7404_v21, %v7304_v37  ;;  %v3142_v15 = vsub.f32 1.0, %v3141_v5  ;;  %4892 = vtanh.f32 %v3212_v58  ;;  %v2503_v3 = vadd.f32 %v2502_v36, %v6735_v2 }
 0x5a7   : > { %v2829_v57 = vsel %vm7440_vm4, %v7176_v56, %v2825_v47  ;;  %v7451_v53 = vpop.eup %4888  ;;  %vm7455_vm5 = vcmp.eq.f32.partialorder %v3134_v6, 8.507059e+37  ;;  %v7459_v35 = vadd.f32 1.0, %v4885_v60  ;;  %v3291_v49 = vadd.f32 %v3275_v31, %v3259_v43 }
 0x5a8   : > { %v2572_v28 = vunpack.c.h.bf16 %v7380_v7  ;;  %v2833_v44 = vor.u32 1.1754944e-38, %v2832_v0  ;;  %v3123_v41 = vsel %vm7396_vm13, %v7136_v59, %v3118_v40  ;;  %v2454_v56 = vadd.f32 %v2453_v24, %v2405_v10  ;;  %v2455_v59 = vpop.f32.mrf.mxu1  ;;  %v7503_v0 = vld [vmem:[%s5890_s2 + $0x30] sm:$0xff]  }
 0x5a9   : > { %v2552_v48 = vadd.f32 %v2551_v16, %v2503_v3  ;;  %vm2831_vm6 = vcmp.eq.f32.partialorder %v2830_v54, 8.507059e+37  ;;  %v7465_v12 = vpop.eup %4890  ;;  %3307 = vst [vmem:[%s5899_s0 + $0x50] sm:$0xff] %v3291_v49  ;;  %v2840_v19 = vadd.f32 %v7291_v1, %v2839_v51  ;;  %vm2842_vm7 = vweird.f32 %v7291_v1 }
 0x5aa   : > { %v2834_v6 = vsel %vm2831_vm6, %v2833_v44, %v2829_v57  ;;  %v2853_v18 = vsub.f32 1.0, %v2852_v63  ;;  %v3143_v7 = vmul.f32 %v7336_v13, %v3142_v15  ;;  %v3149_v34 = vand.u32 2147483647, %v7257_v29 }
 0x5ab   : > { %v3151_v62 = vand.u32 2147483648, %v7257_v29  ;;  %v3197_v52 = vmul.f32 %v2834_v6, %v2552_v48  ;;  %vm3145_vm9 = vweird.f32 %v7257_v29  ;;  %v3156_v45 = vmul.f32 %v7451_v53, %v7368_v38 }
 0x5ac   : > { %v3244_v50 = vsub.f32 1.0, %v3123_v41  ;;  %vm2841_vm10 = vweird.f32 %v7195_v22  ;;  %v2847_v25 = vand.u32 2147483648, %v7195_v22  ;;  %v4893_v4 = vpop.eup %4892  ;;  %4894 = vrcp.f32 %v7459_v35  ;;  %v2504_v27 = vpop.f32.mrf.mxu2 }
 0x5ad   : > { %v3276_v23 = vmul.f32 %v3123_v41, %v2572_v28  ;;  %v3213_v14 = vadd.f32 %v3197_v52, %v2454_v56  ;;  %vm7489_vm11 = vmor %vm2841_vm10, %vm2842_vm7  ;;  %v2845_v9 = vand.u32 2147483647, %v7195_v22  ;;  %v3133_v60 = vsel %vm7477_vm8, %v7220_v20, %v7418_v17  ;;  %v2553_v61 = vpop.f32.mrf.mxu3  ;;  %v2409_v40 = vpop.f32.mrf.mxu0 }
 0x5ae   : > { %v3260_v32 = vmul.f32 %v4893_v4, %v3244_v50  ;;  %v2844_v47 = vsel %vm7489_vm11, %v7291_v1, %v2840_v19  ;;  %v2854_v55 = vmul.f32 %v7404_v21, %v2853_v18  ;;  %v2407_v22 = vadd.f32 %v2406_v11, %v6717_v30 }
 0x5af   : > { %4896 = vtanh.f32 %v3213_v14  ;;  %v2505_v33 = vadd.f32 %v2504_v27, %v6735_v2  ;;  %v2867_v46 = vmul.f32 %v7465_v12, %v7402_v8  ;;  %v3144_v20 = vadd.f32 %v7336_v13, %v3143_v7 }
 0x5b0   : > { %vm3146_vm12 = vweird.f32 %v7336_v13  ;;  %v3292_v17 = vadd.f32 %v3276_v23, %v3260_v32  ;;  %v2848_v31 = vor.u32 1.1754944e-38, %v2847_v25  ;;  %v3157_v58 = vsub.f32 1.0, %v3156_v45  ;;  %v2458_v41 = vpop.f32.mrf.mxu1 }
 0x5b1   : > { %v3138_v1 = vsel %vm7455_vm5, %v7228_v42, %v3133_v60  ;;  %v2554_v10 = vadd.f32 %v2553_v61, %v2505_v33  ;;  %vm2846_vm13 = vcmp.eq.f32.partialorder %v2845_v9, 8.507059e+37  ;;  %v2573_v54 = vunpack.c.l.bf16 %v7503_v0  ;;  %vm7530_vm1 = vmor %vm3145_vm9, %vm3146_vm12 }
 0x5b2   : > { %3308 = vst [vmem:[%s5899_s0 + $0x58] sm:$0xff] %v3292_v17  ;;  %v2849_v43 = vsel %vm2846_vm13, %v2848_v31, %v2844_v47  ;;  %vm2856_vm14 = vweird.f32 %v7304_v37  ;;  %vm2857_vm15 = vweird.f32 %v7404_v21  ;;  %v7518_v36 = vpop.eup %4894  ;;  %v2456_v16 = vadd.f32 %v2455_v59, %v2407_v22 }
 0x5b3   : > { %v3198_v39 = vmul.f32 %v2849_v43, %v2554_v10  ;;  %v2855_v51 = vadd.f32 %v7404_v21, %v2854_v55  ;;  %v2868_v63 = vsub.f32 1.0, %v2867_v46  ;;  %vm7521_vm0 = vcmp.eq.f32.partialorder %v3149_v34, 8.507059e+37  ;;  %vm7546_vm2 = vmor %vm2856_vm14, %vm2857_vm15 }
 0x5b4   : > { %v3152_v15 = vor.u32 1.1754944e-38, %v3151_v62  ;;  %v3245_v3 = vsub.f32 1.0, %v3138_v1  ;;  %v2862_v57 = vand.u32 2147483648, %v7304_v37  ;;  %v3158_v28 = vmul.f32 %v7451_v53, %v3157_v58  ;;  %v2507_v18 = vpop.f32.mrf.mxu2 }
 0x5b5   : > { %v4897_v26 = vpop.eup %4896  ;;  %v3214_v44 = vadd.f32 %v3198_v39, %v2456_v16  ;;  %v2410_v11 = vadd.f32 %v2409_v40, %v6717_v30  ;;  %v2860_v56 = vand.u32 2147483647, %v7304_v37  ;;  %v3171_v48 = vmul.f32 %v7518_v36, %v7459_v35  ;;  %v2556_v7 = vpop.f32.mrf.mxu3 }
 0x5b6   : > { %v3261_v6 = vmul.f32 %v4897_v26, %v3245_v3  ;;  %v3277_v19 = vmul.f32 %v3138_v1, %v2573_v54  ;;  %v3148_v29 = vsel %vm7530_vm1, %v7336_v13, %v3144_v20  ;;  %v2508_v62 = vadd.f32 %v2507_v18, %v6735_v2  ;;  %v2411_v27 = vpop.f32.mrf.mxu0  ;;  %v1661_v1 = vld [vmem:[%s5890_s2 + $0x38] sm:$0xff]  }
 0x5b7   : > { %4898 = vtanh.f32 %v3214_v44  ;;  %v2859_v52 = vsel %vm7546_vm2, %v7404_v21, %v2855_v51  ;;  %v2869_v13 = vmul.f32 %v7465_v12, %v2868_v63  ;;  %vm3161_vm3 = vweird.f32 %v7451_v53 }
 0x5b8   : > { %v3166_v59 = vand.u32 2147483648, %v7368_v38  ;;  %v3293_v5 = vadd.f32 %v3277_v19, %v3261_v6  ;;  %v2863_v37 = vor.u32 1.1754944e-38, %v2862_v57  ;;  %v3153_v45 = vsel %vm7521_vm0, %v3152_v15, %v3148_v29  ;;  %v2460_v43 = vpop.f32.mrf.mxu1 }
 0x5b9   : > { %v2459_v50 = vadd.f32 %v2458_v41, %v2410_v11  ;;  %v2557_v25 = vadd.f32 %v2556_v7, %v2508_v62  ;;  %vm2861_vm4 = vcmp.eq.f32.partialorder %v2860_v56, 8.507059e+37  ;;  %v3159_v4 = vadd.f32 %v7451_v53, %v3158_v28 }
 0x5ba   : > { %v3172_v23 = vsub.f32 1.0, %v3171_v48  ;;  %3309 = vst [vmem:[%s5899_s0 + $0x60] sm:$0xff] %v3293_v5  ;;  %v2574_v21 = vunpack.c.h.bf16 %v7503_v0  ;;  %v2864_v14 = vsel %vm2861_vm4, %v2863_v37, %v2859_v52  ;;  %v2870_v9 = vadd.f32 %v7465_v12, %v2869_v13 }
 0x5bb   : > { %v3199_v24 = vmul.f32 %v2864_v14, %v2557_v25  ;;  %vm2872_vm5 = vweird.f32 %v7465_v12  ;;  %vm3160_vm6 = vweird.f32 %v7368_v38  ;;  %v3164_v32 = vand.u32 2147483647, %v7368_v38 }
 0x5bc   : > { %v3246_v60 = vsub.f32 1.0, %v3153_v45  ;;  %v2877_v61 = vand.u32 2147483648, %v7402_v8  ;;  %vm7569_vm7 = vmor %vm3160_vm6, %vm3161_vm3  ;;  %v3167_v0 = vor.u32 1.1754944e-38, %v3166_v59  ;;  %vm2871_vm8 = vweird.f32 %v7402_v8  ;;  %v2509_v31 = vpop.f32.mrf.mxu2 }
 0x5bd   : > { %v4899_v47 = vpop.eup %4898  ;;  %v3215_v22 = vadd.f32 %v3199_v24, %v2459_v50  ;;  %v2875_v33 = vand.u32 2147483647, %v7402_v8  ;;  %v3173_v38 = vmul.f32 %v7518_v36, %v3172_v23  ;;  %v3278_v20 = vmul.f32 %v3153_v45, %v2574_v21  ;;  %vm7581_vm9 = vmor %vm2871_vm8, %vm2872_vm5  ;;  %v2558_v40 = vpop.f32.mrf.mxu3 }
 0x5be   : > { %v3262_v46 = vmul.f32 %v4899_v47, %v3246_v60  ;;  %v3163_v17 = vsel %vm7569_vm7, %v7451_v53, %v3159_v4  ;;  %v2412_v8 = vadd.f32 %v2411_v27, %v6717_v30  ;;  %v2510_v10 = vadd.f32 %v2509_v31, %v6735_v2 }
 0x5bf   : > { %4900 = vtanh.f32 %v3215_v22  ;;  %v2874_v54 = vsel %vm7581_vm9, %v7465_v12, %v2870_v9  ;;  %vm3165_vm10 = vcmp.eq.f32.partialorder %v3164_v32, 8.507059e+37  ;;  %v2878_v16 = vor.u32 1.1754944e-38, %v2877_v61 }
 0x5c0   : > { %v3294_v53 = vadd.f32 %v3278_v20, %v3262_v46  ;;  %v3168_v39 = vsel %vm3165_vm10, %v3167_v0, %v3163_v17  ;;  %v2559_v51 = vadd.f32 %v2558_v40, %v2510_v10  ;;  %vm2876_vm11 = vcmp.eq.f32.partialorder %v2875_v33, 8.507059e+37 }
 0x5c1   : > { %v3174_v63 = vadd.f32 %v7518_v36, %v3173_v38  ;;  %vm3176_vm12 = vweird.f32 %v7518_v36  ;;  %v2575_v30 = vunpack.c.l.bf16 %v1661_v1  ;;  %v2879_v42 = vsel %vm2876_vm11, %v2878_v16, %v2874_v54 }
 0x5c2   : > { %3310 = vst [vmem:[%s5899_s0 + $0x68] sm:$0xff] %v3294_v53  ;;  %v3181_v2 = vand.u32 2147483648, %v7459_v35  ;;  %v2461_v15 = vadd.f32 %v2460_v43, %v2412_v8  ;;  %v3200_v12 = vmul.f32 %v2879_v42, %v2559_v51  ;;  %vm3175_vm13 = vweird.f32 %v7459_v35 }
 0x5c3   : > { %v3179_v3 = vand.u32 2147483647, %v7459_v35  ;;  %v3247_v57 = vsub.f32 1.0, %v3168_v39  ;;  %vm3177_vm14 = vmor %vm3175_vm13, %vm3176_vm12  ;;  %v3279_v44 = vmul.f32 %v3168_v39, %v2575_v30  ;;  %v2576_v6 = vunpack.c.h.bf16 %v1661_v1 }
 0x5c4   : > { %v3216_v49 = vadd.f32 %v3200_v12, %v2461_v15  ;;  %v3178_v11 = vsel %vm3177_vm14, %v7518_v36, %v3174_v63  ;;  %v3182_v41 = vor.u32 1.1754944e-38, %v3181_v2 }
 0x5c5   : > { %v4901_v26 = vpop.eup %4900  ;;  %vm3180_vm15 = vcmp.eq.f32.partialorder %v3179_v3, 8.507059e+37 }
 0x5c6   : > { %v3263_v28 = vmul.f32 %v4901_v26, %v3247_v57  ;;  %4902 = vtanh.f32 %v3216_v49  ;;  %v3183_v48 = vsel %vm3180_vm15, %v3182_v41, %v3178_v11 }
 0x5c7   : > { %v3248_v19 = vsub.f32 1.0, %v3183_v48  ;;  %v3280_v35 = vmul.f32 %v3183_v48, %v2576_v6 }
 0x5c8   : > { %v3295_v56 = vadd.f32 %v3279_v44, %v3263_v28 }
 0x5ca   : > { %3311 = vst [vmem:[%s5899_s0 + $0x70] sm:$0xff] %v3295_v56 }
 0x5cc   : > { %v4903_v29 = vpop.eup %4902 }
 0x5cd   : > { %v3264_v18 = vmul.f32 %v4903_v29, %v3248_v19 }
 0x5cf   : > { %v3296_v7 = vadd.f32 %v3280_v35, %v3264_v18 }
 0x5d1   : > { %3312 = vst [vmem:[%s5899_s0 + $0x78] sm:$0xff] %v3296_v7 }
 0x5d2 PF: > { %s7955_s8 = sld [smem:[#allocation44_spill]]  ;;  %s3326_s11 = sshll.u32 %s5899_s0, 4  ;;  %s3327_s11 = int_to_ptr.vmem [resolvable:$true] %s3326_s11 }
 0x5d3   : > { %s7956_s29 = sld [smem:[#allocation69_spill]]  ;;  %s3314_s17 = scalar_lea.sflag [#allocation7], %s5886_s27 }
 0x5d8   : > { %s4342_s12 = sshll.u32 %s7955_s8, 7 }
 0x5d9   : > { %s7957_s4 = smov %s7956_s29  ;;  %s3325_s20 = scalar_lea.hbm %s7956_s29, %s4342_s12 }
 0x5da   : > { %s3328_s21 = sshll.u32 %s3325_s20, 4  ;;  %s5164_s2 = scalar_lea.hbm %s7957_s4, 384  ;;  %s3329_s21 = int_to_ptr.hbm [resolvable:$true] %s3328_s21 }
 0x5db   : > { %s5158_s7 = sshra.s32 %s3329_s21, 4  ;;  %s5159_s7 = int_to_ptr.hbm [resolvable:$true] %s5158_s7 }
 0x5dc   : > { %s5160_s5 = scalar_lea.hbm %s5159_s7, 128  ;;  %p5165_p5 = scmp.lt.s32.totalorder %s5159_s7, %s7957_s4 }
 0x5dd   : > { %p5161_p13 = scmp.ne.s32.totalorder %s5159_s7, %s5160_s5  ;;  %p5166_p3 = scmp.lt.s32.totalorder %s5164_s2, %s5160_s5 }
 0x5df   : > { %p5162_p8 = pnand %p5161_p13, %p5816_p6  ;;  %p5167_p9 = por %p5166_p3, %p5165_p5 }
 0x5e1   : > { %p5163_p4 = pneg %p5162_p8 }
 0x5e3   : > { %p5168_p10 = pnand %p5167_p9, %p5163_p4 }
 0x5e5   : > { %5171 = shalt.err (!%p5168_p10)
}
 0x5e6   : > { %s5391_s27 = smov 128   ;;  %s5392_s15 = smov 8  }
 0x5e7   : > { %4525 = dma.vmem_to_hbm [thread:$0]  (%p5816_p6), %s3327_s11, 2048, %s3329_s21, %s3314_s17, %s5391_s27, %s5391_s27, %s5392_s15  }
 0x5e8 PF: > { %s7958_s0 = sld [smem:[#allocation29_spill]]  ;;  %p4557_p1 = scmp.ge.s32.totalorder %s5382_s26, 2 }
 0x5ea   : > { %p4553_p0 = pnand %p4557_p1, %p5820_p7 }
 0x5ec   : > { %p4554_p12 = pneg %p4553_p0 }
 0x5ee   : > { %s3343_s6 = sand.u32 1, %s7958_s0  }
 0x5ef   : > { %s3344_s18 = scalar_lea.sflag [#allocation7], %s3343_s6 }
 0x5f0   : > { %5293 = dma.done.wait (%p4554_p12), %s3344_s18, 2048  }
 0x5f1   : > { %5295 = vsyncadd (%p4554_p12), %s3344_s18, 4294965248  ;;  %s36_s26 = sadd.s32 1, %s5382_s26   ;;  %s7961_s27 = sld [smem:[#allocation30_spill]] }
 0x5f2   : > { %p7621_p11 = scmp.ge.s32.totalorder %s36_s26, 14   ;;  %s7962_s28 = sld [smem:[#allocation31_spill]] }
 0x5f3   : > { %s7963_s30 = sld [smem:[#allocation33_spill]]  ;;  %s7975_s29 = smov %s5802_s3 }
 0x5f4   : > { %s7964_s9 = sld [smem:[#allocation34_spill]]  ;;  %s7979_s10 = smov %s5771_s13 }
 0x5f5   : > { %s7965_s11 = sld [smem:[#allocation35_spill]]  ;;  %s7982_s21 = smov %s5374_s24 }
 0x5f6   : > { %s7966_s12 = sld [smem:[#allocation36_spill]]  ;;  %s7983_s22 = smov %s5378_s25 }
 0x5f7   : > { %s7967_s14 = sld [smem:[#allocation52_spill]] }
 0x5f8   : > { %s7968_s1 = sld [smem:[#allocation37_spill]] }
 0x5f9   : > { %s7969_s15 = sld [smem:[#allocation38_spill]] }
 0x5fa   : > { %s7970_s16 = sld [smem:[#allocation53_spill]] }
 0x5fb   : > { %s7971_s17 = sld [smem:[#allocation40_spill]] }
 0x5fc   : > { %s7972_s18 = sld [smem:[#allocation41_spill]] }
 0x5fd   : > { %s7973_s19 = sld [smem:[#allocation54_spill]]  ;;  %s7980_s13 = smov %s7967_s14 }
 0x5fe   : > { %s7974_s20 = sld [smem:[#allocation45_spill]]  ;;  %s7981_s14 = smov %s7968_s1 }
 0x5ff   : > { %s7976_s23 = sld [smem:[#allocation46_spill]] }
 0x600   : > { %s7977_s7 = sld [smem:[#allocation50_spill]] }
 0x601   : > { %s7978_s5 = sld [smem:[#allocation47_spill]] }
 0x603   :  { %35 = sbr.rel (!%p7621_p11) target bundleno = 32 (0x20), region = 202 }
 0x606   : > { %s7984_s24 = smov %s7977_s7 }
 0x607   : > { %s7985_s25 = smov %s7978_s5 }
 0x608   :  { %3350 = vsyncpa [#allocation6], 1 }
 0x609   :  { %3352 = vsyncpa [#allocation6 + $0x1], 1 }
 0x60a   :  { %3353 = vsyncpa [#allocation9], 1 }
 0x60b   :  { %3355 = vsyncpa [#allocation9 + $0x1], 1 }
 0x60c   :  { %3356 = vsyncpa [#allocation12], 1 }
 0x60d   :  { %3358 = vsyncpa [#allocation12 + $0x1], 1 }
 0x60e   :  { %3359 = vsyncpa [#allocation15], 1 }
 0x60f   :  { %3361 = vsyncpa [#allocation15 + $0x1], 1 }
 0x610   :  { %3362 = vsyncpa [#allocation18], 1 }
 0x611   :  { %3364 = vsyncpa [#allocation18 + $0x1], 1 }
 0x612   :  { %3365 = vsyncpa [#allocation7], 1 }
 0x613   :  { %3367 = vsyncpa [#allocation7 + $0x1], 1 }

</bundles_post_ra>
